<compile_context>
chip_gen: v6e
topology: v6e:2x2x1
jax: 0.10.0
libtpu: 0.0.40
codegen_flags: <defaults>
</compile_context>

<pallas_src>
import jax
import jax.numpy as jnp
from jax import lax
from jax.experimental import pallas as pl
from jax.experimental.pallas import tpu as pltpu


def _conv_stats_kernel(xp_ref, w_ref, conv_ref, sum_ref, sqsum_ref, patch_ref):
    # xp_ref   : (1, H+6, W+6, Cin)  shared pad-3 input tile (one image), NHWC
    # w_ref    : (2*Cout, 18*Cin)    block-diagonal fused weights (both branches)
    # conv_ref : (1, 2*Cout, H*W)    conv output tile, channels-major, lane-dense
    # sum_ref  : (1, 2*Cout, 1)      per-tile per-channel sum
    # sqsum_ref: (1, 2*Cout, 1)      per-tile per-channel sum of squares
    # patch_ref: (H*W, 18*Cin)       VMEM scratch: im2col patches for this tile
    Hp = xp_ref.shape[1]
    Wp = xp_ref.shape[2]
    Cin = xp_ref.shape[3]
    H = Hp - 6
    W = Wp - 6
    HW = H * W

    # im2col: 18 shifted slices (9 taps x 2 dilations) stored into the scratch.
    # Shared pad=3 input: dilation-2 branch uses base offset 1, dilation-3 uses 0.
    # The (1,H,W,Cin)->(HW,Cin) reshape only folds major dims into the sublane
    # dim (lane dim Cin unchanged), so it is layout-free for W % 8 == 0.
    tap = 0
    for dil, base in ((2, 1), (3, 0)):
        for ky in range(3):
            for kx in range(3):
                r0 = base + ky * dil
                c0 = base + kx * dil
                sl = xp_ref[:, r0:r0 + H, c0:c0 + W, :]          # (1, H, W, Cin)
                patch_ref[:, tap * Cin:(tap + 1) * Cin] = sl.reshape(HW, Cin)
                tap += 1

    # One fused MXU call for both branches and all taps (q.k^T-style contraction
    # on the trailing dims): (2*Cout, 18*Cin) . (H*W, 18*Cin)^T -> (2*Cout, H*W).
    conv = lax.dot_general(
        w_ref[...], patch_ref[...],
        dimension_numbers=(((1,), (1,)), ((), ())),
        preferred_element_type=jnp.float32)

    conv_ref[0] = conv
    sum_ref[0] = jnp.sum(conv, axis=1, keepdims=True)
    sqsum_ref[0] = jnp.sum(conv * conv, axis=1, keepdims=True)


def _bn_mish_kernel(conv_ref, scale_ref, shift_ref, o_ref):
    # conv_ref: (1, 2*Cout, H*W); scale/shift: (2*Cout, 1); o_ref like conv_ref
    xhat = conv_ref[0] * scale_ref[...] + shift_ref[...]        # folded BN: 1 FMA
    # Mish(x) = x * tanh(softplus(x)) == x * u / (u + 2),  u = t*(t+2), t = exp(x).
    # Single exp (EUP) + approximate reciprocal (EUP slot, ~free); clamp keeps the
    # exp finite -- for x > 20 the exact result is x anyway.
    t = jnp.exp(jnp.minimum(xhat, 20.0))
    u = t * (t + 2.0)
    y = xhat * u * pl.reciprocal(u + 2.0, approx=True)
    o_ref[0] = y.astype(o_ref.dtype)


@jax.jit
def double_dilated_conv(x_nchw, w1, w2):
    """x_nchw: (N, Cin, H, W); w1, w2: (Cout, Cin, 3, 3) PyTorch OIHW layout."""
    N, Cin, H, W = x_nchw.shape
    Cout = w1.shape[0]
    HW = H * W
    C2 = 2 * Cout
    K = 18 * Cin
    Hp, Wp = H + 6, W + 6

    # Single shared padded input (pad=3 serves both dilations), NHWC.
    x = jnp.transpose(x_nchw, (0, 2, 3, 1))
    xp = jnp.pad(x, ((0, 0), (3, 3), (3, 3), (0, 0))).astype(jnp.float32)

    # Block-diagonal fused weight: rows [0:Cout] = conv1 (dil 2), rows [Cout:] =
    # conv2 (dil 3). Column order matches the im2col tap order (branch, ky, kx, cin).
    w1f = jnp.transpose(w1, (0, 2, 3, 1)).reshape(Cout, 9 * Cin).astype(jnp.float32)
    w2f = jnp.transpose(w2, (0, 2, 3, 1)).reshape(Cout, 9 * Cin).astype(jnp.float32)
    w_all = jnp.zeros((C2, K), jnp.float32)
    w_all = w_all.at[:Cout, :9 * Cin].set(w1f)
    w_all = w_all.at[Cout:, 9 * Cin:].set(w2f)

    cparams = pltpu.CompilerParams(
        dimension_semantics=("parallel",),          # shard batch across TCs (v7x)
        vmem_limit_bytes=32 * 1024 * 1024)

    # ---- Pass 1: fused dilated convs + per-tile BN statistics (tiled over N) ----
    conv, tsum, tsq = pl.pallas_call(
        _conv_stats_kernel,
        grid=(N,),
        in_specs=[
            pl.BlockSpec((1, Hp, Wp, Cin), lambda n: (n, 0, 0, 0)),
            pl.BlockSpec((C2, K), lambda n: (0, 0)),     # resident across the grid
        ],
        out_specs=(
            pl.BlockSpec((1, C2, HW), lambda n: (n, 0, 0)),
            pl.BlockSpec((1, C2, 1), lambda n: (n, 0, 0)),
            pl.BlockSpec((1, C2, 1), lambda n: (n, 0, 0)),
        ),
        out_shape=(
            jax.ShapeDtypeStruct((N, C2, HW), jnp.float32),
            jax.ShapeDtypeStruct((N, C2, 1), jnp.float32),
            jax.ShapeDtypeStruct((N, C2, 1), jnp.float32),
        ),
        scratch_shapes=[pltpu.VMEM((HW, K), jnp.float32)],
        compiler_params=cparams,
    )(xp, w_all)

    # Tiny per-channel reduction of the partial stats (training-mode BN: batch
    # stats, biased variance E[x^2]-mean^2, eps=1e-5, gamma=1, beta=0) folded
    # into a single scale/shift so pass 2 needs one FMA per element.
    count = float(N * H * W)
    mean = jnp.sum(tsum, axis=0) / count                         # (2*Cout, 1)
    var = jnp.maximum(jnp.sum(tsq, axis=0) / count - mean * mean, 0.0)
    scale = lax.rsqrt(var + 1e-5)                                # (2*Cout, 1)
    shift = -mean * scale                                        # (2*Cout, 1)

    # ---- Pass 2: folded BN + Mish (tiled over N, lane-dense loads/stores) ----
    y = pl.pallas_call(
        _bn_mish_kernel,
        grid=(N,),
        in_specs=[
            pl.BlockSpec((1, C2, HW), lambda n: (n, 0, 0)),
            pl.BlockSpec((C2, 1), lambda n: (0, 0)),
            pl.BlockSpec((C2, 1), lambda n: (0, 0)),
        ],
        out_specs=pl.BlockSpec((1, C2, HW), lambda n: (n, 0, 0)),
        out_shape=jax.ShapeDtypeStruct((N, C2, HW), x_nchw.dtype),
        compiler_params=cparams,
    )(conv, scale, shift)

    # (N, 2*Cout, H*W) is already NCHW channel order [conv1 | conv2]; unflatten
    # (contiguous reshape, free).
    return y.reshape(N, C2, H, W)


def _reference(x_nchw, w1, w2):
    """Pure-JAX reference mirroring the PyTorch forward (training-mode BN)."""
    def branch(w, dil, pad):
        y = lax.conv_general_dilated(
            x_nchw, w, window_strides=(1, 1),
            padding=((pad, pad), (pad, pad)),
            rhs_dilation=(dil, dil),
            dimension_numbers=("NCHW", "OIHW", "NCHW"))
        mean = jnp.mean(y, axis=(0, 2, 3), keepdims=True)
        var = jnp.mean((y - mean) ** 2, axis=(0, 2, 3), keepdims=True)
        xhat = (y - mean) * lax.rsqrt(var + 1e-5)
        return xhat * jnp.tanh(jnp.log1p(jnp.exp(xhat)))
    return jnp.concatenate([branch(w1, 2, 2), branch(w2, 3, 3)], axis=1)


if __name__ == "__main__":
    in_channels, out_channels = 4, 8
    N, H, W = 2, 16, 16

    key = jax.random.PRNGKey(0)
    kx, k1, k2 = jax.random.split(key, 3)
    x = jax.random.normal(kx, (N, in_channels, H, W), dtype=jnp.float32)
    w1 = jax.random.normal(k1, (out_channels, in_channels, 3, 3),
                           dtype=jnp.float32) * 0.1
    w2 = jax.random.normal(k2, (out_channels, in_channels, 3, 3),
                           dtype=jnp.float32) * 0.1

    out = jax.block_until_ready(double_dilated_conv(x, w1, w2))
    assert out.shape == (N, 2 * out_channels, H, W), out.shape

    ref = jax.block_until_ready(_reference(x, w1, w2))
    # Tolerance allows ~1e-3 from the approximate EUP reciprocal in Mish.
    assert jnp.allclose(out, ref, atol=3e-3, rtol=3e-3), float(
        jnp.max(jnp.abs(out - ref)))

    print("KERNEL_OK")
</pallas_src>

<mosaic_0001>
module attributes {stable_mosaic.version = 11 : i64} {
  func.func @_conv_stats_kernel(%arg0: i32, %arg1: memref<1x22x22x4xf32, #tpu.memory_space<vmem>>, %arg2: memref<16x72xf32, #tpu.memory_space<vmem>>, %arg3: memref<1x16x256xf32, #tpu.memory_space<vmem>>, %arg4: memref<1x16x1xf32, #tpu.memory_space<vmem>>, %arg5: memref<1x16x1xf32, #tpu.memory_space<vmem>>, %arg6: memref<256x72xf32, #tpu.memory_space<vmem>>) attributes {dimension_semantics = [#tpu.dimension_semantics<parallel>], iteration_bounds = array<i64: 2>, scalar_prefetch = 0 : i64, scratch_operands = 1 : i64, tpu.core_type = #tpu.core_type<tc>, window_params = [{transform_indices = @transform_0, window_bounds = array<i64: 1, 22, 22, 4>}, {pipeline_mode = #tpu.pipeline_mode<synchronous>, transform_indices = @transform_1, window_bounds = array<i64: 16, 72>}, {transform_indices = @transform_2, window_bounds = array<i64: 1, 16, 256>}, {transform_indices = @transform_3, window_bounds = array<i64: 1, 16, 1>}, {transform_indices = @transform_4, window_bounds = array<i64: 1, 16, 1>}]} {
    %c0 = arith.constant 0 : index
    %c1 = arith.constant 1 : index
    %c1_0 = arith.constant 1 : index
    %c0_1 = arith.constant 0 : index
    %0 = vector.load %arg1[%c0, %c1, %c1_0, %c0_1] : memref<1x22x22x4xf32, #tpu.memory_space<vmem>>, vector<1x16x16x4xf32>
    %1 = vector.shape_cast %0 : vector<1x16x16x4xf32> to vector<256x4xf32>
    %c0_2 = arith.constant 0 : index
    %c0_3 = arith.constant 0 : index
    %2 = vector.load %arg6[%c0_2, %c0_3] : memref<256x72xf32, #tpu.memory_space<vmem>>, vector<256x4xf32>
    tpu.vector_store %arg6[%c0_2, %c0_3], %1 {strides = array<i32>} : memref<256x72xf32, #tpu.memory_space<vmem>>, vector<256x4xf32>,
    %c0_4 = arith.constant 0 : index
    %c1_5 = arith.constant 1 : index
    %c3 = arith.constant 3 : index
    %c0_6 = arith.constant 0 : index
    %3 = vector.load %arg1[%c0_4, %c1_5, %c3, %c0_6] : memref<1x22x22x4xf32, #tpu.memory_space<vmem>>, vector<1x16x16x4xf32>
    %4 = vector.shape_cast %3 : vector<1x16x16x4xf32> to vector<256x4xf32>
    %c0_7 = arith.constant 0 : index
    %c4 = arith.constant 4 : index
    %5 = vector.load %arg6[%c0_7, %c4] : memref<256x72xf32, #tpu.memory_space<vmem>>, vector<256x4xf32>
    tpu.vector_store %arg6[%c0_7, %c4], %4 {strides = array<i32>} : memref<256x72xf32, #tpu.memory_space<vmem>>, vector<256x4xf32>,
    %c0_8 = arith.constant 0 : index
    %c1_9 = arith.constant 1 : index
    %c5 = arith.constant 5 : index
    %c0_10 = arith.constant 0 : index
    %6 = vector.load %arg1[%c0_8, %c1_9, %c5, %c0_10] : memref<1x22x22x4xf32, #tpu.memory_space<vmem>>, vector<1x16x16x4xf32>
    %7 = vector.shape_cast %6 : vector<1x16x16x4xf32> to vector<256x4xf32>
    %c0_11 = arith.constant 0 : index
    %c8 = arith.constant 8 : index
    %8 = vector.load %arg6[%c0_11, %c8] : memref<256x72xf32, #tpu.memory_space<vmem>>, vector<256x4xf32>
    tpu.vector_store %arg6[%c0_11, %c8], %7 {strides = array<i32>} : memref<256x72xf32, #tpu.memory_space<vmem>>, vector<256x4xf32>,
    %c0_12 = arith.constant 0 : index
    %c3_13 = arith.constant 3 : index
    %c1_14 = arith.constant 1 : index
    %c0_15 = arith.constant 0 : index
    %9 = vector.load %arg1[%c0_12, %c3_13, %c1_14, %c0_15] : memref<1x22x22x4xf32, #tpu.memory_space<vmem>>, vector<1x16x16x4xf32>
    %10 = vector.shape_cast %9 : vector<1x16x16x4xf32> to vector<256x4xf32>
    %c0_16 = arith.constant 0 : index
    %c12 = arith.constant 12 : index
    %11 = vector.load %arg6[%c0_16, %c12] : memref<256x72xf32, #tpu.memory_space<vmem>>, vector<256x4xf32>
    tpu.vector_store %arg6[%c0_16, %c12], %10 {strides = array<i32>} : memref<256x72xf32, #tpu.memory_space<vmem>>, vector<256x4xf32>,
    %c0_17 = arith.constant 0 : index
    %c3_18 = arith.constant 3 : index
    %c3_19 = arith.constant 3 : index
    %c0_20 = arith.constant 0 : index
    %12 = vector.load %arg1[%c0_17, %c3_18, %c3_19, %c0_20] : memref<1x22x22x4xf32, #tpu.memory_space<vmem>>, vector<1x16x16x4xf32>
    %13 = vector.shape_cast %12 : vector<1x16x16x4xf32> to vector<256x4xf32>
    %c0_21 = arith.constant 0 : index
    %c16 = arith.constant 16 : index
    %14 = vector.load %arg6[%c0_21, %c16] : memref<256x72xf32, #tpu.memory_space<vmem>>, vector<256x4xf32>
    tpu.vector_store %arg6[%c0_21, %c16], %13 {strides = array<i32>} : memref<256x72xf32, #tpu.memory_space<vmem>>, vector<256x4xf32>,
    %c0_22 = arith.constant 0 : index
    %c3_23 = arith.constant 3 : index
    %c5_24 = arith.constant 5 : index
    %c0_25 = arith.constant 0 : index
    %15 = vector.load %arg1[%c0_22, %c3_23, %c5_24, %c0_25] : memref<1x22x22x4xf32, #tpu.memory_space<vmem>>, vector<1x16x16x4xf32>
    %16 = vector.shape_cast %15 : vector<1x16x16x4xf32> to vector<256x4xf32>
    %c0_26 = arith.constant 0 : index
    %c20 = arith.constant 20 : index
    %17 = vector.load %arg6[%c0_26, %c20] : memref<256x72xf32, #tpu.memory_space<vmem>>, vector<256x4xf32>
    tpu.vector_store %arg6[%c0_26, %c20], %16 {strides = array<i32>} : memref<256x72xf32, #tpu.memory_space<vmem>>, vector<256x4xf32>,
    %c0_27 = arith.constant 0 : index
    %c5_28 = arith.constant 5 : index
    %c1_29 = arith.constant 1 : index
    %c0_30 = arith.constant 0 : index
    %18 = vector.load %arg1[%c0_27, %c5_28, %c1_29, %c0_30] : memref<1x22x22x4xf32, #tpu.memory_space<vmem>>, vector<1x16x16x4xf32>
    %19 = vector.shape_cast %18 : vector<1x16x16x4xf32> to vector<256x4xf32>
    %c0_31 = arith.constant 0 : index
    %c24 = arith.constant 24 : index
    %20 = vector.load %arg6[%c0_31, %c24] : memref<256x72xf32, #tpu.memory_space<vmem>>, vector<256x4xf32>
    tpu.vector_store %arg6[%c0_31, %c24], %19 {strides = array<i32>} : memref<256x72xf32, #tpu.memory_space<vmem>>, vector<256x4xf32>,
    %c0_32 = arith.constant 0 : index
    %c5_33 = arith.constant 5 : index
    %c3_34 = arith.constant 3 : index
    %c0_35 = arith.constant 0 : index
    %21 = vector.load %arg1[%c0_32, %c5_33, %c3_34, %c0_35] : memref<1x22x22x4xf32, #tpu.memory_space<vmem>>, vector<1x16x16x4xf32>
    %22 = vector.shape_cast %21 : vector<1x16x16x4xf32> to vector<256x4xf32>
    %c0_36 = arith.constant 0 : index
    %c28 = arith.constant 28 : index
    %23 = vector.load %arg6[%c0_36, %c28] : memref<256x72xf32, #tpu.memory_space<vmem>>, vector<256x4xf32>
    tpu.vector_store %arg6[%c0_36, %c28], %22 {strides = array<i32>} : memref<256x72xf32, #tpu.memory_space<vmem>>, vector<256x4xf32>,
    %c0_37 = arith.constant 0 : index
    %c5_38 = arith.constant 5 : index
    %c5_39 = arith.constant 5 : index
    %c0_40 = arith.constant 0 : index
    %24 = vector.load %arg1[%c0_37, %c5_38, %c5_39, %c0_40] : memref<1x22x22x4xf32, #tpu.memory_space<vmem>>, vector<1x16x16x4xf32>
    %25 = vector.shape_cast %24 : vector<1x16x16x4xf32> to vector<256x4xf32>
    %c0_41 = arith.constant 0 : index
    %c32 = arith.constant 32 : index
    %26 = vector.load %arg6[%c0_41, %c32] : memref<256x72xf32, #tpu.memory_space<vmem>>, vector<256x4xf32>
    tpu.vector_store %arg6[%c0_41, %c32], %25 {strides = array<i32>} : memref<256x72xf32, #tpu.memory_space<vmem>>, vector<256x4xf32>,
    %c0_42 = arith.constant 0 : index
    %c0_43 = arith.constant 0 : index
    %c0_44 = arith.constant 0 : index
    %c0_45 = arith.constant 0 : index
    %27 = vector.load %arg1[%c0_42, %c0_43, %c0_44, %c0_45] : memref<1x22x22x4xf32, #tpu.memory_space<vmem>>, vector<1x16x16x4xf32>
    %28 = vector.shape_cast %27 : vector<1x16x16x4xf32> to vector<256x4xf32>
    %c0_46 = arith.constant 0 : index
    %c36 = arith.constant 36 : index
    %29 = vector.load %arg6[%c0_46, %c36] : memref<256x72xf32, #tpu.memory_space<vmem>>, vector<256x4xf32>
    tpu.vector_store %arg6[%c0_46, %c36], %28 {strides = array<i32>} : memref<256x72xf32, #tpu.memory_space<vmem>>, vector<256x4xf32>,
    %c0_47 = arith.constant 0 : index
    %c0_48 = arith.constant 0 : index
    %c3_49 = arith.constant 3 : index
    %c0_50 = arith.constant 0 : index
    %30 = vector.load %arg1[%c0_47, %c0_48, %c3_49, %c0_50] : memref<1x22x22x4xf32, #tpu.memory_space<vmem>>, vector<1x16x16x4xf32>
    %31 = vector.shape_cast %30 : vector<1x16x16x4xf32> to vector<256x4xf32>
    %c0_51 = arith.constant 0 : index
    %c40 = arith.constant 40 : index
    %32 = vector.load %arg6[%c0_51, %c40] : memref<256x72xf32, #tpu.memory_space<vmem>>, vector<256x4xf32>
    tpu.vector_store %arg6[%c0_51, %c40], %31 {strides = array<i32>} : memref<256x72xf32, #tpu.memory_space<vmem>>, vector<256x4xf32>,
    %c0_52 = arith.constant 0 : index
    %c0_53 = arith.constant 0 : index
    %c6 = arith.constant 6 : index
    %c0_54 = arith.constant 0 : index
    %33 = vector.load %arg1[%c0_52, %c0_53, %c6, %c0_54] : memref<1x22x22x4xf32, #tpu.memory_space<vmem>>, vector<1x16x16x4xf32>
    %34 = vector.shape_cast %33 : vector<1x16x16x4xf32> to vector<256x4xf32>
    %c0_55 = arith.constant 0 : index
    %c44 = arith.constant 44 : index
    %35 = vector.load %arg6[%c0_55, %c44] : memref<256x72xf32, #tpu.memory_space<vmem>>, vector<256x4xf32>
    tpu.vector_store %arg6[%c0_55, %c44], %34 {strides = array<i32>} : memref<256x72xf32, #tpu.memory_space<vmem>>, vector<256x4xf32>,
    %c0_56 = arith.constant 0 : index
    %c3_57 = arith.constant 3 : index
    %c0_58 = arith.constant 0 : index
    %c0_59 = arith.constant 0 : index
    %36 = vector.load %arg1[%c0_56, %c3_57, %c0_58, %c0_59] : memref<1x22x22x4xf32, #tpu.memory_space<vmem>>, vector<1x16x16x4xf32>
    %37 = vector.shape_cast %36 : vector<1x16x16x4xf32> to vector<256x4xf32>
    %c0_60 = arith.constant 0 : index
    %c48 = arith.constant 48 : index
    %38 = vector.load %arg6[%c0_60, %c48] : memref<256x72xf32, #tpu.memory_space<vmem>>, vector<256x4xf32>
    tpu.vector_store %arg6[%c0_60, %c48], %37 {strides = array<i32>} : memref<256x72xf32, #tpu.memory_space<vmem>>, vector<256x4xf32>,
    %c0_61 = arith.constant 0 : index
    %c3_62 = arith.constant 3 : index
    %c3_63 = arith.constant 3 : index
    %c0_64 = arith.constant 0 : index
    %39 = vector.load %arg1[%c0_61, %c3_62, %c3_63, %c0_64] : memref<1x22x22x4xf32, #tpu.memory_space<vmem>>, vector<1x16x16x4xf32>
    %40 = vector.shape_cast %39 : vector<1x16x16x4xf32> to vector<256x4xf32>
    %c0_65 = arith.constant 0 : index
    %c52 = arith.constant 52 : index
    %41 = vector.load %arg6[%c0_65, %c52] : memref<256x72xf32, #tpu.memory_space<vmem>>, vector<256x4xf32>
    tpu.vector_store %arg6[%c0_65, %c52], %40 {strides = array<i32>} : memref<256x72xf32, #tpu.memory_space<vmem>>, vector<256x4xf32>,
    %c0_66 = arith.constant 0 : index
    %c3_67 = arith.constant 3 : index
    %c6_68 = arith.constant 6 : index
    %c0_69 = arith.constant 0 : index
    %42 = vector.load %arg1[%c0_66, %c3_67, %c6_68, %c0_69] : memref<1x22x22x4xf32, #tpu.memory_space<vmem>>, vector<1x16x16x4xf32>
    %43 = vector.shape_cast %42 : vector<1x16x16x4xf32> to vector<256x4xf32>
    %c0_70 = arith.constant 0 : index
    %c56 = arith.constant 56 : index
    %44 = vector.load %arg6[%c0_70, %c56] : memref<256x72xf32, #tpu.memory_space<vmem>>, vector<256x4xf32>
    tpu.vector_store %arg6[%c0_70, %c56], %43 {strides = array<i32>} : memref<256x72xf32, #tpu.memory_space<vmem>>, vector<256x4xf32>,
    %c0_71 = arith.constant 0 : index
    %c6_72 = arith.constant 6 : index
    %c0_73 = arith.constant 0 : index
    %c0_74 = arith.constant 0 : index
    %45 = vector.load %arg1[%c0_71, %c6_72, %c0_73, %c0_74] : memref<1x22x22x4xf32, #tpu.memory_space<vmem>>, vector<1x16x16x4xf32>
    %46 = vector.shape_cast %45 : vector<1x16x16x4xf32> to vector<256x4xf32>
    %c0_75 = arith.constant 0 : index
    %c60 = arith.constant 60 : index
    %47 = vector.load %arg6[%c0_75, %c60] : memref<256x72xf32, #tpu.memory_space<vmem>>, vector<256x4xf32>
    tpu.vector_store %arg6[%c0_75, %c60], %46 {strides = array<i32>} : memref<256x72xf32, #tpu.memory_space<vmem>>, vector<256x4xf32>,
    %c0_76 = arith.constant 0 : index
    %c6_77 = arith.constant 6 : index
    %c3_78 = arith.constant 3 : index
    %c0_79 = arith.constant 0 : index
    %48 = vector.load %arg1[%c0_76, %c6_77, %c3_78, %c0_79] : memref<1x22x22x4xf32, #tpu.memory_space<vmem>>, vector<1x16x16x4xf32>
    %49 = vector.shape_cast %48 : vector<1x16x16x4xf32> to vector<256x4xf32>
    %c0_80 = arith.constant 0 : index
    %c64 = arith.constant 64 : index
    %50 = vector.load %arg6[%c0_80, %c64] : memref<256x72xf32, #tpu.memory_space<vmem>>, vector<256x4xf32>
    tpu.vector_store %arg6[%c0_80, %c64], %49 {strides = array<i32>} : memref<256x72xf32, #tpu.memory_space<vmem>>, vector<256x4xf32>,
    %c0_81 = arith.constant 0 : index
    %c6_82 = arith.constant 6 : index
    %c6_83 = arith.constant 6 : index
    %c0_84 = arith.constant 0 : index
    %51 = vector.load %arg1[%c0_81, %c6_82, %c6_83, %c0_84] : memref<1x22x22x4xf32, #tpu.memory_space<vmem>>, vector<1x16x16x4xf32>
    %52 = vector.shape_cast %51 : vector<1x16x16x4xf32> to vector<256x4xf32>
    %c0_85 = arith.constant 0 : index
    %c68 = arith.constant 68 : index
    %53 = vector.load %arg6[%c0_85, %c68] : memref<256x72xf32, #tpu.memory_space<vmem>>, vector<256x4xf32>
    tpu.vector_store %arg6[%c0_85, %c68], %52 {strides = array<i32>} : memref<256x72xf32, #tpu.memory_space<vmem>>, vector<256x4xf32>,
    %c0_86 = arith.constant 0 : index
    %c0_87 = arith.constant 0 : index
    %54 = vector.load %arg2[%c0_86, %c0_87] : memref<16x72xf32, #tpu.memory_space<vmem>>, vector<16x72xf32>
    %c0_88 = arith.constant 0 : index
    %c0_89 = arith.constant 0 : index
    %55 = vector.load %arg6[%c0_88, %c0_89] : memref<256x72xf32, #tpu.memory_space<vmem>>, vector<256x72xf32>
    %cst = arith.constant dense<0.000000e+00> : vector<16x256xf32>
    %56 = tpu.matmul %54, %55, %cst {dimension_numbers = #tpu.dot_dimension_numbers<[1], [1], [0], [0], [0, 0, 1, 0], [], []>} : vector<16x72xf32>, vector<256x72xf32>, vector<16x256xf32> -> vector<16x256xf32>
    %c0_90 = arith.constant 0 : index
    %c0_91 = arith.constant 0 : index
    %c0_92 = arith.constant 0 : index
    %57 = vector.load %arg3[%c0_90, %c0_91, %c0_92] : memref<1x16x256xf32, #tpu.memory_space<vmem>>, vector<1x16x256xf32>
    %58 = vector.shape_cast %57 : vector<1x16x256xf32> to vector<16x256xf32>
    %59 = vector.shape_cast %56 : vector<16x256xf32> to vector<1x16x256xf32>
    tpu.vector_store %arg3[%c0_90, %c0_91, %c0_92], %59 {strides = array<i32>} : memref<1x16x256xf32, #tpu.memory_space<vmem>>, vector<1x16x256xf32>,
    %cst_93 = arith.constant dense<0.000000e+00> : vector<16xf32>
    %60 = vector.multi_reduction <add>, %56, %cst_93 [1] : vector<16x256xf32> to vector<16xf32>
    %61 = vector.shape_cast %60 : vector<16xf32> to vector<16x1xf32>
    %c0_94 = arith.constant 0 : index
    %c0_95 = arith.constant 0 : index
    %c0_96 = arith.constant 0 : index
    %62 = vector.load %arg4[%c0_94, %c0_95, %c0_96] : memref<1x16x1xf32, #tpu.memory_space<vmem>>, vector<1x16x1xf32>
    %63 = vector.shape_cast %62 : vector<1x16x1xf32> to vector<16x1xf32>
    %64 = vector.shape_cast %61 : vector<16x1xf32> to vector<1x16x1xf32>
    tpu.vector_store %arg4[%c0_94, %c0_95, %c0_96], %64 {strides = array<i32>} : memref<1x16x1xf32, #tpu.memory_space<vmem>>, vector<1x16x1xf32>,
    %65 = arith.mulf %56, %56 : vector<16x256xf32>
    %cst_97 = arith.constant dense<0.000000e+00> : vector<16xf32>
    %66 = vector.multi_reduction <add>, %65, %cst_97 [1] : vector<16x256xf32> to vector<16xf32>
    %67 = vector.shape_cast %66 : vector<16xf32> to vector<16x1xf32>
    %c0_98 = arith.constant 0 : index
    %c0_99 = arith.constant 0 : index
    %c0_100 = arith.constant 0 : index
    %68 = vector.load %arg5[%c0_98, %c0_99, %c0_100] : memref<1x16x1xf32, #tpu.memory_space<vmem>>, vector<1x16x1xf32>
    %69 = vector.shape_cast %68 : vector<1x16x1xf32> to vector<16x1xf32>
    %70 = vector.shape_cast %67 : vector<16x1xf32> to vector<1x16x1xf32>
    tpu.vector_store %arg5[%c0_98, %c0_99, %c0_100], %70 {strides = array<i32>} : memref<1x16x1xf32, #tpu.memory_space<vmem>>, vector<1x16x1xf32>,
    return
  }
  func.func @transform_0(%arg0: i32) -> (i32, i32, i32, i32) {
    %c0_i32 = arith.constant 0 : i32
    %c0_i32_0 = arith.constant 0 : i32
    %c0_i32_1 = arith.constant 0 : i32
    %c0_i32_2 = arith.constant 0 : i32
    return %arg0, %c0_i32, %c0_i32_0, %c0_i32_1 : i32, i32, i32, i32
  }
  func.func @transform_1(%arg0: i32) -> (i32, i32) {
    %c0_i32 = arith.constant 0 : i32
    %c0_i32_0 = arith.constant 0 : i32
    %c0_i32_1 = arith.constant 0 : i32
    return %c0_i32, %c0_i32_0 : i32, i32
  }
  func.func @transform_2(%arg0: i32) -> (i32, i32, i32) {
    %c0_i32 = arith.constant 0 : i32
    %c0_i32_0 = arith.constant 0 : i32
    %c0_i32_1 = arith.constant 0 : i32
    return %arg0, %c0_i32, %c0_i32_0 : i32, i32, i32
  }
  func.func @transform_3(%arg0: i32) -> (i32, i32, i32) {
    %c0_i32 = arith.constant 0 : i32
    %c0_i32_0 = arith.constant 0 : i32
    %c0_i32_1 = arith.constant 0 : i32
    return %arg0, %c0_i32, %c0_i32_0 : i32, i32, i32
  }
  func.func @transform_4(%arg0: i32) -> (i32, i32, i32) {
    %c0_i32 = arith.constant 0 : i32
    %c0_i32_0 = arith.constant 0 : i32
    %c0_i32_1 = arith.constant 0 : i32
    return %arg0, %c0_i32, %c0_i32_0 : i32, i32, i32
  }
}

module attributes {stable_mosaic.version = 11 : i64} {
  func.func @_bn_mish_kernel(%arg0: i32, %arg1: memref<1x16x256xf32, #tpu.memory_space<vmem>>, %arg2: memref<16x1xf32, #tpu.memory_space<vmem>>, %arg3: memref<16x1xf32, #tpu.memory_space<vmem>>, %arg4: memref<1x16x256xf32, #tpu.memory_space<vmem>>) attributes {dimension_semantics = [#tpu.dimension_semantics<parallel>], iteration_bounds = array<i64: 2>, scalar_prefetch = 0 : i64, scratch_operands = 0 : i64, tpu.core_type = #tpu.core_type<tc>, window_params = [{transform_indices = @transform_0, window_bounds = array<i64: 1, 16, 256>}, {pipeline_mode = #tpu.pipeline_mode<synchronous>, transform_indices = @transform_1, window_bounds = array<i64: 16, 1>}, {pipeline_mode = #tpu.pipeline_mode<synchronous>, transform_indices = @transform_2, window_bounds = array<i64: 16, 1>}, {transform_indices = @transform_3, window_bounds = array<i64: 1, 16, 256>}]} {
    %c0 = arith.constant 0 : index
    %c0_0 = arith.constant 0 : index
    %c0_1 = arith.constant 0 : index
    %0 = vector.load %arg1[%c0, %c0_0, %c0_1] : memref<1x16x256xf32, #tpu.memory_space<vmem>>, vector<1x16x256xf32>
    %1 = vector.shape_cast %0 : vector<1x16x256xf32> to vector<16x256xf32>
    %c0_2 = arith.constant 0 : index
    %c0_3 = arith.constant 0 : index
    %2 = vector.load %arg2[%c0_2, %c0_3] : memref<16x1xf32, #tpu.memory_space<vmem>>, vector<16x1xf32>
    %3 = vector.broadcast %2 : vector<16x1xf32> to vector<16x256xf32>
    %4 = arith.mulf %1, %3 : vector<16x256xf32>
    %c0_4 = arith.constant 0 : index
    %c0_5 = arith.constant 0 : index
    %5 = vector.load %arg3[%c0_4, %c0_5] : memref<16x1xf32, #tpu.memory_space<vmem>>, vector<16x1xf32>
    %6 = vector.broadcast %5 : vector<16x1xf32> to vector<16x256xf32>
    %7 = arith.addf %4, %6 : vector<16x256xf32>
    %cst = arith.constant 2.000000e+01 : f32
    %8 = vector.broadcast %cst : f32 to vector<16x256xf32>
    %9 = arith.minimumf %7, %8 : vector<16x256xf32>
    %10 = math.exp %9 : vector<16x256xf32>
    %cst_6 = arith.constant 2.000000e+00 : f32
    %11 = vector.broadcast %cst_6 : f32 to vector<16x256xf32>
    %12 = arith.addf %10, %11 : vector<16x256xf32>
    %13 = arith.mulf %10, %12 : vector<16x256xf32>
    %14 = arith.mulf %7, %13 : vector<16x256xf32>
    %cst_7 = arith.constant 2.000000e+00 : f32
    %15 = vector.broadcast %cst_7 : f32 to vector<16x256xf32>
    %16 = arith.addf %13, %15 : vector<16x256xf32>
    %17 = tpu.reciprocal %16 {approx = true} : vector<16x256xf32> -> vector<16x256xf32>
    %18 = arith.mulf %14, %17 : vector<16x256xf32>
    %c0_8 = arith.constant 0 : index
    %c0_9 = arith.constant 0 : index
    %c0_10 = arith.constant 0 : index
    %19 = vector.load %arg4[%c0_8, %c0_9, %c0_10] : memref<1x16x256xf32, #tpu.memory_space<vmem>>, vector<1x16x256xf32>
    %20 = vector.shape_cast %19 : vector<1x16x256xf32> to vector<16x256xf32>
    %21 = vector.shape_cast %18 : vector<16x256xf32> to vector<1x16x256xf32>
    tpu.vector_store %arg4[%c0_8, %c0_9, %c0_10], %21 {strides = array<i32>} : memref<1x16x256xf32, #tpu.memory_space<vmem>>, vector<1x16x256xf32>,
    return
  }
  func.func @transform_0(%arg0: i32) -> (i32, i32, i32) {
    %c0_i32 = arith.constant 0 : i32
    %c0_i32_0 = arith.constant 0 : i32
    %c0_i32_1 = arith.constant 0 : i32
    return %arg0, %c0_i32, %c0_i32_0 : i32, i32, i32
  }
  func.func @transform_1(%arg0: i32) -> (i32, i32) {
    %c0_i32 = arith.constant 0 : i32
    %c0_i32_0 = arith.constant 0 : i32
    %c0_i32_1 = arith.constant 0 : i32
    return %c0_i32, %c0_i32_0 : i32, i32
  }
  func.func @transform_2(%arg0: i32) -> (i32, i32) {
    %c0_i32 = arith.constant 0 : i32
    %c0_i32_0 = arith.constant 0 : i32
    %c0_i32_1 = arith.constant 0 : i32
    return %c0_i32, %c0_i32_0 : i32, i32
  }
  func.func @transform_3(%arg0: i32) -> (i32, i32, i32) {
    %c0_i32 = arith.constant 0 : i32
    %c0_i32_0 = arith.constant 0 : i32
    %c0_i32_1 = arith.constant 0 : i32
    return %arg0, %c0_i32, %c0_i32_0 : i32, i32, i32
  }
}

</mosaic_0001>

<bundles_post_ra>
// kernel: double_dilated_conv.3
= control target key start
LH: loop header
LB: loop body
LE: loop exit
PB: predicated region body
PF: predicated region fallthrough
CT: control target
= control target key end

     0   :  { %s371_s12 = smov 0   ;;  %s407_s0 = inlined_call_operand.vmem [shape: f32[2,16,256], index: 0, kind: input, shape index: {}]   ;;  %s408_s1 = inlined_call_operand.vmem [shape: f32[16,1], index: 1, kind: input, shape index: {}]   ;;  %s409_s2 = inlined_call_operand.vmem [shape: f32[16,1], index: 2, kind: input, shape index: {}]   ;;  %s410_s3 = inlined_call_operand.vmem [shape: f32[2,16,256], index: 3, kind: output, shape index: {}]  }
   0x1 LB: > { %s302_s13 = sadd.s32 4294967295, %s348_s12   ;;  %p306_p0 = scmp.ge.s32.totalorder %s348_s12, 1  ;;  %s348_s12 = sphi %s371_s12, %s13_s12  }
   0x2   : > { %p137_p1 = scmp.lt.s32.totalorder %s348_s12, 3 }
   0x4   : > { %p138_p2 = pnand %p306_p0, %p137_p1 }
   0x5   : > { %p161_p3 = scmp.lt.s32.totalorder (!%p138_p2), %s302_s13, 1 }
   0x6   : > { %141 = sbr.rel (%p138_p2) target bundleno = 187 (0xbb), region = 32 }
   0xb   : > { %v191_v0 = vld [vmem:[%s409_s2] sm:$0xff]  ;;  %v350_v2 = vmov 0   ;;  %v192_v3 = vld [vmem:[%s409_s2 + $0x8] sm:$0xff]  ;;  %s412_s13 = smov (!%p161_p3, %s302_s13), 1 }
   0xc   : > { %v175_v1 = vld [vmem:[%s408_s1] sm:$0xff]  ;;  %325 = vset.pattern.permute.xlu1 %v350_v2  ;;  %324 = vset.pattern.permute.xlu0 %v350_v2  ;;  %v176_v4 = vld [vmem:[%s408_s1 + $0x8] sm:$0xff]  ;;  %s313_s22 = sshll.u32 %s412_s13, 5 }
   0xd   : > { %195 = vperm.xlu1 %325, %v191_v0   ;;  %179 = vperm.xlu0 %324, %v175_v1   ;;  %s165_s25 = scalar_lea.vmem %s407_s0, %s313_s22  ;;  %s170_s28 = scalar_lea.vmem %s410_s3, %s313_s22 }
   0xe   : > { %v171_v5 = vld [vmem:[%s165_s25] sm:$0xff]  ;;  %v172_v6 = vld [vmem:[%s165_s25 + $0x8] sm:$0xff]  ;;  %v173_v11 = vld [vmem:[%s165_s25 + $0x10] sm:$0xff] }
   0xf   : > { %v174_v12 = vld [vmem:[%s165_s25 + $0x18] sm:$0xff] }
  0x11   : > { %200 = vperm.xlu1 %325, %v192_v3   ;;  %184 = vperm.xlu0 %324, %v176_v4  }
  0x88   : > { %v196_v7 = vpop.permute.xlu1 %195  ;;  %v180_v8 = vpop.permute.xlu0 %179 }
  0x89   : > { %v187_v9 = vmul.f32 %v180_v8, %v171_v5  ;;  %v188_v10 = vmul.f32 %v180_v8, %v172_v6 }
  0x8b   : > { %v203_v13 = vadd.f32 %v196_v7, %v187_v9  ;;  %v204_v14 = vadd.f32 %v196_v7, %v188_v10 }
  0x8c   : > { %v185_v15 = vpop.permute.xlu0 %184  ;;  %v201_v20 = vpop.permute.xlu1 %200 }
  0x8d   : > { %v207_v16 = vmin.f32 %v203_v13, 20.0  ;;  %v208_v17 = vmin.f32 %v204_v14, 20.0  ;;  %v189_v18 = vmul.f32 %v185_v15, %v173_v11  ;;  %v190_v19 = vmul.f32 %v185_v15, %v174_v12 }
  0x8f   : > { %v211_v21 = vmul.f32 1.442695, %v207_v16  ;;  %v213_v22 = vmul.f32 1.442695, %v208_v17  ;;  %v205_v23 = vadd.f32 %v201_v20, %v189_v18  ;;  %v206_v24 = vadd.f32 %v201_v20, %v190_v19 }
  0x91   : > { %326 = vpow2.f32 %v211_v21  ;;  %v209_v25 = vmin.f32 %v205_v23, 20.0  ;;  %v210_v26 = vmin.f32 %v206_v24, 20.0 }
  0x92   : > { %328 = vpow2.f32 %v213_v22 }
  0x93   : > { %v215_v27 = vmul.f32 1.442695, %v209_v25  ;;  %v217_v28 = vmul.f32 1.442695, %v210_v26 }
  0x95   : > { %330 = vpow2.f32 %v215_v27 }
  0x96   : > { %332 = vpow2.f32 %v217_v28 }
  0x9e   : > { %v327_v29 = vpop.eup %326 }
  0x9f   : > { %v329_v30 = vpop.eup %328  ;;  %v219_v31 = vadd.f32 2.0, %v327_v29 }
  0xa0   : > { %v220_v32 = vadd.f32 2.0, %v329_v30 }
  0xa1   : > { %v223_v33 = vmul.f32 %v327_v29, %v219_v31 }
  0xa2   : > { %v331_v34 = vpop.eup %330  ;;  %v224_v35 = vmul.f32 %v329_v30, %v220_v32 }
  0xa3   : > { %v333_v36 = vpop.eup %332  ;;  %v231_v37 = vadd.f32 2.0, %v223_v33  ;;  %v221_v38 = vadd.f32 2.0, %v331_v34  ;;  %v227_v45 = vmul.f32 %v223_v33, %v203_v13 }
  0xa4   : > { %v232_v39 = vadd.f32 2.0, %v224_v35  ;;  %v222_v40 = vadd.f32 2.0, %v333_v36  ;;  %v228_v47 = vmul.f32 %v224_v35, %v204_v14 }
  0xa5   : > { %334 = vrcp.f32 %v231_v37  ;;  %v225_v41 = vmul.f32 %v331_v34, %v221_v38 }
  0xa6   : > { %336 = vrcp.f32 %v232_v39  ;;  %v226_v42 = vmul.f32 %v333_v36, %v222_v40 }
  0xa7   : > { %v233_v43 = vadd.f32 2.0, %v225_v41  ;;  %v229_v51 = vmul.f32 %v225_v41, %v205_v23 }
  0xa8   : > { %v234_v44 = vadd.f32 2.0, %v226_v42  ;;  %v230_v53 = vmul.f32 %v226_v42, %v206_v24 }
  0xa9   : > { %338 = vrcp.f32 %v233_v43 }
  0xaa   : > { %340 = vrcp.f32 %v234_v44 }
  0xb2   : > { %v335_v46 = vpop.eup %334 }
  0xb3   : > { %v337_v48 = vpop.eup %336  ;;  %v239_v49 = vmul.f32 %v335_v46, %v227_v45 }
  0xb4   : > { %v240_v50 = vmul.f32 %v337_v48, %v228_v47 }
  0xb5   : > { %243 = vst [vmem:[%s170_s28] sm:$0xff] %v239_v49 }
  0xb6   : > { %v339_v52 = vpop.eup %338  ;;  %244 = vst [vmem:[%s170_s28 + $0x8] sm:$0xff] %v240_v50 }
  0xb7   : > { %v341_v54 = vpop.eup %340  ;;  %v241_v55 = vmul.f32 %v339_v52, %v229_v51 }
  0xb8   : > { %v242_v56 = vmul.f32 %v341_v54, %v230_v53 }
  0xb9   : > { %245 = vst [vmem:[%s170_s28 + $0x10] sm:$0xff] %v241_v55 }
  0xba   : > { %246 = vst [vmem:[%s170_s28 + $0x18] sm:$0xff] %v242_v56 }
  0xbb PF: > { %s13_s12 = sadd.s32 1, %s348_s12  }
  0xbc   : > { %p10_p4 = scmp.ge.s32.totalorder %s13_s12, 4  }
  0xbe   :  { %12 = sbr.rel (!%p10_p4) target bundleno = 1 (0x1), region = 62 }

// kernel: double_dilated_conv.2
= control target key start
LH: loop header
LB: loop body
LE: loop exit
PB: predicated region body
PF: predicated region fallthrough
CT: control target
= control target key end

     0   :  { %s4608_s15 = smov 0   ;;  %s7007_s0 = inlined_call_operand.vmem [shape: f32[2,22,22,4], index: 0, kind: input, shape index: {}]   ;;  %s7008_s1 = inlined_call_operand.vmem [shape: f32[16,72], index: 1, kind: input, shape index: {}]   ;;  %s7009_s2 = inlined_call_operand.vmem [shape: f32[2,16,256], index: 2, kind: output, shape index: {0}]   ;;  %s7010_s3 = inlined_call_operand.vmem [shape: f32[2,16,1], index: 3, kind: output, shape index: {1}]   ;;  %s7011_s4 = inlined_call_operand.vmem [shape: f32[2,16,1], index: 4, kind: output, shape index: {2}]  }
   0x1 LB: > { %s3933_s16 = sadd.s32 4294967295, %s4564_s15   ;;  %p3937_p0 = scmp.ge.s32.totalorder %s4564_s15, 1  ;;  %s4564_s15 = sphi %s4608_s15, %s15_s15  }
   0x2   : > { %p167_p1 = scmp.lt.s32.totalorder %s4564_s15, 3 }
   0x4   : > { %p168_p2 = pnand %p3937_p0, %p167_p1 }
   0x6   : > { %171 = sbr.rel (%p168_p2) target bundleno = 1575 (0x627), region = 28 }
   0xb   : > { %p203_p3 = scmp.lt.s32.totalorder %s3933_s16, 1  ;;  %s4566_s21 = smov 4   ;;  %vm256_vm0 = vcmask 31744   ;;  %vm449_vm1 = vcmask 64544   ;;  %vm642_vm2 = vcmask 97344   ;;  %vm836_vm3 = vcmask 130144  }
   0xc   : > { %s4567_s22 = smov 8   ;;  %s4568_s23 = smov 12   ;;  %vm1029_vm4 = vcmask 162944   ;;  %vm1222_vm5 = vcmask 195744   ;;  %vm1416_vm6 = vcmask 228544   ;;  %vm1609_vm7 = vcmask 261344  }
   0xd   : > { %s7085_s16 = smov (!%p203_p3, %s3933_s16), 1  ;;  %s4569_s24 = smov 16   ;;  %vm1802_vm8 = vcmask 294144   ;;  %vm1995_vm9 = vcmask 326944   ;;  %vm2188_vm10 = vcmask 359744   ;;  %vm2381_vm11 = vcmask 392544  }
   0xe   : > { %s4532_s17 = smul.u32 528, %s7085_s16  ;;  %s4570_s25 = smov 20   ;;  %vm2574_vm12 = vcmask 425344   ;;  %vm2767_vm13 = vcmask 458144   ;;  %vm2960_vm14 = vcmask 490944   ;;  %vm3154_vm15 = vcmask 523744  }
   0xf   : > { %s4571_s26 = smov 24   ;;  %s4572_s27 = smov 28  }
  0x10   : > { %s4622_s20 = scalar_lea.vmem %s7007_s0, %s4532_s17  ;;  %s4573_s28 = smov 32  }
  0x11   : > { %v3977_v0 = vld [vmem:[%s4622_s20 + $0x1b] sm:$0xff]  ;;  %v3979_v1 = vld [vmem:[%s4622_s20 + $0x33] sm:$0xff]  ;;  %v3978_v2 = vld [vmem:[%s4622_s20 + $0x23] sm:$0xff]  ;;  %s4574_s29 = smov 36   ;;  %s4575_s30 = smov 40  }
  0x12   : > { %353 = vrot.lane.b32.xlu0 %v3977_v0, %s4566_s21  ;;  %357 = vrot.lane.b32.xlu1 %v3979_v1, %s4566_s21  ;;  %v3980_v3 = vld [vmem:[%s4622_s20 + $0x3b] sm:$0xff]  ;;  %v4633_v4 = vld [vmem:[%s4622_s20 + $0x4b] sm:$0xff]  ;;  %s4576_s5 = smov 44   ;;  %s4577_s6 = smov 48  }
  0x13   : > { %v4636_v5 = vld [vmem:[%s4622_s20 + $0x53] sm:$0xff]  ;;  %v4643_v6 = vld [vmem:[%s4622_s20 + $0x63] sm:$0xff]  ;;  %v4646_v7 = vld [vmem:[%s4622_s20 + $0x6b] sm:$0xff]  ;;  %s4578_s7 = smov 52   ;;  %s4579_s8 = smov 56  }
  0x14   : > { %v4653_v8 = vld [vmem:[%s4622_s20 + $0x7b] sm:$0xff]  ;;  %v4656_v9 = vld [vmem:[%s4622_s20 + $0x83] sm:$0xff]  ;;  %v4663_v10 = vld [vmem:[%s4622_s20 + $0x93] sm:$0xff]  ;;  %s4580_s9 = smov 60   ;;  %s4581_s10 = smov 64  }
  0x15   : > { %v4666_v11 = vld [vmem:[%s4622_s20 + $0x9b] sm:$0xff]  ;;  %v3947_v13 = vld [vmem:[%s4622_s20 + $0x31] sm:$0xff]  ;;  %v4686_v18 = vld [vmem:[%s4622_s20 + $0xc3] sm:$0xff]  ;;  %s4582_s11 = smov 68   ;;  %s4461_s18 = sshll.u32 %s7085_s16, 5 }
  0x16   : > { %355 = vrot.lane.b32.xlu0 %v3978_v2, %s4566_s21  ;;  %359 = vrot.lane.b32.xlu1 %v3980_v3, %s4566_s21  ;;  %v3945_v12 = vld [vmem:[%s4622_s20 + $0x19] sm:$0xff]  ;;  %v4675_v14 = vld [vmem:[%s4622_s20 + $0xab] sm:$0xff]  ;;  %259 = vst.msk [vmem:[#allocation2 + $0x10] sm:$0xff] %vm256_vm0, %v3947_v13 }
  0x17   : > { %v4678_v15 = vld [vmem:[%s4622_s20 + $0xb3] sm:$0xff]  ;;  %257 = vst.msk [vmem:[#allocation2] sm:$0xff] %vm256_vm0, %v3945_v12  ;;  %v3946_v16 = vld [vmem:[%s4622_s20 + $0x21] sm:$0xff]  ;;  %v4690_v19 = vld [vmem:[%s4622_s20 + $0x49] sm:$0xff] }
  0x18   : > { %258 = vst.msk [vmem:[#allocation2 + $0x8] sm:$0xff] %vm256_vm0, %v3946_v16  ;;  %v3948_v17 = vld [vmem:[%s4622_s20 + $0x39] sm:$0xff]  ;;  %v4693_v20 = vld [vmem:[%s4622_s20 + $0x51] sm:$0xff]  ;;  %261 = vst.msk [vmem:[#allocation2 + $0x20] sm:$0xff] %vm256_vm0, %v4690_v19 }
  0x19   : > { %260 = vst.msk [vmem:[#allocation2 + $0x18] sm:$0xff] %vm256_vm0, %v3948_v17  ;;  %v4700_v21 = vld [vmem:[%s4622_s20 + $0xcb] sm:$0xff]  ;;  %262 = vst.msk [vmem:[#allocation2 + $0x28] sm:$0xff] %vm256_vm0, %v4693_v20  ;;  %v4707_v22 = vld [vmem:[%s4622_s20 + $0x61] sm:$0xff] }
  0x1a   : > { %361 = vrot.lane.b32.xlu0 %v4633_v4, %s4566_s21  ;;  %363 = vrot.lane.b32.xlu1 %v4636_v5, %s4566_s21  ;;  %263 = vst.msk [vmem:[#allocation2 + $0x30] sm:$0xff] %vm256_vm0, %v4707_v22  ;;  %v4712_v23 = vld [vmem:[%s4622_s20 + $0x69] sm:$0xff]  ;;  %v4715_v24 = vld [vmem:[%s4622_s20 + $0x79] sm:$0xff] }
  0x1b   : > { %v4718_v25 = vld [vmem:[%s4622_s20 + $0x81] sm:$0xff]  ;;  %264 = vst.msk [vmem:[#allocation2 + $0x38] sm:$0xff] %vm256_vm0, %v4712_v23  ;;  %265 = vst.msk [vmem:[#allocation2 + $0x40] sm:$0xff] %vm256_vm0, %v4715_v24  ;;  %v4727_v26 = vld [vmem:[%s4622_s20 + $0x91] sm:$0xff] }
  0x1c   : > { %266 = vst.msk [vmem:[#allocation2 + $0x48] sm:$0xff] %vm256_vm0, %v4718_v25  ;;  %v4730_v27 = vld [vmem:[%s4622_s20 + $0x99] sm:$0xff]  ;;  %v4733_v28 = vld [vmem:[%s4622_s20 + $0xa9] sm:$0xff]  ;;  %267 = vst.msk [vmem:[#allocation2 + $0x50] sm:$0xff] %vm256_vm0, %v4727_v26 }
  0x1d   : > { %v4736_v29 = vld [vmem:[%s4622_s20 + $0xdb] sm:$0xff]  ;;  %v4739_v30 = vld [vmem:[%s4622_s20 + $0xe3] sm:$0xff]  ;;  %268 = vst.msk [vmem:[#allocation2 + $0x58] sm:$0xff] %vm256_vm0, %v4730_v27  ;;  %269 = vst.msk [vmem:[#allocation2 + $0x60] sm:$0xff] %vm256_vm0, %v4733_v28 }
  0x1e   : > { %365 = vrot.lane.b32.xlu0 %v4643_v6, %s4566_s21  ;;  %367 = vrot.lane.b32.xlu1 %v4646_v7, %s4566_s21  ;;  %v4748_v31 = vld [vmem:[%s4622_s20 + $0xb1] sm:$0xff]  ;;  %v4751_v32 = vld [vmem:[%s4622_s20 + $0xc1] sm:$0xff] }
  0x1f   : > { %v4754_v33 = vld [vmem:[%s4622_s20 + $0xc9] sm:$0xff]  ;;  %270 = vst.msk [vmem:[#allocation2 + $0x68] sm:$0xff] %vm256_vm0, %v4748_v31  ;;  %271 = vst.msk [vmem:[#allocation2 + $0x70] sm:$0xff] %vm256_vm0, %v4751_v32  ;;  %v4767_v34 = vld [vmem:[%s4622_s20 + $0xd9] sm:$0xff] }
  0x20   : > { %272 = vst.msk [vmem:[#allocation2 + $0x78] sm:$0xff] %vm256_vm0, %v4754_v33  ;;  %v4770_v35 = vld [vmem:[%s4622_s20 + $0xe1] sm:$0xff]  ;;  %273 = vst.msk [vmem:[#allocation2 + $0x80] sm:$0xff] %vm256_vm0, %v4767_v34  ;;  %v4777_v36 = vld [vmem:[%s4622_s20 + $0xf1] sm:$0xff] }
  0x21   : > { %274 = vst.msk [vmem:[#allocation2 + $0x88] sm:$0xff] %vm256_vm0, %v4770_v35  ;;  %v4780_v37 = vld [vmem:[%s4622_s20 + $0xf9] sm:$0xff]  ;;  %v4783_v38 = vld [vmem:[%s4622_s20 + $0x109] sm:$0xff]  ;;  %275 = vst.msk [vmem:[#allocation2 + $0x90] sm:$0xff] %vm256_vm0, %v4777_v36 }
  0x22   : > { %369 = vrot.lane.b32.xlu0 %v4653_v8, %s4566_s21  ;;  %371 = vrot.lane.b32.xlu1 %v4656_v9, %s4566_s21  ;;  %276 = vst.msk [vmem:[#allocation2 + $0x98] sm:$0xff] %vm256_vm0, %v4780_v37  ;;  %277 = vst.msk [vmem:[#allocation2 + $0xa0] sm:$0xff] %vm256_vm0, %v4783_v38  ;;  %v4792_v39 = vld [vmem:[%s4622_s20 + $0x111] sm:$0xff]  ;;  %v4795_v40 = vld [vmem:[%s4622_s20 + $0x121] sm:$0xff] }
  0x23   : > { %v4798_v41 = vld [vmem:[%s4622_s20 + $0x129] sm:$0xff]  ;;  %278 = vst.msk [vmem:[#allocation2 + $0xa8] sm:$0xff] %vm256_vm0, %v4792_v39  ;;  %279 = vst.msk [vmem:[#allocation2 + $0xb0] sm:$0xff] %vm256_vm0, %v4795_v40  ;;  %v4811_v42 = vld [vmem:[%s4622_s20 + $0xf3] sm:$0xff] }
  0x24   : > { %280 = vst.msk [vmem:[#allocation2 + $0xb8] sm:$0xff] %vm256_vm0, %v4798_v41  ;;  %v4814_v43 = vld [vmem:[%s4622_s20 + $0xfb] sm:$0xff]  ;;  %v4831_v46 = vld [vmem:[%s4622_s20 + $0x10b] sm:$0xff]  ;;  %v4834_v47 = vld [vmem:[%s4622_s20 + $0x113] sm:$0xff] }
  0x25   : > { %v4817_v44 = vld [vmem:[%s4622_s20 + $0x139] sm:$0xff]  ;;  %v4822_v45 = vld [vmem:[%s4622_s20 + $0x141] sm:$0xff]  ;;  %v4837_v48 = vld [vmem:[%s4622_s20 + $0x151] sm:$0xff] }
  0x26   : > { %373 = vrot.lane.b32.xlu0 %v4663_v10, %s4566_s21  ;;  %375 = vrot.lane.b32.xlu1 %v4666_v11, %s4566_s21  ;;  %281 = vst.msk [vmem:[#allocation2 + $0xc0] sm:$0xff] %vm256_vm0, %v4817_v44  ;;  %282 = vst.msk [vmem:[#allocation2 + $0xc8] sm:$0xff] %vm256_vm0, %v4822_v45  ;;  %v4842_v49 = vld [vmem:[%s4622_s20 + $0x159] sm:$0xff]  ;;  %v4851_v50 = vld [vmem:[%s4622_s20 + $0x123] sm:$0xff] }
  0x27   : > { %283 = vst.msk [vmem:[#allocation2 + $0xd0] sm:$0xff] %vm256_vm0, %v4837_v48  ;;  %284 = vst.msk [vmem:[#allocation2 + $0xd8] sm:$0xff] %vm256_vm0, %v4842_v49  ;;  %v4854_v51 = vld [vmem:[%s4622_s20 + $0x12b] sm:$0xff]  ;;  %v4871_v54 = vld [vmem:[%s4622_s20 + $0x13b] sm:$0xff] }
  0x28   : > { %v4857_v52 = vld [vmem:[%s4622_s20 + $0x169] sm:$0xff]  ;;  %v4862_v53 = vld [vmem:[%s4622_s20 + $0x171] sm:$0xff]  ;;  %v4877_v56 = vld [vmem:[%s4622_s20 + $0x181] sm:$0xff] }
  0x29   : > { %285 = vst.msk [vmem:[#allocation2 + $0xe0] sm:$0xff] %vm256_vm0, %v4857_v52  ;;  %286 = vst.msk [vmem:[#allocation2 + $0xe8] sm:$0xff] %vm256_vm0, %v4862_v53  ;;  %v4874_v55 = vld [vmem:[%s4622_s20 + $0x143] sm:$0xff]  ;;  %v4891_v58 = vld [vmem:[%s4622_s20 + $0x153] sm:$0xff] }
  0x2a   : > { %377 = vrot.lane.b32.xlu0 %v4675_v14, %s4566_s21  ;;  %379 = vrot.lane.b32.xlu1 %v4678_v15, %s4566_s21  ;;  %287 = vst.msk [vmem:[#allocation2 + $0xf0] sm:$0xff] %vm256_vm0, %v4877_v56  ;;  %v4882_v57 = vld [vmem:[%s4622_s20 + $0x189] sm:$0xff]  ;;  %v4894_v59 = vld [vmem:[%s4622_s20 + $0x15b] sm:$0xff] }
  0x2b   : > { %288 = vst.msk [vmem:[#allocation2 + $0xf8] sm:$0xff] %vm256_vm0, %v4882_v57  ;;  %v4901_v60 = vld [vmem:[%s4622_s20 + $0x16b] sm:$0xff]  ;;  %v4904_v61 = vld [vmem:[%s4622_s20 + $0x173] sm:$0xff]  ;;  %v4911_v62 = vld [vmem:[%s4622_s20 + $0x183] sm:$0xff]  ;;  %vm3347_vm0 = vcmask 556544  }
  0x2c   : > { %v4914_v63 = vld [vmem:[%s4622_s20 + $0x18b] sm:$0xff]  ;;  %v4009_v0 = vld [vmem:[%s4622_s20 + $0x1d] sm:$0xff]  ;;  %v4011_v2 = vld [vmem:[%s4622_s20 + $0x35] sm:$0xff] }
  0x2d   : > { %v4010_v1 = vld [vmem:[%s4622_s20 + $0x25] sm:$0xff]  ;;  %v4012_v3 = vld [vmem:[%s4622_s20 + $0x3d] sm:$0xff]  ;;  %v4929_v12 = vld [vmem:[%s4622_s20 + $0x4d] sm:$0xff] }
  0x2e   : > { %381 = vrot.lane.b32.xlu0 %v4686_v18, %s4566_s21  ;;  %383 = vrot.lane.b32.xlu1 %v4700_v21, %s4566_s21  ;;  %7036 = vst [vmem:[#allocation3_spill] sm:$0xff] %v4929_v12  ;;  %v4932_v13 = vld [vmem:[%s4622_s20 + $0x55] sm:$0xff]  ;;  %v4939_v16 = vld [vmem:[%s4622_s20 + $0x65] sm:$0xff] }
  0x2f   : > { %7037 = vst [vmem:[#allocation4_spill] sm:$0xff] %v4932_v13  ;;  %7038 = vst [vmem:[#allocation5_spill] sm:$0xff] %v4939_v16  ;;  %v4942_v17 = vld [vmem:[%s4622_s20 + $0x6d] sm:$0xff] }
  0x30   : > { %7039 = vst [vmem:[#allocation6_spill] sm:$0xff] %v4942_v17 }
  0x32   : > { %385 = vrot.lane.b32.xlu0 %v4736_v29, %s4566_s21  ;;  %387 = vrot.lane.b32.xlu1 %v4739_v30, %s4566_s21 }
  0x36   : > { %389 = vrot.lane.b32.xlu0 %v4811_v42, %s4566_s21  ;;  %391 = vrot.lane.b32.xlu1 %v4814_v43, %s4566_s21 }
  0x3a   : > { %393 = vrot.lane.b32.xlu0 %v4831_v46, %s4566_s21  ;;  %395 = vrot.lane.b32.xlu1 %v4834_v47, %s4566_s21 }
  0x3e   : > { %397 = vrot.lane.b32.xlu0 %v4851_v50, %s4566_s21  ;;  %399 = vrot.lane.b32.xlu1 %v4854_v51, %s4566_s21 }
  0x42   : > { %401 = vrot.lane.b32.xlu0 %v4871_v54, %s4566_s21  ;;  %403 = vrot.lane.b32.xlu1 %v4874_v55, %s4566_s21 }
  0x46   : > { %405 = vrot.lane.b32.xlu0 %v4891_v58, %s4566_s21  ;;  %407 = vrot.lane.b32.xlu1 %v4894_v59, %s4566_s21 }
  0x4a   : > { %409 = vrot.lane.b32.xlu0 %v4901_v60, %s4566_s21  ;;  %411 = vrot.lane.b32.xlu1 %v4904_v61, %s4566_s21 }
  0x4e   : > { %413 = vrot.lane.b32.xlu0 %v4911_v62, %s4566_s21  ;;  %415 = vrot.lane.b32.xlu1 %v4914_v63, %s4566_s21  ;;  %s212_s21 = scalar_lea.vmem %s7009_s2, %s4461_s18 }
  0x52   : > { %546 = vrot.lane.b32.xlu0 %v4009_v0, %s4567_s22  ;;  %548 = vrot.lane.b32.xlu1 %v4010_v1, %s4567_s22  ;;  %v4949_v0 = vld [vmem:[%s4622_s20 + $0x7d] sm:$0xff]  ;;  %v4952_v1 = vld [vmem:[%s4622_s20 + $0x85] sm:$0xff] }
  0x53   : > { %7040 = vst [vmem:[#allocation7_spill] sm:$0xff] %v4949_v0  ;;  %7041 = vst [vmem:[#allocation8_spill] sm:$0xff] %v4952_v1 }
  0x56   : > { %550 = vrot.lane.b32.xlu0 %v4011_v2, %s4567_s22  ;;  %552 = vrot.lane.b32.xlu1 %v4012_v3, %s4567_s22  ;;  %v4959_v2 = vld [vmem:[%s4622_s20 + $0x95] sm:$0xff]  ;;  %v4962_v3 = vld [vmem:[%s4622_s20 + $0x9d] sm:$0xff] }
  0x57   : > { %7042 = vst [vmem:[#allocation9_spill] sm:$0xff] %v4959_v2  ;;  %7043 = vst [vmem:[#allocation10_spill] sm:$0xff] %v4962_v3 }
  0x5a   : > { %554 = vrot.lane.b32.xlu0 %v4929_v12, %s4567_s22  ;;  %556 = vrot.lane.b32.xlu1 %v4932_v13, %s4567_s22 }
  0x5e   : > { %558 = vrot.lane.b32.xlu0 %v4939_v16, %s4567_s22  ;;  %560 = vrot.lane.b32.xlu1 %v4942_v17, %s4567_s22  ;;  %v4969_v17 = vld [vmem:[%s4622_s20 + $0xad] sm:$0xff]  ;;  %v4972_v16 = vld [vmem:[%s4622_s20 + $0xb5] sm:$0xff] }
  0x5f   : > { %7044 = vst [vmem:[#allocation11_spill] sm:$0xff] %v4969_v17  ;;  %7045 = vst [vmem:[#allocation12_spill] sm:$0xff] %v4972_v16 }
  0x62   : > { %562 = vrot.lane.b32.xlu0 %v4949_v0, %s4567_s22  ;;  %564 = vrot.lane.b32.xlu1 %v4952_v1, %s4567_s22  ;;  %v4979_v1 = vld [vmem:[%s4622_s20 + $0xc5] sm:$0xff]  ;;  %v4982_v0 = vld [vmem:[%s4622_s20 + $0xcd] sm:$0xff] }
  0x63   : > { %7046 = vst [vmem:[#allocation13_spill] sm:$0xff] %v4979_v1  ;;  %7047 = vst [vmem:[#allocation14_spill] sm:$0xff] %v4982_v0 }
  0x66   : > { %566 = vrot.lane.b32.xlu0 %v4959_v2, %s4567_s22  ;;  %568 = vrot.lane.b32.xlu1 %v4962_v3, %s4567_s22  ;;  %v4989_v3 = vld [vmem:[%s4622_s20 + $0xdd] sm:$0xff]  ;;  %v4992_v2 = vld [vmem:[%s4622_s20 + $0xe5] sm:$0xff] }
  0x67   : > { %7048 = vst [vmem:[#allocation15_spill] sm:$0xff] %v4989_v3  ;;  %7049 = vst [vmem:[#allocation16_spill] sm:$0xff] %v4992_v2 }
  0x6a   : > { %570 = vrot.lane.b32.xlu0 %v4969_v17, %s4567_s22  ;;  %572 = vrot.lane.b32.xlu1 %v4972_v16, %s4567_s22  ;;  %v4999_v16 = vld [vmem:[%s4622_s20 + $0xf5] sm:$0xff]  ;;  %v5002_v17 = vld [vmem:[%s4622_s20 + $0xfd] sm:$0xff] }
  0x6b   : > { %7050 = vst [vmem:[#allocation17_spill] sm:$0xff] %v4999_v16  ;;  %7051 = vst [vmem:[#allocation18_spill] sm:$0xff] %v5002_v17 }
  0x6e   : > { %574 = vrot.lane.b32.xlu0 %v4979_v1, %s4567_s22  ;;  %576 = vrot.lane.b32.xlu1 %v4982_v0, %s4567_s22  ;;  %v5009_v0 = vld [vmem:[%s4622_s20 + $0x10d] sm:$0xff]  ;;  %v5012_v1 = vld [vmem:[%s4622_s20 + $0x115] sm:$0xff] }
  0x6f   : > { %7052 = vst [vmem:[#allocation19_spill] sm:$0xff] %v5009_v0  ;;  %7053 = vst [vmem:[#allocation20_spill] sm:$0xff] %v5012_v1 }
  0x72   : > { %578 = vrot.lane.b32.xlu0 %v4989_v3, %s4567_s22  ;;  %580 = vrot.lane.b32.xlu1 %v4992_v2, %s4567_s22  ;;  %v5019_v2 = vld [vmem:[%s4622_s20 + $0x125] sm:$0xff]  ;;  %v5022_v3 = vld [vmem:[%s4622_s20 + $0x12d] sm:$0xff] }
  0x73   : > { %7054 = vst [vmem:[#allocation21_spill] sm:$0xff] %v5019_v2  ;;  %7055 = vst [vmem:[#allocation22_spill] sm:$0xff] %v5022_v3 }
  0x76   : > { %582 = vrot.lane.b32.xlu0 %v4999_v16, %s4567_s22  ;;  %584 = vrot.lane.b32.xlu1 %v5002_v17, %s4567_s22  ;;  %v5029_v17 = vld [vmem:[%s4622_s20 + $0x13d] sm:$0xff]  ;;  %v5032_v16 = vld [vmem:[%s4622_s20 + $0x145] sm:$0xff] }
  0x77   : > { %7056 = vst [vmem:[#allocation23_spill] sm:$0xff] %v5029_v17  ;;  %7057 = vst [vmem:[#allocation24_spill] sm:$0xff] %v5032_v16 }
  0x7a   : > { %586 = vrot.lane.b32.xlu0 %v5009_v0, %s4567_s22  ;;  %588 = vrot.lane.b32.xlu1 %v5012_v1, %s4567_s22  ;;  %v5039_v1 = vld [vmem:[%s4622_s20 + $0x155] sm:$0xff]  ;;  %v5042_v0 = vld [vmem:[%s4622_s20 + $0x15d] sm:$0xff] }
  0x7b   : > { %7058 = vst [vmem:[#allocation25_spill] sm:$0xff] %v5039_v1  ;;  %7059 = vst [vmem:[#allocation26_spill] sm:$0xff] %v5042_v0 }
  0x7e   : > { %590 = vrot.lane.b32.xlu0 %v5019_v2, %s4567_s22  ;;  %592 = vrot.lane.b32.xlu1 %v5022_v3, %s4567_s22 }
  0x82   : > { %594 = vrot.lane.b32.xlu0 %v5029_v17, %s4567_s22  ;;  %596 = vrot.lane.b32.xlu1 %v5032_v16, %s4567_s22  ;;  %v5051_v16 = vld [vmem:[%s4622_s20 + $0x16d] sm:$0xff]  ;;  %v5054_v17 = vld [vmem:[%s4622_s20 + $0x175] sm:$0xff] }
  0x84   : > { %v354_v2 = vpop.permute.xlu0 %353  ;;  %v358_v13 = vpop.permute.xlu1 %357 }
  0x85   : > { %450 = vst.msk [vmem:[#allocation2] sm:$0xff] %vm449_vm1, %v354_v2  ;;  %452 = vst.msk [vmem:[#allocation2 + $0x10] sm:$0xff] %vm449_vm1, %v358_v13  ;;  %v5063_v13 = vld [vmem:[%s4622_s20 + $0x185] sm:$0xff]  ;;  %v5066_v2 = vld [vmem:[%s4622_s20 + $0x18d] sm:$0xff] }
  0x86   : > { %598 = vrot.lane.b32.xlu0 %v5039_v1, %s4567_s22  ;;  %600 = vrot.lane.b32.xlu1 %v5042_v0, %s4567_s22 }
  0x88   : > { %v356_v3 = vpop.permute.xlu0 %355  ;;  %v360_v12 = vpop.permute.xlu1 %359 }
  0x89   : > { %451 = vst.msk [vmem:[#allocation2 + $0x8] sm:$0xff] %vm449_vm1, %v356_v3  ;;  %453 = vst.msk [vmem:[#allocation2 + $0x18] sm:$0xff] %vm449_vm1, %v360_v12 }
  0x8a   : > { %602 = vrot.lane.b32.xlu0 %v5051_v16, %s4567_s22  ;;  %604 = vrot.lane.b32.xlu1 %v5054_v17, %s4567_s22 }
  0x8c   : > { %v362_v0 = vpop.permute.xlu0 %361  ;;  %v364_v1 = vpop.permute.xlu1 %363 }
  0x8d   : > { %454 = vst.msk [vmem:[#allocation2 + $0x20] sm:$0xff] %vm449_vm1, %v362_v0  ;;  %455 = vst.msk [vmem:[#allocation2 + $0x28] sm:$0xff] %vm449_vm1, %v364_v1 }
  0x8e   : > { %606 = vrot.lane.b32.xlu0 %v5063_v13, %s4567_s22  ;;  %608 = vrot.lane.b32.xlu1 %v5066_v2, %s4567_s22  ;;  %s4462_s22 = sshll.u32 %s7085_s16, 4 }
  0x90   : > { %v366_v12 = vpop.permute.xlu0 %365  ;;  %v368_v3 = vpop.permute.xlu1 %367 }
  0x91   : > { %456 = vst.msk [vmem:[#allocation2 + $0x30] sm:$0xff] %vm449_vm1, %v366_v12  ;;  %457 = vst.msk [vmem:[#allocation2 + $0x38] sm:$0xff] %vm449_vm1, %v368_v3 }
  0x92   : > { %740 = vrot.lane.b32.xlu0 %v4690_v19, %s4568_s23  ;;  %742 = vrot.lane.b32.xlu1 %v4693_v20, %s4568_s23 }
  0x94   : > { %v370_v0 = vpop.permute.xlu0 %369  ;;  %v372_v1 = vpop.permute.xlu1 %371 }
  0x95   : > { %458 = vst.msk [vmem:[#allocation2 + $0x40] sm:$0xff] %vm449_vm1, %v370_v0  ;;  %459 = vst.msk [vmem:[#allocation2 + $0x48] sm:$0xff] %vm449_vm1, %v372_v1 }
  0x96   : > { %744 = vrot.lane.b32.xlu0 %v4707_v22, %s4568_s23  ;;  %746 = vrot.lane.b32.xlu1 %v4712_v23, %s4568_s23 }
  0x98   : > { %v374_v12 = vpop.permute.xlu0 %373  ;;  %v376_v3 = vpop.permute.xlu1 %375 }
  0x99   : > { %460 = vst.msk [vmem:[#allocation2 + $0x50] sm:$0xff] %vm449_vm1, %v374_v12  ;;  %461 = vst.msk [vmem:[#allocation2 + $0x58] sm:$0xff] %vm449_vm1, %v376_v3 }
  0x9a   : > { %748 = vrot.lane.b32.xlu0 %v4715_v24, %s4568_s23  ;;  %750 = vrot.lane.b32.xlu1 %v4718_v25, %s4568_s23 }
  0x9c   : > { %v378_v19 = vpop.permute.xlu0 %377  ;;  %v380_v20 = vpop.permute.xlu1 %379 }
  0x9d   : > { %462 = vst.msk [vmem:[#allocation2 + $0x60] sm:$0xff] %vm449_vm1, %v378_v19  ;;  %463 = vst.msk [vmem:[#allocation2 + $0x68] sm:$0xff] %vm449_vm1, %v380_v20 }
  0x9e   : > { %752 = vrot.lane.b32.xlu0 %v4727_v26, %s4568_s23  ;;  %754 = vrot.lane.b32.xlu1 %v4730_v27, %s4568_s23 }
  0xa0   : > { %v382_v22 = vpop.permute.xlu0 %381  ;;  %v384_v23 = vpop.permute.xlu1 %383 }
  0xa1   : > { %464 = vst.msk [vmem:[#allocation2 + $0x70] sm:$0xff] %vm449_vm1, %v382_v22  ;;  %465 = vst.msk [vmem:[#allocation2 + $0x78] sm:$0xff] %vm449_vm1, %v384_v23 }
  0xa2   : > { %756 = vrot.lane.b32.xlu0 %v4733_v28, %s4568_s23  ;;  %758 = vrot.lane.b32.xlu1 %v4748_v31, %s4568_s23 }
  0xa4   : > { %v386_v0 = vpop.permute.xlu0 %385  ;;  %v388_v1 = vpop.permute.xlu1 %387 }
  0xa5   : > { %466 = vst.msk [vmem:[#allocation2 + $0x80] sm:$0xff] %vm449_vm1, %v386_v0  ;;  %467 = vst.msk [vmem:[#allocation2 + $0x88] sm:$0xff] %vm449_vm1, %v388_v1 }
  0xa6   : > { %760 = vrot.lane.b32.xlu0 %v4751_v32, %s4568_s23  ;;  %762 = vrot.lane.b32.xlu1 %v4754_v33, %s4568_s23 }
  0xa8   : > { %v390_v12 = vpop.permute.xlu0 %389  ;;  %v392_v3 = vpop.permute.xlu1 %391 }
  0xa9   : > { %468 = vst.msk [vmem:[#allocation2 + $0x90] sm:$0xff] %vm449_vm1, %v390_v12  ;;  %469 = vst.msk [vmem:[#allocation2 + $0x98] sm:$0xff] %vm449_vm1, %v392_v3 }
  0xaa   : > { %764 = vrot.lane.b32.xlu0 %v4767_v34, %s4568_s23  ;;  %766 = vrot.lane.b32.xlu1 %v4770_v35, %s4568_s23 }
  0xac   : > { %v394_v19 = vpop.permute.xlu0 %393  ;;  %v396_v20 = vpop.permute.xlu1 %395 }
  0xad   : > { %470 = vst.msk [vmem:[#allocation2 + $0xa0] sm:$0xff] %vm449_vm1, %v394_v19  ;;  %471 = vst.msk [vmem:[#allocation2 + $0xa8] sm:$0xff] %vm449_vm1, %v396_v20 }
  0xae   : > { %768 = vrot.lane.b32.xlu0 %v4777_v36, %s4568_s23  ;;  %770 = vrot.lane.b32.xlu1 %v4780_v37, %s4568_s23 }
  0xb0   : > { %v398_v22 = vpop.permute.xlu0 %397  ;;  %v400_v23 = vpop.permute.xlu1 %399 }
  0xb1   : > { %472 = vst.msk [vmem:[#allocation2 + $0xb0] sm:$0xff] %vm449_vm1, %v398_v22  ;;  %473 = vst.msk [vmem:[#allocation2 + $0xb8] sm:$0xff] %vm449_vm1, %v400_v23 }
  0xb2   : > { %772 = vrot.lane.b32.xlu0 %v4783_v38, %s4568_s23  ;;  %774 = vrot.lane.b32.xlu1 %v4792_v39, %s4568_s23 }
  0xb4   : > { %v402_v0 = vpop.permute.xlu0 %401  ;;  %v404_v1 = vpop.permute.xlu1 %403 }
  0xb5   : > { %474 = vst.msk [vmem:[#allocation2 + $0xc0] sm:$0xff] %vm449_vm1, %v402_v0  ;;  %475 = vst.msk [vmem:[#allocation2 + $0xc8] sm:$0xff] %vm449_vm1, %v404_v1 }
  0xb6   : > { %776 = vrot.lane.b32.xlu0 %v4795_v40, %s4568_s23  ;;  %778 = vrot.lane.b32.xlu1 %v4798_v41, %s4568_s23 }
  0xb8   : > { %v406_v12 = vpop.permute.xlu0 %405  ;;  %v408_v3 = vpop.permute.xlu1 %407 }
  0xb9   : > { %476 = vst.msk [vmem:[#allocation2 + $0xd0] sm:$0xff] %vm449_vm1, %v406_v12  ;;  %477 = vst.msk [vmem:[#allocation2 + $0xd8] sm:$0xff] %vm449_vm1, %v408_v3  ;;  %v5159_v12 = vld [vmem:[%s4622_s20 + $0x199] sm:$0xff]  ;;  %v5162_v3 = vld [vmem:[%s4622_s20 + $0x1a1] sm:$0xff] }
  0xba   : > { %780 = vrot.lane.b32.xlu0 %v4817_v44, %s4568_s23  ;;  %782 = vrot.lane.b32.xlu1 %v4822_v45, %s4568_s23 }
  0xbc   : > { %v410_v19 = vpop.permute.xlu0 %409  ;;  %v412_v20 = vpop.permute.xlu1 %411 }
  0xbd   : > { %478 = vst.msk [vmem:[#allocation2 + $0xe0] sm:$0xff] %vm449_vm1, %v410_v19  ;;  %479 = vst.msk [vmem:[#allocation2 + $0xe8] sm:$0xff] %vm449_vm1, %v412_v20 }
  0xbe   : > { %784 = vrot.lane.b32.xlu0 %v4837_v48, %s4568_s23  ;;  %786 = vrot.lane.b32.xlu1 %v4842_v49, %s4568_s23 }
  0xc0   : > { %v414_v22 = vpop.permute.xlu0 %413  ;;  %v416_v23 = vpop.permute.xlu1 %415 }
  0xc1   : > { %480 = vst.msk [vmem:[#allocation2 + $0xf0] sm:$0xff] %vm449_vm1, %v414_v22  ;;  %481 = vst.msk [vmem:[#allocation2 + $0xf8] sm:$0xff] %vm449_vm1, %v416_v23  ;;  %v5171_v22 = vld [vmem:[%s4622_s20 + $0x1b1] sm:$0xff]  ;;  %v5174_v23 = vld [vmem:[%s4622_s20 + $0x1b9] sm:$0xff]  ;;  %vm3540_vm1 = vcmask 589344  }
  0xc2   : > { %788 = vrot.lane.b32.xlu0 %v4857_v52, %s4568_s23  ;;  %790 = vrot.lane.b32.xlu1 %v4862_v53, %s4568_s23 }
  0xc4   : > { %v547_v0 = vpop.permute.xlu0 %546  ;;  %v549_v1 = vpop.permute.xlu1 %548 }
  0xc5   : > { %643 = vst.msk [vmem:[#allocation2] sm:$0xff] %vm642_vm2, %v547_v0  ;;  %644 = vst.msk [vmem:[#allocation2 + $0x8] sm:$0xff] %vm642_vm2, %v549_v1 }
  0xc6   : > { %792 = vrot.lane.b32.xlu0 %v4877_v56, %s4568_s23  ;;  %794 = vrot.lane.b32.xlu1 %v4882_v57, %s4568_s23 }
  0xc8   : > { %v551_v19 = vpop.permute.xlu0 %550  ;;  %v553_v20 = vpop.permute.xlu1 %552 }
  0xc9   : > { %645 = vst.msk [vmem:[#allocation2 + $0x10] sm:$0xff] %vm642_vm2, %v551_v19  ;;  %646 = vst.msk [vmem:[#allocation2 + $0x18] sm:$0xff] %vm642_vm2, %v553_v20 }
  0xca   : > { %796 = vrot.lane.b32.xlu0 %v5159_v12, %s4568_s23  ;;  %798 = vrot.lane.b32.xlu1 %v5162_v3, %s4568_s23 }
  0xcc   : > { %v555_v0 = vpop.permute.xlu0 %554  ;;  %v557_v1 = vpop.permute.xlu1 %556 }
  0xcd   : > { %647 = vst.msk [vmem:[#allocation2 + $0x20] sm:$0xff] %vm642_vm2, %v555_v0  ;;  %648 = vst.msk [vmem:[#allocation2 + $0x28] sm:$0xff] %vm642_vm2, %v557_v1 }
  0xce   : > { %800 = vrot.lane.b32.xlu0 %v5171_v22, %s4568_s23  ;;  %802 = vrot.lane.b32.xlu1 %v5174_v23, %s4568_s23 }
  0xd0   : > { %v559_v19 = vpop.permute.xlu0 %558  ;;  %v561_v20 = vpop.permute.xlu1 %560 }
  0xd1   : > { %649 = vst.msk [vmem:[#allocation2 + $0x30] sm:$0xff] %vm642_vm2, %v559_v19  ;;  %650 = vst.msk [vmem:[#allocation2 + $0x38] sm:$0xff] %vm642_vm2, %v561_v20 }
  0xd2   : > { %933 = vrot.lane.b32.xlu0 %v4633_v4, %s4569_s24  ;;  %935 = vrot.lane.b32.xlu1 %v4636_v5, %s4569_s24 }
  0xd4   : > { %v563_v0 = vpop.permute.xlu0 %562  ;;  %v565_v1 = vpop.permute.xlu1 %564 }
  0xd5   : > { %651 = vst.msk [vmem:[#allocation2 + $0x40] sm:$0xff] %vm642_vm2, %v563_v0  ;;  %652 = vst.msk [vmem:[#allocation2 + $0x48] sm:$0xff] %vm642_vm2, %v565_v1  ;;  %v5282_v0 = vld [vmem:[%s4622_s20 + $0x1bb] sm:$0xff] }
  0xd6   : > { %937 = vrot.lane.b32.xlu0 %v4643_v6, %s4569_s24  ;;  %939 = vrot.lane.b32.xlu1 %v4646_v7, %s4569_s24 }
  0xd8   : > { %v567_v19 = vpop.permute.xlu0 %566  ;;  %v569_v20 = vpop.permute.xlu1 %568 }
  0xd9   : > { %653 = vst.msk [vmem:[#allocation2 + $0x50] sm:$0xff] %vm642_vm2, %v567_v19  ;;  %654 = vst.msk [vmem:[#allocation2 + $0x58] sm:$0xff] %vm642_vm2, %v569_v20 }
  0xda   : > { %941 = vrot.lane.b32.xlu0 %v4653_v8, %s4569_s24  ;;  %943 = vrot.lane.b32.xlu1 %v4656_v9, %s4569_s24 }
  0xdc   : > { %v571_v4 = vpop.permute.xlu0 %570  ;;  %v573_v5 = vpop.permute.xlu1 %572 }
  0xdd   : > { %655 = vst.msk [vmem:[#allocation2 + $0x60] sm:$0xff] %vm642_vm2, %v571_v4  ;;  %656 = vst.msk [vmem:[#allocation2 + $0x68] sm:$0xff] %vm642_vm2, %v573_v5  ;;  %v7060_v4 = vld [vmem:[#allocation3_spill] sm:$0xff]  ;;  %v7061_v5 = vld [vmem:[#allocation4_spill] sm:$0xff] }
  0xde   : > { %945 = vrot.lane.b32.xlu0 %v4663_v10, %s4569_s24  ;;  %947 = vrot.lane.b32.xlu1 %v4666_v11, %s4569_s24 }
  0xe0   : > { %v575_v6 = vpop.permute.xlu0 %574  ;;  %v577_v7 = vpop.permute.xlu1 %576 }
  0xe1   : > { %657 = vst.msk [vmem:[#allocation2 + $0x70] sm:$0xff] %vm642_vm2, %v575_v6  ;;  %658 = vst.msk [vmem:[#allocation2 + $0x78] sm:$0xff] %vm642_vm2, %v577_v7 }
  0xe2   : > { %949 = vrot.lane.b32.xlu0 %v4675_v14, %s4569_s24  ;;  %951 = vrot.lane.b32.xlu1 %v4678_v15, %s4569_s24 }
  0xe4   : > { %v579_v8 = vpop.permute.xlu0 %578  ;;  %v581_v9 = vpop.permute.xlu1 %580 }
  0xe5   : > { %659 = vst.msk [vmem:[#allocation2 + $0x80] sm:$0xff] %vm642_vm2, %v579_v8  ;;  %660 = vst.msk [vmem:[#allocation2 + $0x88] sm:$0xff] %vm642_vm2, %v581_v9  ;;  %v7062_v8 = vld [vmem:[#allocation5_spill] sm:$0xff]  ;;  %v7063_v9 = vld [vmem:[#allocation6_spill] sm:$0xff] }
  0xe6   : > { %953 = vrot.lane.b32.xlu0 %v4686_v18, %s4569_s24  ;;  %955 = vrot.lane.b32.xlu1 %v4700_v21, %s4569_s24 }
  0xe8   : > { %v583_v10 = vpop.permute.xlu0 %582  ;;  %v585_v11 = vpop.permute.xlu1 %584 }
  0xe9   : > { %661 = vst.msk [vmem:[#allocation2 + $0x90] sm:$0xff] %vm642_vm2, %v583_v10  ;;  %662 = vst.msk [vmem:[#allocation2 + $0x98] sm:$0xff] %vm642_vm2, %v585_v11 }
  0xea   : > { %957 = vrot.lane.b32.xlu0 %v4736_v29, %s4569_s24  ;;  %959 = vrot.lane.b32.xlu1 %v4739_v30, %s4569_s24 }
  0xec   : > { %v587_v14 = vpop.permute.xlu0 %586  ;;  %v589_v15 = vpop.permute.xlu1 %588 }
  0xed   : > { %663 = vst.msk [vmem:[#allocation2 + $0xa0] sm:$0xff] %vm642_vm2, %v587_v14  ;;  %664 = vst.msk [vmem:[#allocation2 + $0xa8] sm:$0xff] %vm642_vm2, %v589_v15  ;;  %v7064_v14 = vld [vmem:[#allocation7_spill] sm:$0xff]  ;;  %v7065_v15 = vld [vmem:[#allocation8_spill] sm:$0xff] }
  0xee   : > { %961 = vrot.lane.b32.xlu0 %v4811_v42, %s4569_s24  ;;  %963 = vrot.lane.b32.xlu1 %v4814_v43, %s4569_s24 }
  0xf0   : > { %v591_v18 = vpop.permute.xlu0 %590  ;;  %v593_v21 = vpop.permute.xlu1 %592 }
  0xf1   : > { %665 = vst.msk [vmem:[#allocation2 + $0xb0] sm:$0xff] %vm642_vm2, %v591_v18  ;;  %666 = vst.msk [vmem:[#allocation2 + $0xb8] sm:$0xff] %vm642_vm2, %v593_v21 }
  0xf2   : > { %965 = vrot.lane.b32.xlu0 %v4831_v46, %s4569_s24  ;;  %967 = vrot.lane.b32.xlu1 %v4834_v47, %s4569_s24 }
  0xf4   : > { %v595_v29 = vpop.permute.xlu0 %594  ;;  %v597_v30 = vpop.permute.xlu1 %596 }
  0xf5   : > { %667 = vst.msk [vmem:[#allocation2 + $0xc0] sm:$0xff] %vm642_vm2, %v595_v29  ;;  %668 = vst.msk [vmem:[#allocation2 + $0xc8] sm:$0xff] %vm642_vm2, %v597_v30  ;;  %v7066_v29 = vld [vmem:[#allocation9_spill] sm:$0xff]  ;;  %v7067_v30 = vld [vmem:[#allocation10_spill] sm:$0xff] }
  0xf6   : > { %969 = vrot.lane.b32.xlu0 %v4851_v50, %s4569_s24  ;;  %971 = vrot.lane.b32.xlu1 %v4854_v51, %s4569_s24 }
  0xf8   : > { %v599_v42 = vpop.permute.xlu0 %598  ;;  %v601_v43 = vpop.permute.xlu1 %600 }
  0xf9   : > { %669 = vst.msk [vmem:[#allocation2 + $0xd0] sm:$0xff] %vm642_vm2, %v599_v42  ;;  %670 = vst.msk [vmem:[#allocation2 + $0xd8] sm:$0xff] %vm642_vm2, %v601_v43 }
  0xfa   : > { %973 = vrot.lane.b32.xlu0 %v4871_v54, %s4569_s24  ;;  %975 = vrot.lane.b32.xlu1 %v4874_v55, %s4569_s24 }
  0xfc   : > { %v603_v46 = vpop.permute.xlu0 %602  ;;  %v605_v47 = vpop.permute.xlu1 %604 }
  0xfd   : > { %671 = vst.msk [vmem:[#allocation2 + $0xe0] sm:$0xff] %vm642_vm2, %v603_v46  ;;  %672 = vst.msk [vmem:[#allocation2 + $0xe8] sm:$0xff] %vm642_vm2, %v605_v47  ;;  %v7068_v46 = vld [vmem:[#allocation11_spill] sm:$0xff]  ;;  %v7069_v47 = vld [vmem:[#allocation12_spill] sm:$0xff] }
  0xfe   : > { %977 = vrot.lane.b32.xlu0 %v4891_v58, %s4569_s24  ;;  %979 = vrot.lane.b32.xlu1 %v4894_v59, %s4569_s24  ;;  %v5267_v58 = vld [vmem:[%s4622_s20 + $0x19b] sm:$0xff]  ;;  %v5270_v59 = vld [vmem:[%s4622_s20 + $0x1a3] sm:$0xff] }
 0x100   : > { %v607_v50 = vpop.permute.xlu0 %606  ;;  %v609_v51 = vpop.permute.xlu1 %608 }
 0x101   : > { %673 = vst.msk [vmem:[#allocation2 + $0xf0] sm:$0xff] %vm642_vm2, %v607_v50  ;;  %674 = vst.msk [vmem:[#allocation2 + $0xf8] sm:$0xff] %vm642_vm2, %v609_v51  ;;  %vm3607_vm2 = vcmask 588800  }
 0x102   : > { %981 = vrot.lane.b32.xlu0 %v4901_v60, %s4569_s24  ;;  %983 = vrot.lane.b32.xlu1 %v4904_v61, %s4569_s24 }
 0x104   : > { %v741_v54 = vpop.permute.xlu0 %740  ;;  %v743_v55 = vpop.permute.xlu1 %742 }
 0x105   : > { %837 = vst.msk [vmem:[#allocation2] sm:$0xff] %vm836_vm3, %v741_v54  ;;  %838 = vst.msk [vmem:[#allocation2 + $0x8] sm:$0xff] %vm836_vm3, %v743_v55  ;;  %v7070_v54 = vld [vmem:[#allocation13_spill] sm:$0xff]  ;;  %v7071_v55 = vld [vmem:[#allocation14_spill] sm:$0xff] }
 0x106   : > { %985 = vrot.lane.b32.xlu0 %v4911_v62, %s4569_s24  ;;  %987 = vrot.lane.b32.xlu1 %v4914_v63, %s4569_s24  ;;  %v5279_v62 = vld [vmem:[%s4622_s20 + $0x1b3] sm:$0xff] }
 0x108   : > { %v745_v60 = vpop.permute.xlu0 %744  ;;  %v747_v61 = vpop.permute.xlu1 %746 }
 0x109   : > { %839 = vst.msk [vmem:[#allocation2 + $0x10] sm:$0xff] %vm836_vm3, %v745_v60  ;;  %840 = vst.msk [vmem:[#allocation2 + $0x18] sm:$0xff] %vm836_vm3, %v747_v61 }
 0x10a   : > { %989 = vrot.lane.b32.xlu0 %v5267_v58, %s4569_s24  ;;  %991 = vrot.lane.b32.xlu1 %v5270_v59, %s4569_s24 }
 0x10c   : > { %v749_v63 = vpop.permute.xlu0 %748  ;;  %v751_v1 = vpop.permute.xlu1 %750 }
 0x10d   : > { %841 = vst.msk [vmem:[#allocation2 + $0x20] sm:$0xff] %vm836_vm3, %v749_v63  ;;  %842 = vst.msk [vmem:[#allocation2 + $0x28] sm:$0xff] %vm836_vm3, %v751_v1  ;;  %v7072_v63 = vld [vmem:[#allocation15_spill] sm:$0xff]  ;;  %v7073_v1 = vld [vmem:[#allocation16_spill] sm:$0xff] }
 0x10e   : > { %993 = vrot.lane.b32.xlu0 %v5279_v62, %s4569_s24  ;;  %995 = vrot.lane.b32.xlu1 %v5282_v0, %s4569_s24 }
 0x110   : > { %v753_v19 = vpop.permute.xlu0 %752  ;;  %v755_v20 = vpop.permute.xlu1 %754 }
 0x111   : > { %843 = vst.msk [vmem:[#allocation2 + $0x30] sm:$0xff] %vm836_vm3, %v753_v19  ;;  %844 = vst.msk [vmem:[#allocation2 + $0x38] sm:$0xff] %vm836_vm3, %v755_v20 }
 0x112   : > { %1126 = vrot.lane.b32.xlu0 %v7060_v4, %s4570_s25  ;;  %1128 = vrot.lane.b32.xlu1 %v7061_v5, %s4570_s25  ;;  %v7074_v4 = vld [vmem:[#allocation17_spill] sm:$0xff]  ;;  %v7075_v5 = vld [vmem:[#allocation18_spill] sm:$0xff] }
 0x114   : > { %v757_v6 = vpop.permute.xlu0 %756  ;;  %v759_v7 = vpop.permute.xlu1 %758 }
 0x115   : > { %845 = vst.msk [vmem:[#allocation2 + $0x40] sm:$0xff] %vm836_vm3, %v757_v6  ;;  %846 = vst.msk [vmem:[#allocation2 + $0x48] sm:$0xff] %vm836_vm3, %v759_v7 }
 0x116   : > { %1130 = vrot.lane.b32.xlu0 %v7062_v8, %s4570_s25  ;;  %1132 = vrot.lane.b32.xlu1 %v7063_v9, %s4570_s25  ;;  %v7076_v8 = vld [vmem:[#allocation19_spill] sm:$0xff]  ;;  %v7077_v9 = vld [vmem:[#allocation20_spill] sm:$0xff] }
 0x118   : > { %v761_v10 = vpop.permute.xlu0 %760  ;;  %v763_v11 = vpop.permute.xlu1 %762 }
 0x119   : > { %847 = vst.msk [vmem:[#allocation2 + $0x50] sm:$0xff] %vm836_vm3, %v761_v10  ;;  %848 = vst.msk [vmem:[#allocation2 + $0x58] sm:$0xff] %vm836_vm3, %v763_v11 }
 0x11a   : > { %1134 = vrot.lane.b32.xlu0 %v7064_v14, %s4570_s25  ;;  %1136 = vrot.lane.b32.xlu1 %v7065_v15, %s4570_s25  ;;  %v7078_v14 = vld [vmem:[#allocation21_spill] sm:$0xff]  ;;  %v7079_v15 = vld [vmem:[#allocation22_spill] sm:$0xff] }
 0x11c   : > { %v765_v18 = vpop.permute.xlu0 %764  ;;  %v767_v21 = vpop.permute.xlu1 %766 }
 0x11d   : > { %849 = vst.msk [vmem:[#allocation2 + $0x60] sm:$0xff] %vm836_vm3, %v765_v18  ;;  %850 = vst.msk [vmem:[#allocation2 + $0x68] sm:$0xff] %vm836_vm3, %v767_v21 }
 0x11e   : > { %1138 = vrot.lane.b32.xlu0 %v7066_v29, %s4570_s25  ;;  %1140 = vrot.lane.b32.xlu1 %v7067_v30, %s4570_s25  ;;  %v7080_v29 = vld [vmem:[#allocation23_spill] sm:$0xff]  ;;  %v7081_v30 = vld [vmem:[#allocation24_spill] sm:$0xff] }
 0x120   : > { %v769_v42 = vpop.permute.xlu0 %768  ;;  %v771_v43 = vpop.permute.xlu1 %770 }
 0x121   : > { %851 = vst.msk [vmem:[#allocation2 + $0x70] sm:$0xff] %vm836_vm3, %v769_v42  ;;  %852 = vst.msk [vmem:[#allocation2 + $0x78] sm:$0xff] %vm836_vm3, %v771_v43 }
 0x122   : > { %1142 = vrot.lane.b32.xlu0 %v7068_v46, %s4570_s25  ;;  %1144 = vrot.lane.b32.xlu1 %v7069_v47, %s4570_s25  ;;  %v7082_v46 = vld [vmem:[#allocation25_spill] sm:$0xff]  ;;  %v7083_v47 = vld [vmem:[#allocation26_spill] sm:$0xff] }
 0x124   : > { %v773_v50 = vpop.permute.xlu0 %772  ;;  %v775_v51 = vpop.permute.xlu1 %774 }
 0x125   : > { %853 = vst.msk [vmem:[#allocation2 + $0x80] sm:$0xff] %vm836_vm3, %v773_v50  ;;  %854 = vst.msk [vmem:[#allocation2 + $0x88] sm:$0xff] %vm836_vm3, %v775_v51 }
 0x126   : > { %1146 = vrot.lane.b32.xlu0 %v7070_v54, %s4570_s25  ;;  %1148 = vrot.lane.b32.xlu1 %v7071_v55, %s4570_s25 }
 0x128   : > { %v777_v60 = vpop.permute.xlu0 %776  ;;  %v779_v61 = vpop.permute.xlu1 %778 }
 0x129   : > { %855 = vst.msk [vmem:[#allocation2 + $0x90] sm:$0xff] %vm836_vm3, %v777_v60  ;;  %856 = vst.msk [vmem:[#allocation2 + $0x98] sm:$0xff] %vm836_vm3, %v779_v61  ;;  %v5375_v60 = vld [vmem:[%s4622_s20 + $0x19d] sm:$0xff] }
 0x12a   : > { %1150 = vrot.lane.b32.xlu0 %v7072_v63, %s4570_s25  ;;  %1152 = vrot.lane.b32.xlu1 %v7073_v1, %s4570_s25  ;;  %v5390_v63 = vld [vmem:[%s4622_s20 + $0x1bd] sm:$0xff] }
 0x12c   : > { %v781_v19 = vpop.permute.xlu0 %780  ;;  %v783_v20 = vpop.permute.xlu1 %782 }
 0x12d   : > { %857 = vst.msk [vmem:[#allocation2 + $0xa0] sm:$0xff] %vm836_vm3, %v781_v19  ;;  %858 = vst.msk [vmem:[#allocation2 + $0xa8] sm:$0xff] %vm836_vm3, %v783_v20 }
 0x12e   : > { %1154 = vrot.lane.b32.xlu0 %v7074_v4, %s4570_s25  ;;  %1156 = vrot.lane.b32.xlu1 %v7075_v5, %s4570_s25 }
 0x130   : > { %v785_v6 = vpop.permute.xlu0 %784  ;;  %v787_v7 = vpop.permute.xlu1 %786 }
 0x131   : > { %859 = vst.msk [vmem:[#allocation2 + $0xb0] sm:$0xff] %vm836_vm3, %v785_v6  ;;  %860 = vst.msk [vmem:[#allocation2 + $0xb8] sm:$0xff] %vm836_vm3, %v787_v7 }
 0x132   : > { %1158 = vrot.lane.b32.xlu0 %v7076_v8, %s4570_s25  ;;  %1160 = vrot.lane.b32.xlu1 %v7077_v9, %s4570_s25  ;;  %v4167_v8 = vld [vmem:[%s4622_s20 + $0x1e1] sm:$0xff]  ;;  %v4168_v9 = vld [vmem:[%s4622_s20 + $0x1e9] sm:$0xff] }
 0x134   : > { %v789_v10 = vpop.permute.xlu0 %788  ;;  %v791_v11 = vpop.permute.xlu1 %790 }
 0x135   : > { %861 = vst.msk [vmem:[#allocation2 + $0xc0] sm:$0xff] %vm836_vm3, %v789_v10  ;;  %862 = vst.msk [vmem:[#allocation2 + $0xc8] sm:$0xff] %vm836_vm3, %v791_v11  ;;  %v5495_v10 = vld [vmem:[%s4622_s20 + $0x7b] sm:$0xff]  ;;  %v5498_v11 = vld [vmem:[%s4622_s20 + $0x83] sm:$0xff] }
 0x136   : > { %1162 = vrot.lane.b32.xlu0 %v7078_v14, %s4570_s25  ;;  %1164 = vrot.lane.b32.xlu1 %v7079_v15, %s4570_s25 }
 0x138   : > { %v793_v18 = vpop.permute.xlu0 %792  ;;  %v795_v21 = vpop.permute.xlu1 %794 }
 0x139   : > { %863 = vst.msk [vmem:[#allocation2 + $0xd0] sm:$0xff] %vm836_vm3, %v793_v18  ;;  %864 = vst.msk [vmem:[#allocation2 + $0xd8] sm:$0xff] %vm836_vm3, %v795_v21  ;;  %v5507_v18 = vld [vmem:[%s4622_s20 + $0x93] sm:$0xff]  ;;  %v5510_v21 = vld [vmem:[%s4622_s20 + $0x9b] sm:$0xff] }
 0x13a   : > { %1166 = vrot.lane.b32.xlu0 %v7080_v29, %s4570_s25  ;;  %1168 = vrot.lane.b32.xlu1 %v7081_v30, %s4570_s25 }
 0x13c   : > { %v797_v42 = vpop.permute.xlu0 %796  ;;  %v799_v43 = vpop.permute.xlu1 %798 }
 0x13d   : > { %865 = vst.msk [vmem:[#allocation2 + $0xe0] sm:$0xff] %vm836_vm3, %v797_v42  ;;  %866 = vst.msk [vmem:[#allocation2 + $0xe8] sm:$0xff] %vm836_vm3, %v799_v43  ;;  %v5519_v42 = vld [vmem:[%s4622_s20 + $0xab] sm:$0xff]  ;;  %v5522_v43 = vld [vmem:[%s4622_s20 + $0xb3] sm:$0xff] }
 0x13e   : > { %1170 = vrot.lane.b32.xlu0 %v7082_v46, %s4570_s25  ;;  %1172 = vrot.lane.b32.xlu1 %v7083_v47, %s4570_s25 }
 0x140   : > { %v801_v50 = vpop.permute.xlu0 %800  ;;  %v803_v51 = vpop.permute.xlu1 %802 }
 0x141   : > { %867 = vst.msk [vmem:[#allocation2 + $0xf0] sm:$0xff] %vm836_vm3, %v801_v50  ;;  %868 = vst.msk [vmem:[#allocation2 + $0xf8] sm:$0xff] %vm836_vm3, %v803_v51  ;;  %v5531_v50 = vld [vmem:[%s4622_s20 + $0xc3] sm:$0xff]  ;;  %v5534_v51 = vld [vmem:[%s4622_s20 + $0xcb] sm:$0xff]  ;;  %vm3797_vm3 = vcmask 7168  }
 0x142   : > { %1174 = vrot.lane.b32.xlu0 %v5051_v16, %s4570_s25  ;;  %1176 = vrot.lane.b32.xlu1 %v5054_v17, %s4570_s25  ;;  %v5378_v16 = vld [vmem:[%s4622_s20 + $0x1a5] sm:$0xff] }
 0x144   : > { %v934_v54 = vpop.permute.xlu0 %933  ;;  %v936_v55 = vpop.permute.xlu1 %935 }
 0x145   : > { %1030 = vst.msk [vmem:[#allocation2] sm:$0xff] %vm1029_vm4, %v934_v54  ;;  %1031 = vst.msk [vmem:[#allocation2 + $0x8] sm:$0xff] %vm1029_vm4, %v936_v55 }
 0x146   : > { %1178 = vrot.lane.b32.xlu0 %v5063_v13, %s4570_s25  ;;  %1180 = vrot.lane.b32.xlu1 %v5066_v2, %s4570_s25  ;;  %v5387_v13 = vld [vmem:[%s4622_s20 + $0x1b5] sm:$0xff] }
 0x148   : > { %v938_v17 = vpop.permute.xlu0 %937  ;;  %v940_v61 = vpop.permute.xlu1 %939 }
 0x149   : > { %1032 = vst.msk [vmem:[#allocation2 + $0x10] sm:$0xff] %vm1029_vm4, %v938_v17  ;;  %1033 = vst.msk [vmem:[#allocation2 + $0x18] sm:$0xff] %vm1029_vm4, %v940_v61  ;;  %v5543_v17 = vld [vmem:[%s4622_s20 + $0xdb] sm:$0xff]  ;;  %v5546_v61 = vld [vmem:[%s4622_s20 + $0xe3] sm:$0xff] }
 0x14a   : > { %1182 = vrot.lane.b32.xlu0 %v5375_v60, %s4570_s25  ;;  %1184 = vrot.lane.b32.xlu1 %v5378_v16, %s4570_s25 }
 0x14c   : > { %v942_v2 = vpop.permute.xlu0 %941  ;;  %v944_v1 = vpop.permute.xlu1 %943 }
 0x14d   : > { %1034 = vst.msk [vmem:[#allocation2 + $0x20] sm:$0xff] %vm1029_vm4, %v942_v2  ;;  %1035 = vst.msk [vmem:[#allocation2 + $0x28] sm:$0xff] %vm1029_vm4, %v944_v1 }
 0x14e   : > { %1186 = vrot.lane.b32.xlu0 %v5387_v13, %s4570_s25  ;;  %1188 = vrot.lane.b32.xlu1 %v5390_v63, %s4570_s25  ;;  %s217_s25 = scalar_lea.vmem %s7010_s3, %s4462_s22 }
 0x150   : > { %v946_v19 = vpop.permute.xlu0 %945  ;;  %v948_v20 = vpop.permute.xlu1 %947 }
 0x151   : > { %1036 = vst.msk [vmem:[#allocation2 + $0x30] sm:$0xff] %vm1029_vm4, %v946_v19  ;;  %1037 = vst.msk [vmem:[#allocation2 + $0x38] sm:$0xff] %vm1029_vm4, %v948_v20  ;;  %v5555_v19 = vld [vmem:[%s4622_s20 + $0xf3] sm:$0xff]  ;;  %v5558_v20 = vld [vmem:[%s4622_s20 + $0xfb] sm:$0xff] }
 0x152   : > { %1320 = vrot.lane.b32.xlu0 %v4715_v24, %s4571_s26  ;;  %1322 = vrot.lane.b32.xlu1 %v4718_v25, %s4571_s26 }
 0x154   : > { %v950_v4 = vpop.permute.xlu0 %949  ;;  %v952_v5 = vpop.permute.xlu1 %951 }
 0x155   : > { %1038 = vst.msk [vmem:[#allocation2 + $0x40] sm:$0xff] %vm1029_vm4, %v950_v4  ;;  %1039 = vst.msk [vmem:[#allocation2 + $0x48] sm:$0xff] %vm1029_vm4, %v952_v5 }
 0x156   : > { %1324 = vrot.lane.b32.xlu0 %v4727_v26, %s4571_s26  ;;  %1326 = vrot.lane.b32.xlu1 %v4730_v27, %s4571_s26 }
 0x158   : > { %v954_v6 = vpop.permute.xlu0 %953  ;;  %v956_v7 = vpop.permute.xlu1 %955 }
 0x159   : > { %1040 = vst.msk [vmem:[#allocation2 + $0x50] sm:$0xff] %vm1029_vm4, %v954_v6  ;;  %1041 = vst.msk [vmem:[#allocation2 + $0x58] sm:$0xff] %vm1029_vm4, %v956_v7  ;;  %v5567_v6 = vld [vmem:[%s4622_s20 + $0x10b] sm:$0xff]  ;;  %v5570_v7 = vld [vmem:[%s4622_s20 + $0x113] sm:$0xff] }
 0x15a   : > { %1328 = vrot.lane.b32.xlu0 %v4733_v28, %s4571_s26  ;;  %1330 = vrot.lane.b32.xlu1 %v4748_v31, %s4571_s26 }
 0x15c   : > { %v958_v24 = vpop.permute.xlu0 %957  ;;  %v960_v25 = vpop.permute.xlu1 %959 }
 0x15d   : > { %1042 = vst.msk [vmem:[#allocation2 + $0x60] sm:$0xff] %vm1029_vm4, %v958_v24  ;;  %1043 = vst.msk [vmem:[#allocation2 + $0x68] sm:$0xff] %vm1029_vm4, %v960_v25 }
 0x15e   : > { %1332 = vrot.lane.b32.xlu0 %v4751_v32, %s4571_s26  ;;  %1334 = vrot.lane.b32.xlu1 %v4754_v33, %s4571_s26 }
 0x160   : > { %v962_v26 = vpop.permute.xlu0 %961  ;;  %v964_v27 = vpop.permute.xlu1 %963 }
 0x161   : > { %1044 = vst.msk [vmem:[#allocation2 + $0x70] sm:$0xff] %vm1029_vm4, %v962_v26  ;;  %1045 = vst.msk [vmem:[#allocation2 + $0x78] sm:$0xff] %vm1029_vm4, %v964_v27  ;;  %v5579_v26 = vld [vmem:[%s4622_s20 + $0x123] sm:$0xff]  ;;  %v5582_v27 = vld [vmem:[%s4622_s20 + $0x12b] sm:$0xff] }
 0x162   : > { %1336 = vrot.lane.b32.xlu0 %v4767_v34, %s4571_s26  ;;  %1338 = vrot.lane.b32.xlu1 %v4770_v35, %s4571_s26 }
 0x164   : > { %v966_v28 = vpop.permute.xlu0 %965  ;;  %v968_v31 = vpop.permute.xlu1 %967 }
 0x165   : > { %1046 = vst.msk [vmem:[#allocation2 + $0x80] sm:$0xff] %vm1029_vm4, %v966_v28  ;;  %1047 = vst.msk [vmem:[#allocation2 + $0x88] sm:$0xff] %vm1029_vm4, %v968_v31 }
 0x166   : > { %1340 = vrot.lane.b32.xlu0 %v4777_v36, %s4571_s26  ;;  %1342 = vrot.lane.b32.xlu1 %v4780_v37, %s4571_s26 }
 0x168   : > { %v970_v32 = vpop.permute.xlu0 %969  ;;  %v972_v33 = vpop.permute.xlu1 %971 }
 0x169   : > { %1048 = vst.msk [vmem:[#allocation2 + $0x90] sm:$0xff] %vm1029_vm4, %v970_v32  ;;  %1049 = vst.msk [vmem:[#allocation2 + $0x98] sm:$0xff] %vm1029_vm4, %v972_v33  ;;  %v5591_v32 = vld [vmem:[%s4622_s20 + $0x13b] sm:$0xff]  ;;  %v5594_v33 = vld [vmem:[%s4622_s20 + $0x143] sm:$0xff] }
 0x16a   : > { %1344 = vrot.lane.b32.xlu0 %v4783_v38, %s4571_s26  ;;  %1346 = vrot.lane.b32.xlu1 %v4792_v39, %s4571_s26 }
 0x16c   : > { %v974_v34 = vpop.permute.xlu0 %973  ;;  %v976_v35 = vpop.permute.xlu1 %975 }
 0x16d   : > { %1050 = vst.msk [vmem:[#allocation2 + $0xa0] sm:$0xff] %vm1029_vm4, %v974_v34  ;;  %1051 = vst.msk [vmem:[#allocation2 + $0xa8] sm:$0xff] %vm1029_vm4, %v976_v35 }
 0x16e   : > { %1348 = vrot.lane.b32.xlu0 %v4795_v40, %s4571_s26  ;;  %1350 = vrot.lane.b32.xlu1 %v4798_v41, %s4571_s26 }
 0x170   : > { %v978_v36 = vpop.permute.xlu0 %977  ;;  %v980_v37 = vpop.permute.xlu1 %979 }
 0x171   : > { %1052 = vst.msk [vmem:[#allocation2 + $0xb0] sm:$0xff] %vm1029_vm4, %v978_v36  ;;  %1053 = vst.msk [vmem:[#allocation2 + $0xb8] sm:$0xff] %vm1029_vm4, %v980_v37  ;;  %v5603_v36 = vld [vmem:[%s4622_s20 + $0x153] sm:$0xff]  ;;  %v5606_v37 = vld [vmem:[%s4622_s20 + $0x15b] sm:$0xff] }
 0x172   : > { %1352 = vrot.lane.b32.xlu0 %v4817_v44, %s4571_s26  ;;  %1354 = vrot.lane.b32.xlu1 %v4822_v45, %s4571_s26 }
 0x174   : > { %v982_v38 = vpop.permute.xlu0 %981  ;;  %v984_v39 = vpop.permute.xlu1 %983 }
 0x175   : > { %1054 = vst.msk [vmem:[#allocation2 + $0xc0] sm:$0xff] %vm1029_vm4, %v982_v38  ;;  %1055 = vst.msk [vmem:[#allocation2 + $0xc8] sm:$0xff] %vm1029_vm4, %v984_v39 }
 0x176   : > { %1356 = vrot.lane.b32.xlu0 %v4837_v48, %s4571_s26  ;;  %1358 = vrot.lane.b32.xlu1 %v4842_v49, %s4571_s26 }
 0x178   : > { %v986_v40 = vpop.permute.xlu0 %985  ;;  %v988_v41 = vpop.permute.xlu1 %987 }
 0x179   : > { %1056 = vst.msk [vmem:[#allocation2 + $0xd0] sm:$0xff] %vm1029_vm4, %v986_v40  ;;  %1057 = vst.msk [vmem:[#allocation2 + $0xd8] sm:$0xff] %vm1029_vm4, %v988_v41  ;;  %v5615_v40 = vld [vmem:[%s4622_s20 + $0x16b] sm:$0xff]  ;;  %v5618_v41 = vld [vmem:[%s4622_s20 + $0x173] sm:$0xff] }
 0x17a   : > { %1360 = vrot.lane.b32.xlu0 %v4857_v52, %s4571_s26  ;;  %1362 = vrot.lane.b32.xlu1 %v4862_v53, %s4571_s26 }
 0x17c   : > { %v990_v44 = vpop.permute.xlu0 %989  ;;  %v992_v45 = vpop.permute.xlu1 %991 }
 0x17d   : > { %1058 = vst.msk [vmem:[#allocation2 + $0xe0] sm:$0xff] %vm1029_vm4, %v990_v44  ;;  %1059 = vst.msk [vmem:[#allocation2 + $0xe8] sm:$0xff] %vm1029_vm4, %v992_v45 }
 0x17e   : > { %1364 = vrot.lane.b32.xlu0 %v4877_v56, %s4571_s26  ;;  %1366 = vrot.lane.b32.xlu1 %v4882_v57, %s4571_s26  ;;  %v4165_v56 = vld [vmem:[%s4622_s20 + $0x1c9] sm:$0xff]  ;;  %v4166_v57 = vld [vmem:[%s4622_s20 + $0x1d1] sm:$0xff] }
 0x180   : > { %v994_v48 = vpop.permute.xlu0 %993  ;;  %v996_v49 = vpop.permute.xlu1 %995 }
 0x181   : > { %1060 = vst.msk [vmem:[#allocation2 + $0xf0] sm:$0xff] %vm1029_vm4, %v994_v48  ;;  %1061 = vst.msk [vmem:[#allocation2 + $0xf8] sm:$0xff] %vm1029_vm4, %v996_v49  ;;  %v4191_v48 = vld [vmem:[%s4622_s20 + $0x183] sm:$0xff]  ;;  %v4192_v49 = vld [vmem:[%s4622_s20 + $0x18b] sm:$0xff] }
 0x182   : > { %1368 = vrot.lane.b32.xlu0 %v5159_v12, %s4571_s26  ;;  %1370 = vrot.lane.b32.xlu1 %v5162_v3, %s4571_s26 }
 0x184   : > { %v1127_v52 = vpop.permute.xlu0 %1126  ;;  %v1129_v53 = vpop.permute.xlu1 %1128 }
 0x185   : > { %1223 = vst.msk [vmem:[#allocation2] sm:$0xff] %vm1222_vm5, %v1127_v52  ;;  %1224 = vst.msk [vmem:[#allocation2 + $0x8] sm:$0xff] %vm1222_vm5, %v1129_v53 }
 0x186   : > { %1372 = vrot.lane.b32.xlu0 %v5171_v22, %s4571_s26  ;;  %1374 = vrot.lane.b32.xlu1 %v5174_v23, %s4571_s26 }
 0x188   : > { %v1131_v12 = vpop.permute.xlu0 %1130  ;;  %v1133_v3 = vpop.permute.xlu1 %1132 }
 0x189   : > { %1225 = vst.msk [vmem:[#allocation2 + $0x10] sm:$0xff] %vm1222_vm5, %v1131_v12  ;;  %1226 = vst.msk [vmem:[#allocation2 + $0x18] sm:$0xff] %vm1222_vm5, %v1133_v3 }
 0x18a   : > { %1376 = vrot.lane.b32.xlu0 %v4165_v56, %s4571_s26  ;;  %1378 = vrot.lane.b32.xlu1 %v4166_v57, %s4571_s26 }
 0x18c   : > { %v1135_v22 = vpop.permute.xlu0 %1134  ;;  %v1137_v23 = vpop.permute.xlu1 %1136 }
 0x18d   : > { %1227 = vst.msk [vmem:[#allocation2 + $0x20] sm:$0xff] %vm1222_vm5, %v1135_v22  ;;  %1228 = vst.msk [vmem:[#allocation2 + $0x28] sm:$0xff] %vm1222_vm5, %v1137_v23  ;;  %v4199_v22 = vld [vmem:[%s4622_s20 + $0x1e3] sm:$0xff]  ;;  %v4200_v23 = vld [vmem:[%s4622_s20 + $0x1eb] sm:$0xff] }
 0x18e   : > { %1380 = vrot.lane.b32.xlu0 %v4167_v8, %s4571_s26  ;;  %1382 = vrot.lane.b32.xlu1 %v4168_v9, %s4571_s26  ;;  %v4197_v8 = vld [vmem:[%s4622_s20 + $0x1cb] sm:$0xff] }
 0x190   : > { %v1139_v14 = vpop.permute.xlu0 %1138  ;;  %v1141_v15 = vpop.permute.xlu1 %1140 }
 0x191   : > { %1229 = vst.msk [vmem:[#allocation2 + $0x30] sm:$0xff] %vm1222_vm5, %v1139_v14  ;;  %1230 = vst.msk [vmem:[#allocation2 + $0x38] sm:$0xff] %vm1222_vm5, %v1141_v15  ;;  %v4201_v14 = vld [vmem:[%s4622_s20 + $0x7d] sm:$0xff]  ;;  %v4202_v15 = vld [vmem:[%s4622_s20 + $0x85] sm:$0xff] }
 0x192   : > { %1513 = vrot.lane.b32.xlu0 %v5495_v10, %s4572_s27  ;;  %1515 = vrot.lane.b32.xlu1 %v5498_v11, %s4572_s27 }
 0x194   : > { %v1143_v29 = vpop.permute.xlu0 %1142  ;;  %v1145_v30 = vpop.permute.xlu1 %1144 }
 0x195   : > { %1231 = vst.msk [vmem:[#allocation2 + $0x40] sm:$0xff] %vm1222_vm5, %v1143_v29  ;;  %1232 = vst.msk [vmem:[#allocation2 + $0x48] sm:$0xff] %vm1222_vm5, %v1145_v30 }
 0x196   : > { %1517 = vrot.lane.b32.xlu0 %v5507_v18, %s4572_s27  ;;  %1519 = vrot.lane.b32.xlu1 %v5510_v21, %s4572_s27 }
 0x198   : > { %v1147_v46 = vpop.permute.xlu0 %1146  ;;  %v1149_v47 = vpop.permute.xlu1 %1148 }
 0x199   : > { %1233 = vst.msk [vmem:[#allocation2 + $0x50] sm:$0xff] %vm1222_vm5, %v1147_v46  ;;  %1234 = vst.msk [vmem:[#allocation2 + $0x58] sm:$0xff] %vm1222_vm5, %v1149_v47  ;;  %v4203_v46 = vld [vmem:[%s4622_s20 + $0x95] sm:$0xff]  ;;  %v4204_v47 = vld [vmem:[%s4622_s20 + $0x9d] sm:$0xff] }
 0x19a   : > { %1521 = vrot.lane.b32.xlu0 %v5519_v42, %s4572_s27  ;;  %1523 = vrot.lane.b32.xlu1 %v5522_v43, %s4572_s27 }
 0x19c   : > { %v1151_v54 = vpop.permute.xlu0 %1150  ;;  %v1153_v55 = vpop.permute.xlu1 %1152 }
 0x19d   : > { %1235 = vst.msk [vmem:[#allocation2 + $0x60] sm:$0xff] %vm1222_vm5, %v1151_v54  ;;  %1236 = vst.msk [vmem:[#allocation2 + $0x68] sm:$0xff] %vm1222_vm5, %v1153_v55 }
 0x19e   : > { %1525 = vrot.lane.b32.xlu0 %v5531_v50, %s4572_s27  ;;  %1527 = vrot.lane.b32.xlu1 %v5534_v51, %s4572_s27 }
 0x1a0   : > { %v1155_v2 = vpop.permute.xlu0 %1154  ;;  %v1157_v1 = vpop.permute.xlu1 %1156 }
 0x1a1   : > { %1237 = vst.msk [vmem:[#allocation2 + $0x70] sm:$0xff] %vm1222_vm5, %v1155_v2  ;;  %1238 = vst.msk [vmem:[#allocation2 + $0x78] sm:$0xff] %vm1222_vm5, %v1157_v1  ;;  %v4205_v2 = vld [vmem:[%s4622_s20 + $0xad] sm:$0xff]  ;;  %v4206_v1 = vld [vmem:[%s4622_s20 + $0xb5] sm:$0xff] }
 0x1a2   : > { %1529 = vrot.lane.b32.xlu0 %v5543_v17, %s4572_s27  ;;  %1531 = vrot.lane.b32.xlu1 %v5546_v61, %s4572_s27 }
 0x1a4   : > { %v1159_v4 = vpop.permute.xlu0 %1158  ;;  %v1161_v5 = vpop.permute.xlu1 %1160 }
 0x1a5   : > { %1239 = vst.msk [vmem:[#allocation2 + $0x80] sm:$0xff] %vm1222_vm5, %v1159_v4  ;;  %1240 = vst.msk [vmem:[#allocation2 + $0x88] sm:$0xff] %vm1222_vm5, %v1161_v5 }
 0x1a6   : > { %1533 = vrot.lane.b32.xlu0 %v5555_v19, %s4572_s27  ;;  %1535 = vrot.lane.b32.xlu1 %v5558_v20, %s4572_s27 }
 0x1a8   : > { %v1163_v24 = vpop.permute.xlu0 %1162  ;;  %v1165_v25 = vpop.permute.xlu1 %1164 }
 0x1a9   : > { %1241 = vst.msk [vmem:[#allocation2 + $0x90] sm:$0xff] %vm1222_vm5, %v1163_v24  ;;  %1242 = vst.msk [vmem:[#allocation2 + $0x98] sm:$0xff] %vm1222_vm5, %v1165_v25  ;;  %v4207_v24 = vld [vmem:[%s4622_s20 + $0xc5] sm:$0xff]  ;;  %v4208_v25 = vld [vmem:[%s4622_s20 + $0xcd] sm:$0xff] }
 0x1aa   : > { %1537 = vrot.lane.b32.xlu0 %v5567_v6, %s4572_s27  ;;  %1539 = vrot.lane.b32.xlu1 %v5570_v7, %s4572_s27 }
 0x1ac   : > { %v1167_v28 = vpop.permute.xlu0 %1166  ;;  %v1169_v31 = vpop.permute.xlu1 %1168 }
 0x1ad   : > { %1243 = vst.msk [vmem:[#allocation2 + $0xa0] sm:$0xff] %vm1222_vm5, %v1167_v28  ;;  %1244 = vst.msk [vmem:[#allocation2 + $0xa8] sm:$0xff] %vm1222_vm5, %v1169_v31 }
 0x1ae   : > { %1541 = vrot.lane.b32.xlu0 %v5579_v26, %s4572_s27  ;;  %1543 = vrot.lane.b32.xlu1 %v5582_v27, %s4572_s27 }
 0x1b0   : > { %v1171_v34 = vpop.permute.xlu0 %1170  ;;  %v1173_v35 = vpop.permute.xlu1 %1172 }
 0x1b1   : > { %1245 = vst.msk [vmem:[#allocation2 + $0xb0] sm:$0xff] %vm1222_vm5, %v1171_v34  ;;  %1246 = vst.msk [vmem:[#allocation2 + $0xb8] sm:$0xff] %vm1222_vm5, %v1173_v35  ;;  %v4209_v34 = vld [vmem:[%s4622_s20 + $0xdd] sm:$0xff]  ;;  %v4210_v35 = vld [vmem:[%s4622_s20 + $0xe5] sm:$0xff] }
 0x1b2   : > { %1545 = vrot.lane.b32.xlu0 %v5591_v32, %s4572_s27  ;;  %1547 = vrot.lane.b32.xlu1 %v5594_v33, %s4572_s27 }
 0x1b4   : > { %v1175_v38 = vpop.permute.xlu0 %1174  ;;  %v1177_v39 = vpop.permute.xlu1 %1176 }
 0x1b5   : > { %1247 = vst.msk [vmem:[#allocation2 + $0xc0] sm:$0xff] %vm1222_vm5, %v1175_v38  ;;  %1248 = vst.msk [vmem:[#allocation2 + $0xc8] sm:$0xff] %vm1222_vm5, %v1177_v39 }
 0x1b6   : > { %1549 = vrot.lane.b32.xlu0 %v5603_v36, %s4572_s27  ;;  %1551 = vrot.lane.b32.xlu1 %v5606_v37, %s4572_s27 }
 0x1b8   : > { %v1179_v44 = vpop.permute.xlu0 %1178  ;;  %v1181_v45 = vpop.permute.xlu1 %1180 }
 0x1b9   : > { %1249 = vst.msk [vmem:[#allocation2 + $0xd0] sm:$0xff] %vm1222_vm5, %v1179_v44  ;;  %1250 = vst.msk [vmem:[#allocation2 + $0xd8] sm:$0xff] %vm1222_vm5, %v1181_v45  ;;  %v4211_v44 = vld [vmem:[%s4622_s20 + $0xf5] sm:$0xff]  ;;  %v4212_v45 = vld [vmem:[%s4622_s20 + $0xfd] sm:$0xff] }
 0x1ba   : > { %1553 = vrot.lane.b32.xlu0 %v5615_v40, %s4572_s27  ;;  %1555 = vrot.lane.b32.xlu1 %v5618_v41, %s4572_s27 }
 0x1bc   : > { %v1183_v52 = vpop.permute.xlu0 %1182  ;;  %v1185_v53 = vpop.permute.xlu1 %1184 }
 0x1bd   : > { %1251 = vst.msk [vmem:[#allocation2 + $0xe0] sm:$0xff] %vm1222_vm5, %v1183_v52  ;;  %1252 = vst.msk [vmem:[#allocation2 + $0xe8] sm:$0xff] %vm1222_vm5, %v1185_v53  ;;  %v4213_v52 = vld [vmem:[%s4622_s20 + $0x10d] sm:$0xff]  ;;  %v4214_v53 = vld [vmem:[%s4622_s20 + $0x115] sm:$0xff] }
 0x1be   : > { %1557 = vrot.lane.b32.xlu0 %v4191_v48, %s4572_s27  ;;  %1559 = vrot.lane.b32.xlu1 %v4192_v49, %s4572_s27 }
 0x1c0   : > { %v1187_v56 = vpop.permute.xlu0 %1186  ;;  %v1189_v57 = vpop.permute.xlu1 %1188 }
 0x1c1   : > { %1253 = vst.msk [vmem:[#allocation2 + $0xf0] sm:$0xff] %vm1222_vm5, %v1187_v56  ;;  %1254 = vst.msk [vmem:[#allocation2 + $0xf8] sm:$0xff] %vm1222_vm5, %v1189_v57 }
 0x1c2   : > { %1561 = vrot.lane.b32.xlu0 %v5267_v58, %s4572_s27  ;;  %1563 = vrot.lane.b32.xlu1 %v5270_v59, %s4572_s27  ;;  %v4198_v58 = vld [vmem:[%s4622_s20 + $0x1d3] sm:$0xff] }
 0x1c4   : > { %v1321_v12 = vpop.permute.xlu0 %1320  ;;  %v1323_v3 = vpop.permute.xlu1 %1322 }
 0x1c5   : > { %1417 = vst.msk [vmem:[#allocation2] sm:$0xff] %vm1416_vm6, %v1321_v12  ;;  %1418 = vst.msk [vmem:[#allocation2 + $0x8] sm:$0xff] %vm1416_vm6, %v1323_v3  ;;  %v4215_v12 = vld [vmem:[%s4622_s20 + $0x125] sm:$0xff]  ;;  %v4216_v3 = vld [vmem:[%s4622_s20 + $0x12d] sm:$0xff] }
 0x1c6   : > { %1565 = vrot.lane.b32.xlu0 %v5279_v62, %s4572_s27  ;;  %1567 = vrot.lane.b32.xlu1 %v5282_v0, %s4572_s27 }
 0x1c8   : > { %v1325_v59 = vpop.permute.xlu0 %1324  ;;  %v1327_v9 = vpop.permute.xlu1 %1326 }
 0x1c9   : > { %1419 = vst.msk [vmem:[#allocation2 + $0x10] sm:$0xff] %vm1416_vm6, %v1325_v59  ;;  %1420 = vst.msk [vmem:[#allocation2 + $0x18] sm:$0xff] %vm1416_vm6, %v1327_v9  ;;  %v4217_v59 = vld [vmem:[%s4622_s20 + $0x13d] sm:$0xff]  ;;  %v4218_v9 = vld [vmem:[%s4622_s20 + $0x145] sm:$0xff] }
 0x1ca   : > { %1569 = vrot.lane.b32.xlu0 %v4197_v8, %s4572_s27  ;;  %1571 = vrot.lane.b32.xlu1 %v4198_v58, %s4572_s27 }
 0x1cc   : > { %v1329_v62 = vpop.permute.xlu0 %1328  ;;  %v1331_v0 = vpop.permute.xlu1 %1330 }
 0x1cd   : > { %1421 = vst.msk [vmem:[#allocation2 + $0x20] sm:$0xff] %vm1416_vm6, %v1329_v62  ;;  %1422 = vst.msk [vmem:[#allocation2 + $0x28] sm:$0xff] %vm1416_vm6, %v1331_v0  ;;  %v4219_v62 = vld [vmem:[%s4622_s20 + $0x155] sm:$0xff]  ;;  %v4220_v0 = vld [vmem:[%s4622_s20 + $0x15d] sm:$0xff] }
 0x1ce   : > { %1573 = vrot.lane.b32.xlu0 %v4199_v22, %s4572_s27  ;;  %1575 = vrot.lane.b32.xlu1 %v4200_v23, %s4572_s27 }
 0x1d0   : > { %v1333_v29 = vpop.permute.xlu0 %1332  ;;  %v1335_v30 = vpop.permute.xlu1 %1334 }
 0x1d1   : > { %1423 = vst.msk [vmem:[#allocation2 + $0x30] sm:$0xff] %vm1416_vm6, %v1333_v29  ;;  %1424 = vst.msk [vmem:[#allocation2 + $0x38] sm:$0xff] %vm1416_vm6, %v1335_v30  ;;  %v4221_v29 = vld [vmem:[%s4622_s20 + $0x16d] sm:$0xff]  ;;  %v4222_v30 = vld [vmem:[%s4622_s20 + $0x175] sm:$0xff] }
 0x1d2   : > { %1706 = vrot.lane.b32.xlu0 %v4201_v14, %s4573_s28  ;;  %1708 = vrot.lane.b32.xlu1 %v4202_v15, %s4573_s28 }
 0x1d4   : > { %v1337_v54 = vpop.permute.xlu0 %1336  ;;  %v1339_v55 = vpop.permute.xlu1 %1338 }
 0x1d5   : > { %1425 = vst.msk [vmem:[#allocation2 + $0x40] sm:$0xff] %vm1416_vm6, %v1337_v54  ;;  %1426 = vst.msk [vmem:[#allocation2 + $0x48] sm:$0xff] %vm1416_vm6, %v1339_v55  ;;  %v4223_v54 = vld [vmem:[%s4622_s20 + $0x185] sm:$0xff]  ;;  %v4224_v55 = vld [vmem:[%s4622_s20 + $0x18d] sm:$0xff] }
 0x1d6   : > { %1710 = vrot.lane.b32.xlu0 %v4203_v46, %s4573_s28  ;;  %1712 = vrot.lane.b32.xlu1 %v4204_v47, %s4573_s28 }
 0x1d8   : > { %v1341_v4 = vpop.permute.xlu0 %1340  ;;  %v1343_v5 = vpop.permute.xlu1 %1342 }
 0x1d9   : > { %1427 = vst.msk [vmem:[#allocation2 + $0x50] sm:$0xff] %vm1416_vm6, %v1341_v4  ;;  %1428 = vst.msk [vmem:[#allocation2 + $0x58] sm:$0xff] %vm1416_vm6, %v1343_v5 }
 0x1da   : > { %1714 = vrot.lane.b32.xlu0 %v4205_v2, %s4573_s28  ;;  %1716 = vrot.lane.b32.xlu1 %v4206_v1, %s4573_s28 }
 0x1dc   : > { %v1345_v28 = vpop.permute.xlu0 %1344  ;;  %v1347_v31 = vpop.permute.xlu1 %1346 }
 0x1dd   : > { %1429 = vst.msk [vmem:[#allocation2 + $0x60] sm:$0xff] %vm1416_vm6, %v1345_v28  ;;  %1430 = vst.msk [vmem:[#allocation2 + $0x68] sm:$0xff] %vm1416_vm6, %v1347_v31  ;;  %v4229_v28 = vld [vmem:[%s4622_s20 + $0x1cd] sm:$0xff] }
 0x1de   : > { %1718 = vrot.lane.b32.xlu0 %v4207_v24, %s4573_s28  ;;  %1720 = vrot.lane.b32.xlu1 %v4208_v25, %s4573_s28 }
 0x1e0   : > { %v1349_v38 = vpop.permute.xlu0 %1348  ;;  %v1351_v39 = vpop.permute.xlu1 %1350 }
 0x1e1   : > { %1431 = vst.msk [vmem:[#allocation2 + $0x70] sm:$0xff] %vm1416_vm6, %v1349_v38  ;;  %1432 = vst.msk [vmem:[#allocation2 + $0x78] sm:$0xff] %vm1416_vm6, %v1351_v39  ;;  %v1835_v38 = vld [vmem:[%s4622_s20] sm:$0xff]  ;;  %v1836_v39 = vld [vmem:[%s4622_s20 + $0x8] sm:$0xff] }
 0x1e2   : > { %1722 = vrot.lane.b32.xlu0 %v4209_v34, %s4573_s28  ;;  %1724 = vrot.lane.b32.xlu1 %v4210_v35, %s4573_s28  ;;  %v4231_v34 = vld [vmem:[%s4622_s20 + $0x1e5] sm:$0xff]  ;;  %v4232_v35 = vld [vmem:[%s4622_s20 + $0x1ed] sm:$0xff] }
 0x1e4   : > { %v1353_v48 = vpop.permute.xlu0 %1352  ;;  %v1355_v49 = vpop.permute.xlu1 %1354 }
 0x1e5   : > { %1433 = vst.msk [vmem:[#allocation2 + $0x80] sm:$0xff] %vm1416_vm6, %v1353_v48  ;;  %1434 = vst.msk [vmem:[#allocation2 + $0x88] sm:$0xff] %vm1416_vm6, %v1355_v49  ;;  %v1837_v48 = vld [vmem:[%s4622_s20 + $0x18] sm:$0xff]  ;;  %v1838_v49 = vld [vmem:[%s4622_s20 + $0x20] sm:$0xff] }
 0x1e6   : > { %1726 = vrot.lane.b32.xlu0 %v4211_v44, %s4573_s28  ;;  %1728 = vrot.lane.b32.xlu1 %v4212_v45, %s4573_s28 }
 0x1e8   : > { %v1357_v56 = vpop.permute.xlu0 %1356  ;;  %v1359_v57 = vpop.permute.xlu1 %1358 }
 0x1e9   : > { %1435 = vst.msk [vmem:[#allocation2 + $0x90] sm:$0xff] %vm1416_vm6, %v1357_v56  ;;  %1436 = vst.msk [vmem:[#allocation2 + $0x98] sm:$0xff] %vm1416_vm6, %v1359_v57  ;;  %v1839_v56 = vld [vmem:[%s4622_s20 + $0x30] sm:$0xff]  ;;  %v1840_v57 = vld [vmem:[%s4622_s20 + $0x38] sm:$0xff] }
 0x1ea   : > { %1730 = vrot.lane.b32.xlu0 %v4213_v52, %s4573_s28  ;;  %1732 = vrot.lane.b32.xlu1 %v4214_v53, %s4573_s28 }
 0x1ec   : > { %v1361_v8 = vpop.permute.xlu0 %1360  ;;  %v1363_v58 = vpop.permute.xlu1 %1362 }
 0x1ed   : > { %1437 = vst.msk [vmem:[#allocation2 + $0xa0] sm:$0xff] %vm1416_vm6, %v1361_v8  ;;  %1438 = vst.msk [vmem:[#allocation2 + $0xa8] sm:$0xff] %vm1416_vm6, %v1363_v58  ;;  %v5771_v8 = vld [vmem:[%s4622_s20 + $0x48] sm:$0xff]  ;;  %v1842_v58 = vld [vmem:[%s4622_s20 + $0x50] sm:$0xff] }
 0x1ee   : > { %1734 = vrot.lane.b32.xlu0 %v4215_v12, %s4573_s28  ;;  %1736 = vrot.lane.b32.xlu1 %v4216_v3, %s4573_s28 }
 0x1f0   : > { %v1365_v22 = vpop.permute.xlu0 %1364  ;;  %v1367_v23 = vpop.permute.xlu1 %1366 }
 0x1f1   : > { %1439 = vst.msk [vmem:[#allocation2 + $0xb0] sm:$0xff] %vm1416_vm6, %v1365_v22  ;;  %1440 = vst.msk [vmem:[#allocation2 + $0xb8] sm:$0xff] %vm1416_vm6, %v1367_v23  ;;  %v1843_v22 = vld [vmem:[%s4622_s20 + $0x60] sm:$0xff]  ;;  %v1844_v23 = vld [vmem:[%s4622_s20 + $0x68] sm:$0xff] }
 0x1f2   : > { %1738 = vrot.lane.b32.xlu0 %v4217_v59, %s4573_s28  ;;  %1740 = vrot.lane.b32.xlu1 %v4218_v9, %s4573_s28 }
 0x1f4   : > { %v1369_v14 = vpop.permute.xlu0 %1368  ;;  %v1371_v15 = vpop.permute.xlu1 %1370 }
 0x1f5   : > { %1441 = vst.msk [vmem:[#allocation2 + $0xc0] sm:$0xff] %vm1416_vm6, %v1369_v14  ;;  %1442 = vst.msk [vmem:[#allocation2 + $0xc8] sm:$0xff] %vm1416_vm6, %v1371_v15  ;;  %v1845_v14 = vld [vmem:[%s4622_s20 + $0x78] sm:$0xff]  ;;  %v1846_v15 = vld [vmem:[%s4622_s20 + $0x80] sm:$0xff] }
 0x1f6   : > { %1742 = vrot.lane.b32.xlu0 %v4219_v62, %s4573_s28  ;;  %1744 = vrot.lane.b32.xlu1 %v4220_v0, %s4573_s28 }
 0x1f8   : > { %v1373_v46 = vpop.permute.xlu0 %1372  ;;  %v1375_v47 = vpop.permute.xlu1 %1374 }
 0x1f9   : > { %1443 = vst.msk [vmem:[#allocation2 + $0xd0] sm:$0xff] %vm1416_vm6, %v1373_v46  ;;  %1444 = vst.msk [vmem:[#allocation2 + $0xd8] sm:$0xff] %vm1416_vm6, %v1375_v47  ;;  %v1847_v46 = vld [vmem:[%s4622_s20 + $0x90] sm:$0xff]  ;;  %v1848_v47 = vld [vmem:[%s4622_s20 + $0x98] sm:$0xff] }
 0x1fa   : > { %1746 = vrot.lane.b32.xlu0 %v4221_v29, %s4573_s28  ;;  %1748 = vrot.lane.b32.xlu1 %v4222_v30, %s4573_s28 }
 0x1fc   : > { %v1377_v2 = vpop.permute.xlu0 %1376  ;;  %v1379_v1 = vpop.permute.xlu1 %1378 }
 0x1fd   : > { %1445 = vst.msk [vmem:[#allocation2 + $0xe0] sm:$0xff] %vm1416_vm6, %v1377_v2  ;;  %1446 = vst.msk [vmem:[#allocation2 + $0xe8] sm:$0xff] %vm1416_vm6, %v1379_v1  ;;  %v1849_v2 = vld [vmem:[%s4622_s20 + $0xa8] sm:$0xff]  ;;  %v1850_v1 = vld [vmem:[%s4622_s20 + $0xb0] sm:$0xff] }
 0x1fe   : > { %1750 = vrot.lane.b32.xlu0 %v4223_v54, %s4573_s28  ;;  %1752 = vrot.lane.b32.xlu1 %v4224_v55, %s4573_s28 }
 0x200   : > { %v1381_v4 = vpop.permute.xlu0 %1380  ;;  %v1383_v5 = vpop.permute.xlu1 %1382 }
 0x201   : > { %1447 = vst.msk [vmem:[#allocation2 + $0xf0] sm:$0xff] %vm1416_vm6, %v1381_v4  ;;  %1448 = vst.msk [vmem:[#allocation2 + $0xf8] sm:$0xff] %vm1416_vm6, %v1383_v5 }
 0x202   : > { %1754 = vrot.lane.b32.xlu0 %v5375_v60, %s4573_s28  ;;  %1756 = vrot.lane.b32.xlu1 %v5378_v16, %s4573_s28  ;;  %v4230_v60 = vld [vmem:[%s4622_s20 + $0x1d5] sm:$0xff] }
 0x204   : > { %v1514_v24 = vpop.permute.xlu0 %1513  ;;  %v1516_v25 = vpop.permute.xlu1 %1515 }
 0x205   : > { %1610 = vst.msk [vmem:[#allocation2] sm:$0xff] %vm1609_vm7, %v1514_v24  ;;  %1611 = vst.msk [vmem:[#allocation2 + $0x8] sm:$0xff] %vm1609_vm7, %v1516_v25  ;;  %v1851_v24 = vld [vmem:[%s4622_s20 + $0xc0] sm:$0xff]  ;;  %v1852_v25 = vld [vmem:[%s4622_s20 + $0xc8] sm:$0xff] }
 0x206   : > { %1758 = vrot.lane.b32.xlu0 %v5387_v13, %s4573_s28  ;;  %1760 = vrot.lane.b32.xlu1 %v5390_v63, %s4573_s28 }
 0x208   : > { %v1518_v16 = vpop.permute.xlu0 %1517  ;;  %v1520_v31 = vpop.permute.xlu1 %1519 }
 0x209   : > { %1612 = vst.msk [vmem:[#allocation2 + $0x10] sm:$0xff] %vm1609_vm7, %v1518_v16  ;;  %1613 = vst.msk [vmem:[#allocation2 + $0x18] sm:$0xff] %vm1609_vm7, %v1520_v31  ;;  %v5810_v16 = vld [vmem:[%s4622_s20 + $0xd8] sm:$0xff]  ;;  %v5813_v31 = vld [vmem:[%s4622_s20 + $0xe0] sm:$0xff] }
 0x20a   : > { %1762 = vrot.lane.b32.xlu0 %v4229_v28, %s4573_s28  ;;  %1764 = vrot.lane.b32.xlu1 %v4230_v60, %s4573_s28 }
 0x20c   : > { %v1522_v13 = vpop.permute.xlu0 %1521  ;;  %v1524_v63 = vpop.permute.xlu1 %1523 }
 0x20d   : > { %1614 = vst.msk [vmem:[#allocation2 + $0x20] sm:$0xff] %vm1609_vm7, %v1522_v13  ;;  %1615 = vst.msk [vmem:[#allocation2 + $0x28] sm:$0xff] %vm1609_vm7, %v1524_v63  ;;  %v5822_v13 = vld [vmem:[%s4622_s20 + $0xf0] sm:$0xff]  ;;  %v5825_v63 = vld [vmem:[%s4622_s20 + $0xf8] sm:$0xff] }
 0x20e   : > { %1766 = vrot.lane.b32.xlu0 %v4231_v34, %s4573_s28  ;;  %1768 = vrot.lane.b32.xlu1 %v4232_v35, %s4573_s28  ;;  %s222_s28 = scalar_lea.vmem %s7011_s4, %s4462_s22 }
 0x210   : > { %v1526_v44 = vpop.permute.xlu0 %1525  ;;  %v1528_v45 = vpop.permute.xlu1 %1527 }
 0x211   : > { %1616 = vst.msk [vmem:[#allocation2 + $0x30] sm:$0xff] %vm1609_vm7, %v1526_v44  ;;  %1617 = vst.msk [vmem:[#allocation2 + $0x38] sm:$0xff] %vm1609_vm7, %v1528_v45  ;;  %v1857_v44 = vld [vmem:[%s4622_s20 + $0x108] sm:$0xff]  ;;  %v1858_v45 = vld [vmem:[%s4622_s20 + $0x110] sm:$0xff] }
 0x212   : > { %1899 = vrot.lane.b32.xlu0 %v1835_v38, %s4574_s29  ;;  %1901 = vrot.lane.b32.xlu1 %v1836_v39, %s4574_s29 }
 0x214   : > { %v1530_v52 = vpop.permute.xlu0 %1529  ;;  %v1532_v53 = vpop.permute.xlu1 %1531 }
 0x215   : > { %1618 = vst.msk [vmem:[#allocation2 + $0x40] sm:$0xff] %vm1609_vm7, %v1530_v52  ;;  %1619 = vst.msk [vmem:[#allocation2 + $0x48] sm:$0xff] %vm1609_vm7, %v1532_v53  ;;  %v5840_v52 = vld [vmem:[%s4622_s20 + $0x120] sm:$0xff]  ;;  %v5843_v53 = vld [vmem:[%s4622_s20 + $0x128] sm:$0xff] }
 0x216   : > { %1903 = vrot.lane.b32.xlu0 %v1837_v48, %s4574_s29  ;;  %1905 = vrot.lane.b32.xlu1 %v1838_v49, %s4574_s29 }
 0x218   : > { %v1534_v12 = vpop.permute.xlu0 %1533  ;;  %v1536_v3 = vpop.permute.xlu1 %1535 }
 0x219   : > { %1620 = vst.msk [vmem:[#allocation2 + $0x50] sm:$0xff] %vm1609_vm7, %v1534_v12  ;;  %1621 = vst.msk [vmem:[#allocation2 + $0x58] sm:$0xff] %vm1609_vm7, %v1536_v3  ;;  %v5852_v12 = vld [vmem:[%s4622_s20 + $0x138] sm:$0xff]  ;;  %v5855_v3 = vld [vmem:[%s4622_s20 + $0x140] sm:$0xff] }
 0x21a   : > { %1907 = vrot.lane.b32.xlu0 %v1839_v56, %s4574_s29  ;;  %1909 = vrot.lane.b32.xlu1 %v1840_v57, %s4574_s29 }
 0x21c   : > { %v1538_v59 = vpop.permute.xlu0 %1537  ;;  %v1540_v9 = vpop.permute.xlu1 %1539 }
 0x21d   : > { %1622 = vst.msk [vmem:[#allocation2 + $0x60] sm:$0xff] %vm1609_vm7, %v1538_v59  ;;  %1623 = vst.msk [vmem:[#allocation2 + $0x68] sm:$0xff] %vm1609_vm7, %v1540_v9  ;;  %v1863_v9 = vld [vmem:[%s4622_s20 + $0x150] sm:$0xff] }
 0x21e   : > { %1911 = vrot.lane.b32.xlu0 %v5771_v8, %s4574_s29  ;;  %1913 = vrot.lane.b32.xlu1 %v1842_v58, %s4574_s29 }
 0x220   : > { %v1542_v62 = vpop.permute.xlu0 %1541  ;;  %v1544_v0 = vpop.permute.xlu1 %1543 }
 0x221   : > { %1624 = vst.msk [vmem:[#allocation2 + $0x70] sm:$0xff] %vm1609_vm7, %v1542_v62  ;;  %1625 = vst.msk [vmem:[#allocation2 + $0x78] sm:$0xff] %vm1609_vm7, %v1544_v0  ;;  %v1865_v0 = vld [vmem:[%s4622_s20 + $0x168] sm:$0xff] }
 0x222   : > { %1915 = vrot.lane.b32.xlu0 %v1843_v22, %s4574_s29  ;;  %1917 = vrot.lane.b32.xlu1 %v1844_v23, %s4574_s29  ;;  %v1864_v22 = vld [vmem:[%s4622_s20 + $0x158] sm:$0xff] }
 0x224   : > { %v1546_v29 = vpop.permute.xlu0 %1545  ;;  %v1548_v30 = vpop.permute.xlu1 %1547 }
 0x225   : > { %1626 = vst.msk [vmem:[#allocation2 + $0x80] sm:$0xff] %vm1609_vm7, %v1546_v29  ;;  %1627 = vst.msk [vmem:[#allocation2 + $0x88] sm:$0xff] %vm1609_vm7, %v1548_v30  ;;  %v2028_v30 = vld [vmem:[%s4622_s20 + $0x3] sm:$0xff] }
 0x226   : > { %1919 = vrot.lane.b32.xlu0 %v1845_v14, %s4574_s29  ;;  %1921 = vrot.lane.b32.xlu1 %v1846_v15, %s4574_s29  ;;  %v1866_v14 = vld [vmem:[%s4622_s20 + $0x170] sm:$0xff] }
 0x228   : > { %v1550_v54 = vpop.permute.xlu0 %1549  ;;  %v1552_v55 = vpop.permute.xlu1 %1551 }
 0x229   : > { %1628 = vst.msk [vmem:[#allocation2 + $0x90] sm:$0xff] %vm1609_vm7, %v1550_v54  ;;  %1629 = vst.msk [vmem:[#allocation2 + $0x98] sm:$0xff] %vm1609_vm7, %v1552_v55  ;;  %v2030_v55 = vld [vmem:[%s4622_s20 + $0x1b] sm:$0xff] }
 0x22a   : > { %1923 = vrot.lane.b32.xlu0 %v1847_v46, %s4574_s29  ;;  %1925 = vrot.lane.b32.xlu1 %v1848_v47, %s4574_s29  ;;  %v2029_v46 = vld [vmem:[%s4622_s20 + $0xb] sm:$0xff] }
 0x22c   : > { %v1554_v4 = vpop.permute.xlu0 %1553  ;;  %v1556_v5 = vpop.permute.xlu1 %1555 }
 0x22d   : > { %1630 = vst.msk [vmem:[#allocation2 + $0xa0] sm:$0xff] %vm1609_vm7, %v1554_v4  ;;  %1631 = vst.msk [vmem:[#allocation2 + $0xa8] sm:$0xff] %vm1609_vm7, %v1556_v5  ;;  %v2032_v5 = vld [vmem:[%s4622_s20 + $0x33] sm:$0xff] }
 0x22e   : > { %1927 = vrot.lane.b32.xlu0 %v1849_v2, %s4574_s29  ;;  %1929 = vrot.lane.b32.xlu1 %v1850_v1, %s4574_s29  ;;  %v2031_v2 = vld [vmem:[%s4622_s20 + $0x23] sm:$0xff] }
 0x230   : > { %v1558_v28 = vpop.permute.xlu0 %1557  ;;  %v1560_v60 = vpop.permute.xlu1 %1559 }
 0x231   : > { %1632 = vst.msk [vmem:[#allocation2 + $0xb0] sm:$0xff] %vm1609_vm7, %v1558_v28  ;;  %1633 = vst.msk [vmem:[#allocation2 + $0xb8] sm:$0xff] %vm1609_vm7, %v1560_v60  ;;  %v2034_v60 = vld [vmem:[%s4622_s20 + $0x4b] sm:$0xff] }
 0x232   : > { %1931 = vrot.lane.b32.xlu0 %v1851_v24, %s4574_s29  ;;  %1933 = vrot.lane.b32.xlu1 %v1852_v25, %s4574_s29  ;;  %v2033_v24 = vld [vmem:[%s4622_s20 + $0x3b] sm:$0xff] }
 0x234   : > { %v1562_v34 = vpop.permute.xlu0 %1561  ;;  %v1564_v35 = vpop.permute.xlu1 %1563 }
 0x235   : > { %1634 = vst.msk [vmem:[#allocation2 + $0xc0] sm:$0xff] %vm1609_vm7, %v1562_v34  ;;  %1635 = vst.msk [vmem:[#allocation2 + $0xc8] sm:$0xff] %vm1609_vm7, %v1564_v35  ;;  %v2035_v34 = vld [vmem:[%s4622_s20 + $0x53] sm:$0xff] }
 0x236   : > { %1935 = vrot.lane.b32.xlu0 %v5810_v16, %s4574_s29  ;;  %1937 = vrot.lane.b32.xlu1 %v5813_v31, %s4574_s29 }
 0x238   : > { %v1566_v38 = vpop.permute.xlu0 %1565  ;;  %v1568_v39 = vpop.permute.xlu1 %1567 }
 0x239   : > { %1636 = vst.msk [vmem:[#allocation2 + $0xd0] sm:$0xff] %vm1609_vm7, %v1566_v38  ;;  %1637 = vst.msk [vmem:[#allocation2 + $0xd8] sm:$0xff] %vm1609_vm7, %v1568_v39  ;;  %v2036_v39 = vld [vmem:[%s4622_s20 + $0x63] sm:$0xff] }
 0x23a   : > { %1939 = vrot.lane.b32.xlu0 %v5822_v13, %s4574_s29  ;;  %1941 = vrot.lane.b32.xlu1 %v5825_v63, %s4574_s29 }
 0x23c   : > { %v1570_v48 = vpop.permute.xlu0 %1569  ;;  %v1572_v49 = vpop.permute.xlu1 %1571 }
 0x23d   : > { %1638 = vst.msk [vmem:[#allocation2 + $0xe0] sm:$0xff] %vm1609_vm7, %v1570_v48  ;;  %1639 = vst.msk [vmem:[#allocation2 + $0xe8] sm:$0xff] %vm1609_vm7, %v1572_v49 }
 0x23e   : > { %1943 = vrot.lane.b32.xlu0 %v1857_v44, %s4574_s29  ;;  %1945 = vrot.lane.b32.xlu1 %v1858_v45, %s4574_s29  ;;  %v2037_v44 = vld [vmem:[%s4622_s20 + $0x6b] sm:$0xff] }
 0x240   : > { %v1574_v56 = vpop.permute.xlu0 %1573  ;;  %v1576_v57 = vpop.permute.xlu1 %1575 }
 0x241   : > { %1640 = vst.msk [vmem:[#allocation2 + $0xf0] sm:$0xff] %vm1609_vm7, %v1574_v56  ;;  %1641 = vst.msk [vmem:[#allocation2 + $0xf8] sm:$0xff] %vm1609_vm7, %v1576_v57 }
 0x242   : > { %1947 = vrot.lane.b32.xlu0 %v5840_v52, %s4574_s29  ;;  %1949 = vrot.lane.b32.xlu1 %v5843_v53, %s4574_s29 }
 0x244   : > { %v1707_v58 = vpop.permute.xlu0 %1706  ;;  %v1709_v59 = vpop.permute.xlu1 %1708 }
 0x245   : > { %1803 = vst.msk [vmem:[#allocation2] sm:$0xff] %vm1802_vm8, %v1707_v58  ;;  %1804 = vst.msk [vmem:[#allocation2 + $0x8] sm:$0xff] %vm1802_vm8, %v1709_v59 }
 0x246   : > { %1951 = vrot.lane.b32.xlu0 %v5852_v12, %s4574_s29  ;;  %1953 = vrot.lane.b32.xlu1 %v5855_v3, %s4574_s29 }
 0x248   : > { %v1711_v23 = vpop.permute.xlu0 %1710  ;;  %v1713_v62 = vpop.permute.xlu1 %1712 }
 0x249   : > { %1805 = vst.msk [vmem:[#allocation2 + $0x10] sm:$0xff] %vm1802_vm8, %v1711_v23  ;;  %1806 = vst.msk [vmem:[#allocation2 + $0x18] sm:$0xff] %vm1802_vm8, %v1713_v62  ;;  %v2225_v62 = vld [vmem:[%s4622_s20 + $0x36] sm:$0xff] }
 0x24a   : > { %1955 = vrot.lane.b32.xlu0 %v1863_v9, %s4574_s29  ;;  %1957 = vrot.lane.b32.xlu1 %v1864_v22, %s4574_s29  ;;  %v2223_v22 = vld [vmem:[%s4622_s20 + $0x1e] sm:$0xff] }
 0x24c   : > { %v1715_v15 = vpop.permute.xlu0 %1714  ;;  %v1717_v29 = vpop.permute.xlu1 %1716 }
 0x24d   : > { %1807 = vst.msk [vmem:[#allocation2 + $0x20] sm:$0xff] %vm1802_vm8, %v1715_v15  ;;  %1808 = vst.msk [vmem:[#allocation2 + $0x28] sm:$0xff] %vm1802_vm8, %v1717_v29  ;;  %v2227_v29 = vld [vmem:[%s4622_s20 + $0x4e] sm:$0xff] }
 0x24e   : > { %1959 = vrot.lane.b32.xlu0 %v1865_v0, %s4574_s29  ;;  %1961 = vrot.lane.b32.xlu1 %v1866_v14, %s4574_s29  ;;  %v2226_v0 = vld [vmem:[%s4622_s20 + $0x3e] sm:$0xff] }
 0x250   : > { %v1719_v47 = vpop.permute.xlu0 %1718  ;;  %v1721_v54 = vpop.permute.xlu1 %1720 }
 0x251   : > { %1809 = vst.msk [vmem:[#allocation2 + $0x30] sm:$0xff] %vm1802_vm8, %v1719_v47  ;;  %1810 = vst.msk [vmem:[#allocation2 + $0x38] sm:$0xff] %vm1802_vm8, %v1721_v54  ;;  %v2229_v54 = vld [vmem:[%s4622_s20 + $0x66] sm:$0xff] }
 0x252   : > { %2092 = vrot.lane.b32.xlu0 %v2028_v30, %s4575_s30  ;;  %2094 = vrot.lane.b32.xlu1 %v2029_v46, %s4575_s30  ;;  %v2228_v30 = vld [vmem:[%s4622_s20 + $0x56] sm:$0xff] }
 0x254   : > { %v1723_v1 = vpop.permute.xlu0 %1722  ;;  %v1725_v4 = vpop.permute.xlu1 %1724 }
 0x255   : > { %1811 = vst.msk [vmem:[#allocation2 + $0x40] sm:$0xff] %vm1802_vm8, %v1723_v1  ;;  %1812 = vst.msk [vmem:[#allocation2 + $0x48] sm:$0xff] %vm1802_vm8, %v1725_v4  ;;  %v2231_v4 = vld [vmem:[%s4622_s20 + $0x7e] sm:$0xff] }
 0x256   : > { %2096 = vrot.lane.b32.xlu0 %v2030_v55, %s4575_s30  ;;  %2098 = vrot.lane.b32.xlu1 %v2031_v2, %s4575_s30  ;;  %v2230_v55 = vld [vmem:[%s4622_s20 + $0x6e] sm:$0xff] }
 0x258   : > { %v1727_v25 = vpop.permute.xlu0 %1726  ;;  %v1729_v28 = vpop.permute.xlu1 %1728 }
 0x259   : > { %1813 = vst.msk [vmem:[#allocation2 + $0x50] sm:$0xff] %vm1802_vm8, %v1727_v25  ;;  %1814 = vst.msk [vmem:[#allocation2 + $0x58] sm:$0xff] %vm1802_vm8, %v1729_v28  ;;  %v2233_v28 = vld [vmem:[%s4622_s20 + $0x96] sm:$0xff] }
 0x25a   : > { %2100 = vrot.lane.b32.xlu0 %v2032_v5, %s4575_s30  ;;  %2102 = vrot.lane.b32.xlu1 %v2033_v24, %s4575_s30  ;;  %v2232_v5 = vld [vmem:[%s4622_s20 + $0x86] sm:$0xff] }
 0x25c   : > { %v1731_v35 = vpop.permute.xlu0 %1730  ;;  %v1733_v38 = vpop.permute.xlu1 %1732 }
 0x25d   : > { %1815 = vst.msk [vmem:[#allocation2 + $0x60] sm:$0xff] %vm1802_vm8, %v1731_v35  ;;  %1816 = vst.msk [vmem:[#allocation2 + $0x68] sm:$0xff] %vm1802_vm8, %v1733_v38  ;;  %v6014_v38 = vld [vmem:[%s4622_s20 + $0xae] sm:$0xff] }
 0x25e   : > { %2104 = vrot.lane.b32.xlu0 %v2034_v60, %s4575_s30  ;;  %2106 = vrot.lane.b32.xlu1 %v2035_v34, %s4575_s30  ;;  %v2234_v60 = vld [vmem:[%s4622_s20 + $0x9e] sm:$0xff] }
 0x260   : > { %v1735_v45 = vpop.permute.xlu0 %1734  ;;  %v1737_v48 = vpop.permute.xlu1 %1736 }
 0x261   : > { %1817 = vst.msk [vmem:[#allocation2 + $0x70] sm:$0xff] %vm1802_vm8, %v1735_v45  ;;  %1818 = vst.msk [vmem:[#allocation2 + $0x78] sm:$0xff] %vm1802_vm8, %v1737_v48  ;;  %v6026_v48 = vld [vmem:[%s4622_s20 + $0xc6] sm:$0xff] }
 0x262   : > { %2108 = vrot.lane.b32.xlu0 %v2036_v39, %s4575_s30  ;;  %2110 = vrot.lane.b32.xlu1 %v2037_v44, %s4575_s30  ;;  %v6017_v39 = vld [vmem:[%s4622_s20 + $0xb6] sm:$0xff] }
 0x264   : > { %v1739_v49 = vpop.permute.xlu0 %1738  ;;  %v1741_v56 = vpop.permute.xlu1 %1740 }
 0x265   : > { %1819 = vst.msk [vmem:[#allocation2 + $0x80] sm:$0xff] %vm1802_vm8, %v1739_v49  ;;  %1820 = vst.msk [vmem:[#allocation2 + $0x88] sm:$0xff] %vm1802_vm8, %v1741_v56  ;;  %v6029_v49 = vld [vmem:[%s4622_s20 + $0xce] sm:$0xff] }
 0x266   : > { %2112 = vrot.lane.b32.xlu0 %v5495_v10, %s4575_s30  ;;  %2114 = vrot.lane.b32.xlu1 %v5498_v11, %s4575_s30 }
 0x268   : > { %v1743_v57 = vpop.permute.xlu0 %1742  ;;  %v1745_v58 = vpop.permute.xlu1 %1744 }
 0x269   : > { %1821 = vst.msk [vmem:[#allocation2 + $0x90] sm:$0xff] %vm1802_vm8, %v1743_v57  ;;  %1822 = vst.msk [vmem:[#allocation2 + $0x98] sm:$0xff] %vm1802_vm8, %v1745_v58  ;;  %v6038_v58 = vld [vmem:[%s4622_s20 + $0xde] sm:$0xff] }
 0x26a   : > { %2116 = vrot.lane.b32.xlu0 %v5507_v18, %s4575_s30  ;;  %2118 = vrot.lane.b32.xlu1 %v5510_v21, %s4575_s30 }
 0x26c   : > { %v1747_v59 = vpop.permute.xlu0 %1746  ;;  %v1749_v9 = vpop.permute.xlu1 %1748 }
 0x26d   : > { %1823 = vst.msk [vmem:[#allocation2 + $0xa0] sm:$0xff] %vm1802_vm8, %v1747_v59  ;;  %1824 = vst.msk [vmem:[#allocation2 + $0xa8] sm:$0xff] %vm1802_vm8, %v1749_v9  ;;  %v6041_v59 = vld [vmem:[%s4622_s20 + $0xe6] sm:$0xff] }
 0x26e   : > { %2120 = vrot.lane.b32.xlu0 %v5519_v42, %s4575_s30  ;;  %2122 = vrot.lane.b32.xlu1 %v5522_v43, %s4575_s30 }
 0x270   : > { %v1751_v10 = vpop.permute.xlu0 %1750  ;;  %v1753_v11 = vpop.permute.xlu1 %1752 }
 0x271   : > { %1825 = vst.msk [vmem:[#allocation2 + $0xb0] sm:$0xff] %vm1802_vm8, %v1751_v10  ;;  %1826 = vst.msk [vmem:[#allocation2 + $0xb8] sm:$0xff] %vm1802_vm8, %v1753_v11  ;;  %v6050_v11 = vld [vmem:[%s4622_s20 + $0xf6] sm:$0xff] }
 0x272   : > { %2124 = vrot.lane.b32.xlu0 %v5531_v50, %s4575_s30  ;;  %2126 = vrot.lane.b32.xlu1 %v5534_v51, %s4575_s30 }
 0x274   : > { %v1755_v18 = vpop.permute.xlu0 %1754  ;;  %v1757_v21 = vpop.permute.xlu1 %1756 }
 0x275   : > { %1827 = vst.msk [vmem:[#allocation2 + $0xc0] sm:$0xff] %vm1802_vm8, %v1755_v18  ;;  %1828 = vst.msk [vmem:[#allocation2 + $0xc8] sm:$0xff] %vm1802_vm8, %v1757_v21  ;;  %v6053_v18 = vld [vmem:[%s4622_s20 + $0xfe] sm:$0xff] }
 0x276   : > { %2128 = vrot.lane.b32.xlu0 %v5543_v17, %s4575_s30  ;;  %2130 = vrot.lane.b32.xlu1 %v5546_v61, %s4575_s30 }
 0x278   : > { %v1759_v42 = vpop.permute.xlu0 %1758  ;;  %v1761_v43 = vpop.permute.xlu1 %1760 }
 0x279   : > { %1829 = vst.msk [vmem:[#allocation2 + $0xd0] sm:$0xff] %vm1802_vm8, %v1759_v42  ;;  %1830 = vst.msk [vmem:[#allocation2 + $0xd8] sm:$0xff] %vm1802_vm8, %v1761_v43  ;;  %v6062_v43 = vld [vmem:[%s4622_s20 + $0x10e] sm:$0xff] }
 0x27a   : > { %2132 = vrot.lane.b32.xlu0 %v5555_v19, %s4575_s30  ;;  %2134 = vrot.lane.b32.xlu1 %v5558_v20, %s4575_s30 }
 0x27c   : > { %v1763_v50 = vpop.permute.xlu0 %1762  ;;  %v1765_v51 = vpop.permute.xlu1 %1764 }
 0x27d   : > { %1831 = vst.msk [vmem:[#allocation2 + $0xe0] sm:$0xff] %vm1802_vm8, %v1763_v50  ;;  %1832 = vst.msk [vmem:[#allocation2 + $0xe8] sm:$0xff] %vm1802_vm8, %v1765_v51  ;;  %v6065_v50 = vld [vmem:[%s4622_s20 + $0x116] sm:$0xff] }
 0x27e   : > { %2136 = vrot.lane.b32.xlu0 %v5567_v6, %s4575_s30  ;;  %2138 = vrot.lane.b32.xlu1 %v5570_v7, %s4575_s30 }
 0x280   : > { %v1767_v17 = vpop.permute.xlu0 %1766  ;;  %v1769_v61 = vpop.permute.xlu1 %1768 }
 0x281   : > { %1833 = vst.msk [vmem:[#allocation2 + $0xf0] sm:$0xff] %vm1802_vm8, %v1767_v17  ;;  %1834 = vst.msk [vmem:[#allocation2 + $0xf8] sm:$0xff] %vm1802_vm8, %v1769_v61  ;;  %v6074_v61 = vld [vmem:[%s4622_s20 + $0x126] sm:$0xff] }
 0x282   : > { %2140 = vrot.lane.b32.xlu0 %v5579_v26, %s4575_s30  ;;  %2142 = vrot.lane.b32.xlu1 %v5582_v27, %s4575_s30 }
 0x284   : > { %v1900_v19 = vpop.permute.xlu0 %1899  ;;  %v1902_v20 = vpop.permute.xlu1 %1901 }
 0x285   : > { %1996 = vst.msk [vmem:[#allocation2] sm:$0xff] %vm1995_vm9, %v1900_v19  ;;  %1997 = vst.msk [vmem:[#allocation2 + $0x8] sm:$0xff] %vm1995_vm9, %v1902_v20  ;;  %v6077_v19 = vld [vmem:[%s4622_s20 + $0x12e] sm:$0xff] }
 0x286   : > { %2144 = vrot.lane.b32.xlu0 %v5591_v32, %s4575_s30  ;;  %2146 = vrot.lane.b32.xlu1 %v5594_v33, %s4575_s30  ;;  %v2221_v32 = vld [vmem:[%s4622_s20 + $0x6] sm:$0xff]  ;;  %v2222_v33 = vld [vmem:[%s4622_s20 + $0xe] sm:$0xff] }
 0x288   : > { %v1904_v6 = vpop.permute.xlu0 %1903  ;;  %v1906_v7 = vpop.permute.xlu1 %1905 }
 0x289   : > { %1998 = vst.msk [vmem:[#allocation2 + $0x10] sm:$0xff] %vm1995_vm9, %v1904_v6  ;;  %1999 = vst.msk [vmem:[#allocation2 + $0x18] sm:$0xff] %vm1995_vm9, %v1906_v7  ;;  %v6086_v7 = vld [vmem:[%s4622_s20 + $0x13e] sm:$0xff] }
 0x28a   : > { %2148 = vrot.lane.b32.xlu0 %v5603_v36, %s4575_s30  ;;  %2150 = vrot.lane.b32.xlu1 %v5606_v37, %s4575_s30 }
 0x28c   : > { %v1908_v26 = vpop.permute.xlu0 %1907  ;;  %v1910_v27 = vpop.permute.xlu1 %1909 }
 0x28d   : > { %2000 = vst.msk [vmem:[#allocation2 + $0x20] sm:$0xff] %vm1995_vm9, %v1908_v26  ;;  %2001 = vst.msk [vmem:[#allocation2 + $0x28] sm:$0xff] %vm1995_vm9, %v1910_v27  ;;  %v6089_v26 = vld [vmem:[%s4622_s20 + $0x146] sm:$0xff] }
 0x28e   : > { %2152 = vrot.lane.b32.xlu0 %v5615_v40, %s4575_s30  ;;  %2154 = vrot.lane.b32.xlu1 %v5618_v41, %s4575_s30  ;;  %v2224_v40 = vld [vmem:[%s4622_s20 + $0x26] sm:$0xff] }
 0x290   : > { %v1912_v36 = vpop.permute.xlu0 %1911  ;;  %v1914_v37 = vpop.permute.xlu1 %1913 }
 0x291   : > { %2002 = vst.msk [vmem:[#allocation2 + $0x30] sm:$0xff] %vm1995_vm9, %v1912_v36  ;;  %2003 = vst.msk [vmem:[#allocation2 + $0x38] sm:$0xff] %vm1995_vm9, %v1914_v37  ;;  %v6101_v36 = vld [vmem:[%s4622_s20 + $0x15e] sm:$0xff] }
 0x292   : > { %2285 = vrot.lane.b32.xlu0 %v2221_v32, %s4576_s5  ;;  %2287 = vrot.lane.b32.xlu1 %v2222_v33, %s4576_s5  ;;  %v6098_v33 = vld [vmem:[%s4622_s20 + $0x156] sm:$0xff] }
 0x294   : > { %v1916_v41 = vpop.permute.xlu0 %1915  ;;  %v1918_v23 = vpop.permute.xlu1 %1917 }
 0x295   : > { %2004 = vst.msk [vmem:[#allocation2 + $0x40] sm:$0xff] %vm1995_vm9, %v1916_v41  ;;  %2005 = vst.msk [vmem:[#allocation2 + $0x48] sm:$0xff] %vm1995_vm9, %v1918_v23  ;;  %v6113_v41 = vld [vmem:[%s4622_s20 + $0x176] sm:$0xff] }
 0x296   : > { %2289 = vrot.lane.b32.xlu0 %v2223_v22, %s4576_s5  ;;  %2291 = vrot.lane.b32.xlu1 %v2224_v40, %s4576_s5  ;;  %v6110_v40 = vld [vmem:[%s4622_s20 + $0x16e] sm:$0xff] }
 0x298   : > { %v1920_v14 = vpop.permute.xlu0 %1919  ;;  %v1922_v15 = vpop.permute.xlu1 %1921 }
 0x299   : > { %2006 = vst.msk [vmem:[#allocation2 + $0x50] sm:$0xff] %vm1995_vm9, %v1920_v14  ;;  %2007 = vst.msk [vmem:[#allocation2 + $0x58] sm:$0xff] %vm1995_vm9, %v1922_v15 }
 0x29a   : > { %2293 = vrot.lane.b32.xlu0 %v2225_v62, %s4576_s5  ;;  %2295 = vrot.lane.b32.xlu1 %v2226_v0, %s4576_s5  ;;  %v6122_v0 = vld [vmem:[%s4622_s20 + $0x1b8] sm:$0xff] }
 0x29c   : > { %v1924_v46 = vpop.permute.xlu0 %1923  ;;  %v1926_v47 = vpop.permute.xlu1 %1925 }
 0x29d   : > { %2008 = vst.msk [vmem:[#allocation2 + $0x60] sm:$0xff] %vm1995_vm9, %v1924_v46  ;;  %2009 = vst.msk [vmem:[#allocation2 + $0x68] sm:$0xff] %vm1995_vm9, %v1926_v47  ;;  %v6143_v47 = vld [vmem:[%s4622_s20 + $0x1be] sm:$0xff] }
 0x29e   : > { %2297 = vrot.lane.b32.xlu0 %v2227_v29, %s4576_s5  ;;  %2299 = vrot.lane.b32.xlu1 %v2228_v30, %s4576_s5  ;;  %v6131_v29 = vld [vmem:[%s4622_s20 + $0x1bb] sm:$0xff] }
 0x2a0   : > { %v1928_v2 = vpop.permute.xlu0 %1927  ;;  %v1930_v1 = vpop.permute.xlu1 %1929 }
 0x2a1   : > { %2010 = vst.msk [vmem:[#allocation2 + $0x70] sm:$0xff] %vm1995_vm9, %v1928_v2  ;;  %2011 = vst.msk [vmem:[#allocation2 + $0x78] sm:$0xff] %vm1995_vm9, %v1930_v1 }
 0x2a2   : > { %2301 = vrot.lane.b32.xlu0 %v2229_v54, %s4576_s5  ;;  %2303 = vrot.lane.b32.xlu1 %v2230_v55, %s4576_s5 }
 0x2a4   : > { %v1932_v24 = vpop.permute.xlu0 %1931  ;;  %v1934_v25 = vpop.permute.xlu1 %1933 }
 0x2a5   : > { %2012 = vst.msk [vmem:[#allocation2 + $0x80] sm:$0xff] %vm1995_vm9, %v1932_v24  ;;  %2013 = vst.msk [vmem:[#allocation2 + $0x88] sm:$0xff] %vm1995_vm9, %v1934_v25  ;;  %v4392_v25 = vld [vmem:[%s4622_s20 + $0x203] sm:$0xff] }
 0x2a6   : > { %2305 = vrot.lane.b32.xlu0 %v2231_v4, %s4576_s5  ;;  %2307 = vrot.lane.b32.xlu1 %v2232_v5, %s4576_s5  ;;  %v6158_v4 = vld [vmem:[%s4622_s20 + $0x1b0] sm:$0xff] }
 0x2a8   : > { %v1936_v34 = vpop.permute.xlu0 %1935  ;;  %v1938_v35 = vpop.permute.xlu1 %1937 }
 0x2a9   : > { %2014 = vst.msk [vmem:[#allocation2 + $0x90] sm:$0xff] %vm1995_vm9, %v1936_v34  ;;  %2015 = vst.msk [vmem:[#allocation2 + $0x98] sm:$0xff] %vm1995_vm9, %v1938_v35  ;;  %v6173_v34 = vld [vmem:[%s4622_s20 + $0x1b3] sm:$0xff]  ;;  %v6176_v35 = vld [vmem:[%s4622_s20 + $0x143] sm:$0xff] }
 0x2aa   : > { %2309 = vrot.lane.b32.xlu0 %v2233_v28, %s4576_s5  ;;  %2311 = vrot.lane.b32.xlu1 %v2234_v60, %s4576_s5 }
 0x2ac   : > { %v1940_v44 = vpop.permute.xlu0 %1939  ;;  %v1942_v45 = vpop.permute.xlu1 %1941 }
 0x2ad   : > { %2016 = vst.msk [vmem:[#allocation2 + $0xa0] sm:$0xff] %vm1995_vm9, %v1940_v44  ;;  %2017 = vst.msk [vmem:[#allocation2 + $0xa8] sm:$0xff] %vm1995_vm9, %v1942_v45  ;;  %v4424_v45 = vld [vmem:[%s4622_s20 + $0x206] sm:$0xff] }
 0x2ae   : > { %2313 = vrot.lane.b32.xlu0 %v6014_v38, %s4576_s5  ;;  %2315 = vrot.lane.b32.xlu1 %v6017_v39, %s4576_s5 }
 0x2b0   : > { %v1944_v56 = vpop.permute.xlu0 %1943  ;;  %v1946_v57 = vpop.permute.xlu1 %1945 }
 0x2b1   : > { %2018 = vst.msk [vmem:[#allocation2 + $0xb0] sm:$0xff] %vm1995_vm9, %v1944_v56  ;;  %2019 = vst.msk [vmem:[#allocation2 + $0xb8] sm:$0xff] %vm1995_vm9, %v1946_v57 }
 0x2b2   : > { %2317 = vrot.lane.b32.xlu0 %v6026_v48, %s4576_s5  ;;  %2319 = vrot.lane.b32.xlu1 %v6029_v49, %s4576_s5 }
 0x2b4   : > { %v1948_v9 = vpop.permute.xlu0 %1947  ;;  %v1950_v10 = vpop.permute.xlu1 %1949 }
 0x2b5   : > { %2020 = vst.msk [vmem:[#allocation2 + $0xc0] sm:$0xff] %vm1995_vm9, %v1948_v9  ;;  %2021 = vst.msk [vmem:[#allocation2 + $0xc8] sm:$0xff] %vm1995_vm9, %v1950_v10  ;;  %v6194_v9 = vld [vmem:[%s4622_s20 + $0x1b6] sm:$0xff] }
 0x2b6   : > { %2321 = vrot.lane.b32.xlu0 %v6038_v58, %s4576_s5  ;;  %2323 = vrot.lane.b32.xlu1 %v6041_v59, %s4576_s5 }
 0x2b8   : > { %v1952_v21 = vpop.permute.xlu0 %1951  ;;  %v1954_v42 = vpop.permute.xlu1 %1953 }
 0x2b9   : > { %2022 = vst.msk [vmem:[#allocation2 + $0xd0] sm:$0xff] %vm1995_vm9, %v1952_v21  ;;  %2023 = vst.msk [vmem:[#allocation2 + $0xd8] sm:$0xff] %vm1995_vm9, %v1954_v42  ;;  %v4359_v42 = vld [vmem:[%s4622_s20 + $0x1f8] sm:$0xff] }
 0x2ba   : > { %2325 = vrot.lane.b32.xlu0 %v6050_v11, %s4576_s5  ;;  %2327 = vrot.lane.b32.xlu1 %v6053_v18, %s4576_s5 }
 0x2bc   : > { %v1956_v51 = vpop.permute.xlu0 %1955  ;;  %v1958_v17 = vpop.permute.xlu1 %1957 }
 0x2bd   : > { %2024 = vst.msk [vmem:[#allocation2 + $0xe0] sm:$0xff] %vm1995_vm9, %v1956_v51  ;;  %2025 = vst.msk [vmem:[#allocation2 + $0xe8] sm:$0xff] %vm1995_vm9, %v1958_v17 }
 0x2be   : > { %2329 = vrot.lane.b32.xlu0 %v6062_v43, %s4576_s5  ;;  %2331 = vrot.lane.b32.xlu1 %v6065_v50, %s4576_s5 }
 0x2c0   : > { %v1960_v20 = vpop.permute.xlu0 %1959  ;;  %v1962_v6 = vpop.permute.xlu1 %1961 }
 0x2c1   : > { %2026 = vst.msk [vmem:[#allocation2 + $0xf0] sm:$0xff] %vm1995_vm9, %v1960_v20  ;;  %2027 = vst.msk [vmem:[#allocation2 + $0xf8] sm:$0xff] %vm1995_vm9, %v1962_v6  ;;  %v6209_v20 = vld [vmem:[%s4622_s20 + $0x1a0] sm:$0xff] }
 0x2c2   : > { %2333 = vrot.lane.b32.xlu0 %v6074_v61, %s4576_s5  ;;  %2335 = vrot.lane.b32.xlu1 %v6077_v19, %s4576_s5 }
 0x2c4   : > { %v2093_v27 = vpop.permute.xlu0 %2092  ;;  %v2095_v32 = vpop.permute.xlu1 %2094 }
 0x2c5   : > { %2189 = vst.msk [vmem:[#allocation2] sm:$0xff] %vm2188_vm10, %v2093_v27  ;;  %2190 = vst.msk [vmem:[#allocation2 + $0x8] sm:$0xff] %vm2188_vm10, %v2095_v32 }
 0x2c6   : > { %2337 = vrot.lane.b32.xlu0 %v6086_v7, %s4576_s5  ;;  %2339 = vrot.lane.b32.xlu1 %v6089_v26, %s4576_s5 }
 0x2c8   : > { %v2097_v37 = vpop.permute.xlu0 %2096  ;;  %v2099_v22 = vpop.permute.xlu1 %2098 }
 0x2c9   : > { %2191 = vst.msk [vmem:[#allocation2 + $0x10] sm:$0xff] %vm2188_vm10, %v2097_v37  ;;  %2192 = vst.msk [vmem:[#allocation2 + $0x18] sm:$0xff] %vm2188_vm10, %v2099_v22  ;;  %v6224_v22 = vld [vmem:[%s4622_s20 + $0x1a3] sm:$0xff] }
 0x2ca   : > { %2341 = vrot.lane.b32.xlu0 %v6098_v33, %s4576_s5  ;;  %2343 = vrot.lane.b32.xlu1 %v6101_v36, %s4576_s5 }
 0x2cc   : > { %v2101_v23 = vpop.permute.xlu0 %2100  ;;  %v2103_v62 = vpop.permute.xlu1 %2102 }
 0x2cd   : > { %2193 = vst.msk [vmem:[#allocation2 + $0x20] sm:$0xff] %vm2188_vm10, %v2101_v23  ;;  %2194 = vst.msk [vmem:[#allocation2 + $0x28] sm:$0xff] %vm2188_vm10, %v2103_v62  ;;  %v6227_v23 = vld [vmem:[%s4622_s20 + $0x13b] sm:$0xff] }
 0x2ce   : > { %2345 = vrot.lane.b32.xlu0 %v6110_v40, %s4576_s5  ;;  %2347 = vrot.lane.b32.xlu1 %v6113_v41, %s4576_s5 }
 0x2d0   : > { %v2105_v14 = vpop.permute.xlu0 %2104  ;;  %v2107_v15 = vpop.permute.xlu1 %2106 }
 0x2d1   : > { %2195 = vst.msk [vmem:[#allocation2 + $0x30] sm:$0xff] %vm2188_vm10, %v2105_v14  ;;  %2196 = vst.msk [vmem:[#allocation2 + $0x38] sm:$0xff] %vm2188_vm10, %v2107_v15  ;;  %v6237_v14 = vld [vmem:[%s4622_s20 + $0xe3] sm:$0xff] }
 0x2d2   : > { %2478 = vrot.lane.b32.xlu0 %v5771_v8, %s4577_s6  ;;  %2540 = vrot.lane.b32.xlu1 %v6122_v0, %s4577_s6  ;;  %v6140_v8 = vld [vmem:[%s4622_s20 + $0xfb] sm:$0xff] }
 0x2d4   : > { %v2109_v30 = vpop.permute.xlu0 %2108  ;;  %v2111_v46 = vpop.permute.xlu1 %2110 }
 0x2d5   : > { %2197 = vst.msk [vmem:[#allocation2 + $0x40] sm:$0xff] %vm2188_vm10, %v2109_v30  ;;  %2198 = vst.msk [vmem:[#allocation2 + $0x48] sm:$0xff] %vm2188_vm10, %v2111_v46  ;;  %v6245_v46 = vld [vmem:[%s4622_s20 + $0x1a6] sm:$0xff] }
 0x2d6   : > { %2508 = vrot.lane.b32.xlu0 %v5825_v63, %s4577_s6  ;;  %2733 = vrot.lane.b32.xlu1 %v6131_v29, %s4578_s7  ;;  %v4360_v63 = vld [vmem:[%s4622_s20 + $0x200] sm:$0xff] }
 0x2d8   : > { %v2113_v54 = vpop.permute.xlu0 %2112  ;;  %v2115_v55 = vpop.permute.xlu1 %2114 }
 0x2d9   : > { %2199 = vst.msk [vmem:[#allocation2 + $0x50] sm:$0xff] %vm2188_vm10, %v2113_v54  ;;  %2200 = vst.msk [vmem:[#allocation2 + $0x58] sm:$0xff] %vm2188_vm10, %v2115_v55 }
 0x2da   : > { %2701 = vrot.lane.b32.xlu0 %v6140_v8, %s4578_s7  ;;  %2926 = vrot.lane.b32.xlu1 %v6143_v47, %s4579_s8 }
 0x2dc   : > { %v2117_v2 = vpop.permute.xlu0 %2116  ;;  %v2119_v1 = vpop.permute.xlu1 %2118 }
 0x2dd   : > { %2201 = vst.msk [vmem:[#allocation2 + $0x60] sm:$0xff] %vm2188_vm10, %v2117_v2  ;;  %2202 = vst.msk [vmem:[#allocation2 + $0x68] sm:$0xff] %vm2188_vm10, %v2119_v1 }
 0x2de   : > { %2894 = vrot.lane.b32.xlu0 %v6053_v18, %s4579_s8  ;;  %3120 = vrot.lane.b32.xlu1 %v4360_v63, %s4580_s9  ;;  %v4358_v63 = vld [vmem:[%s4622_s20 + $0x1e8] sm:$0xff] }
 0x2e0   : > { %v2121_v5 = vpop.permute.xlu0 %2120  ;;  %v2123_v24 = vpop.permute.xlu1 %2122 }
 0x2e1   : > { %2203 = vst.msk [vmem:[#allocation2 + $0x70] sm:$0xff] %vm2188_vm10, %v2121_v5  ;;  %2204 = vst.msk [vmem:[#allocation2 + $0x78] sm:$0xff] %vm2188_vm10, %v2123_v24  ;;  %v6260_v5 = vld [vmem:[%s4622_s20 + $0x198] sm:$0xff] }
 0x2e2   : > { %2538 = vrot.lane.b32.xlu0 %v6158_v4, %s4577_s6  ;;  %3088 = vrot.lane.b32.xlu1 %v5855_v3, %s4580_s9 }
 0x2e4   : > { %v2125_v28 = vpop.permute.xlu0 %2124  ;;  %v2127_v60 = vpop.permute.xlu1 %2126 }
 0x2e5   : > { %2205 = vst.msk [vmem:[#allocation2 + $0x80] sm:$0xff] %vm2188_vm10, %v2125_v28  ;;  %2206 = vst.msk [vmem:[#allocation2 + $0x88] sm:$0xff] %vm2188_vm10, %v2127_v60  ;;  %v6275_v60 = vld [vmem:[%s4622_s20 + $0x19b] sm:$0xff] }
 0x2e6   : > { %3313 = vrot.lane.b32.xlu0 %v4392_v25, %s4581_s10  ;;  %2506 = vrot.lane.b32.xlu1 %v5822_v13, %s4577_s6  ;;  %v6186_v13 = vld [vmem:[%s4622_s20 + $0xf3] sm:$0xff] }
 0x2e8   : > { %v2129_v3 = vpop.permute.xlu0 %2128  ;;  %v2131_v44 = vpop.permute.xlu1 %2130 }
 0x2e9   : > { %2207 = vst.msk [vmem:[#allocation2 + $0x90] sm:$0xff] %vm2188_vm10, %v2129_v3  ;;  %2208 = vst.msk [vmem:[#allocation2 + $0x98] sm:$0xff] %vm2188_vm10, %v2131_v44  ;;  %v6278_v3 = vld [vmem:[%s4622_s20 + $0x12b] sm:$0xff] }
 0x2ea   : > { %2731 = vrot.lane.b32.xlu0 %v6173_v34, %s4578_s7  ;;  %3281 = vrot.lane.b32.xlu1 %v6176_v35, %s4581_s10 }
 0x2ec   : > { %v2133_v56 = vpop.permute.xlu0 %2132  ;;  %v2135_v57 = vpop.permute.xlu1 %2134 }
 0x2ed   : > { %2209 = vst.msk [vmem:[#allocation2 + $0xa0] sm:$0xff] %vm2188_vm10, %v2133_v56  ;;  %2210 = vst.msk [vmem:[#allocation2 + $0xa8] sm:$0xff] %vm2188_vm10, %v2135_v57 }
 0x2ee   : > { %3506 = vrot.lane.b32.xlu0 %v4424_v45, %s4582_s11  ;;  %2699 = vrot.lane.b32.xlu1 %v6186_v13, %s4578_s7  ;;  %v4422_v45 = vld [vmem:[%s4622_s20 + $0x1ee] sm:$0xff] }
 0x2f0   : > { %v2137_v10 = vpop.permute.xlu0 %2136  ;;  %v2139_v21 = vpop.permute.xlu1 %2138 }
 0x2f1   : > { %2211 = vst.msk [vmem:[#allocation2 + $0xb0] sm:$0xff] %vm2188_vm10, %v2137_v10  ;;  %2212 = vst.msk [vmem:[#allocation2 + $0xb8] sm:$0xff] %vm2188_vm10, %v2139_v21  ;;  %v6296_v10 = vld [vmem:[%s4622_s20 + $0x19e] sm:$0xff] }
 0x2f2   : > { %2924 = vrot.lane.b32.xlu0 %v6194_v9, %s4579_s8  ;;  %3474 = vrot.lane.b32.xlu1 %v6089_v26, %s4582_s11  ;;  %v4391_v26 = vld [vmem:[%s4622_s20 + $0x1fb] sm:$0xff] }
 0x2f4   : > { %v2141_v51 = vpop.permute.xlu0 %2140  ;;  %v2143_v17 = vpop.permute.xlu1 %2142 }
 0x2f5   : > { %2213 = vst.msk [vmem:[#allocation2 + $0xc0] sm:$0xff] %vm2188_vm10, %v2141_v51  ;;  %2214 = vst.msk [vmem:[#allocation2 + $0xc8] sm:$0xff] %vm2188_vm10, %v2143_v17  ;;  %v4357_v51 = vld [vmem:[%s4622_s20 + $0x1e0] sm:$0xff] }
 0x2f6   : > { %2892 = vrot.lane.b32.xlu0 %v6050_v11, %s4579_s8  ;;  %3118 = vrot.lane.b32.xlu1 %v4359_v42, %s4580_s9 }
 0x2f8   : > { %v2145_v6 = vpop.permute.xlu0 %2144  ;;  %v2147_v27 = vpop.permute.xlu1 %2146 }
 0x2f9   : > { %2215 = vst.msk [vmem:[#allocation2 + $0xd0] sm:$0xff] %vm2188_vm10, %v2145_v6  ;;  %2216 = vst.msk [vmem:[#allocation2 + $0xd8] sm:$0xff] %vm2188_vm10, %v2147_v27  ;;  %v6311_v27 = vld [vmem:[%s4622_s20 + $0x188] sm:$0xff] }
 0x2fa   : > { %2536 = vrot.lane.b32.xlu0 %v6209_v20, %s4577_s6  ;;  %3086 = vrot.lane.b32.xlu1 %v5852_v12, %s4580_s9 }
 0x2fc   : > { %v2149_v32 = vpop.permute.xlu0 %2148  ;;  %v2151_v37 = vpop.permute.xlu1 %2150 }
 0x2fd   : > { %2217 = vst.msk [vmem:[#allocation2 + $0xe0] sm:$0xff] %vm2188_vm10, %v2149_v32  ;;  %2218 = vst.msk [vmem:[#allocation2 + $0xe8] sm:$0xff] %vm2188_vm10, %v2151_v37 }
 0x2fe   : > { %3311 = vrot.lane.b32.xlu0 %v4391_v26, %s4581_s10  ;;  %2504 = vrot.lane.b32.xlu1 %v5813_v31, %s4577_s6  ;;  %v4423_v31 = vld [vmem:[%s4622_s20 + $0x1fe] sm:$0xff] }
 0x300   : > { %v2153_v12 = vpop.permute.xlu0 %2152  ;;  %v2155_v62 = vpop.permute.xlu1 %2154 }
 0x301   : > { %2219 = vst.msk [vmem:[#allocation2 + $0xf0] sm:$0xff] %vm2188_vm10, %v2153_v12  ;;  %2220 = vst.msk [vmem:[#allocation2 + $0xf8] sm:$0xff] %vm2188_vm10, %v2155_v62  ;;  %v6329_v62 = vld [vmem:[%s4622_s20 + $0x18b] sm:$0xff] }
 0x302   : > { %2729 = vrot.lane.b32.xlu0 %v6224_v22, %s4578_s7  ;;  %3279 = vrot.lane.b32.xlu1 %v6227_v23, %s4581_s10 }
 0x304   : > { %v2286_v15 = vpop.permute.xlu0 %2285  ;;  %v2288_v30 = vpop.permute.xlu1 %2287 }
 0x305   : > { %2382 = vst.msk [vmem:[#allocation2] sm:$0xff] %vm2381_vm11, %v2286_v15  ;;  %2383 = vst.msk [vmem:[#allocation2 + $0x8] sm:$0xff] %vm2381_vm11, %v2288_v30  ;;  %v4421_v30 = vld [vmem:[%s4622_s20 + $0x1e6] sm:$0xff] }
 0x306   : > { %3504 = vrot.lane.b32.xlu0 %v4423_v31, %s4582_s11  ;;  %2697 = vrot.lane.b32.xlu1 %v6237_v14, %s4578_s7 }
 0x308   : > { %v2290_v54 = vpop.permute.xlu0 %2289  ;;  %v2292_v55 = vpop.permute.xlu1 %2291 }
 0x309   : > { %2384 = vst.msk [vmem:[#allocation2 + $0x10] sm:$0xff] %vm2381_vm11, %v2290_v54  ;;  %2385 = vst.msk [vmem:[#allocation2 + $0x18] sm:$0xff] %vm2381_vm11, %v2292_v55  ;;  %v6342_v54 = vld [vmem:[%s4622_s20 + $0xcb] sm:$0xff] }
 0x30a   : > { %2922 = vrot.lane.b32.xlu0 %v6245_v46, %s4579_s8  ;;  %3472 = vrot.lane.b32.xlu1 %v6086_v7, %s4582_s11 }
 0x30c   : > { %v2294_v2 = vpop.permute.xlu0 %2293  ;;  %v2296_v1 = vpop.permute.xlu1 %2295 }
 0x30d   : > { %2386 = vst.msk [vmem:[#allocation2 + $0x20] sm:$0xff] %vm2381_vm11, %v2294_v2  ;;  %2387 = vst.msk [vmem:[#allocation2 + $0x28] sm:$0xff] %vm2381_vm11, %v2296_v1  ;;  %v6350_v2 = vld [vmem:[%s4622_s20 + $0x18e] sm:$0xff] }
 0x30e   : > { %2890 = vrot.lane.b32.xlu0 %v6041_v59, %s4579_s8  ;;  %3116 = vrot.lane.b32.xlu1 %v4358_v63, %s4580_s9  ;;  %v4390_v59 = vld [vmem:[%s4622_s20 + $0x1eb] sm:$0xff] }
 0x310   : > { %v2298_v24 = vpop.permute.xlu0 %2297  ;;  %v2300_v25 = vpop.permute.xlu1 %2299 }
 0x311   : > { %2388 = vst.msk [vmem:[#allocation2 + $0x30] sm:$0xff] %vm2381_vm11, %v2298_v24  ;;  %2389 = vst.msk [vmem:[#allocation2 + $0x38] sm:$0xff] %vm2381_vm11, %v2300_v25  ;;  %v4356_v25 = vld [vmem:[%s4622_s20 + $0x1d0] sm:$0xff] }
 0x312   : > { %2534 = vrot.lane.b32.xlu0 %v6260_v5, %s4577_s6  ;;  %3084 = vrot.lane.b32.xlu1 %v5843_v53, %s4580_s9 }
 0x314   : > { %v2302_v7 = vpop.permute.xlu0 %2301  ;;  %v2304_v28 = vpop.permute.xlu1 %2303 }
 0x315   : > { %2390 = vst.msk [vmem:[#allocation2 + $0x40] sm:$0xff] %vm2381_vm11, %v2302_v7  ;;  %2391 = vst.msk [vmem:[#allocation2 + $0x48] sm:$0xff] %vm2381_vm11, %v2304_v28  ;;  %v6365_v28 = vld [vmem:[%s4622_s20 + $0x180] sm:$0xff] }
 0x316   : > { %3309 = vrot.lane.b32.xlu0 %v4390_v59, %s4581_s10  ;;  %2502 = vrot.lane.b32.xlu1 %v5810_v16, %s4577_s6  ;;  %v6288_v16 = vld [vmem:[%s4622_s20 + $0xdb] sm:$0xff] }
 0x318   : > { %v2306_v53 = vpop.permute.xlu0 %2305  ;;  %v2308_v44 = vpop.permute.xlu1 %2307 }
 0x319   : > { %2392 = vst.msk [vmem:[#allocation2 + $0x50] sm:$0xff] %vm2381_vm11, %v2306_v53  ;;  %2393 = vst.msk [vmem:[#allocation2 + $0x58] sm:$0xff] %vm2381_vm11, %v2308_v44  ;;  %v6368_v53 = vld [vmem:[%s4622_s20 + $0x110] sm:$0xff] }
 0x31a   : > { %2727 = vrot.lane.b32.xlu0 %v6275_v60, %s4578_s7  ;;  %3277 = vrot.lane.b32.xlu1 %v6278_v3, %s4581_s10 }
 0x31c   : > { %v2310_v56 = vpop.permute.xlu0 %2309  ;;  %v2312_v57 = vpop.permute.xlu1 %2311 }
 0x31d   : > { %2394 = vst.msk [vmem:[#allocation2 + $0x60] sm:$0xff] %vm2381_vm11, %v2310_v56  ;;  %2395 = vst.msk [vmem:[#allocation2 + $0x68] sm:$0xff] %vm2381_vm11, %v2312_v57 }
 0x31e   : > { %3502 = vrot.lane.b32.xlu0 %v4422_v45, %s4582_s11  ;;  %2695 = vrot.lane.b32.xlu1 %v6288_v16, %s4578_s7  ;;  %v6378_v45 = vld [vmem:[%s4622_s20 + $0xc0] sm:$0xff] }
 0x320   : > { %v2314_v21 = vpop.permute.xlu0 %2313  ;;  %v2316_v42 = vpop.permute.xlu1 %2315 }
 0x321   : > { %2396 = vst.msk [vmem:[#allocation2 + $0x70] sm:$0xff] %vm2381_vm11, %v2314_v21  ;;  %2397 = vst.msk [vmem:[#allocation2 + $0x78] sm:$0xff] %vm2381_vm11, %v2316_v42  ;;  %v6386_v21 = vld [vmem:[%s4622_s20 + $0x183] sm:$0xff]  ;;  %v6389_v42 = vld [vmem:[%s4622_s20 + $0x113] sm:$0xff] }
 0x322   : > { %2920 = vrot.lane.b32.xlu0 %v6296_v10, %s4579_s8  ;;  %3470 = vrot.lane.b32.xlu1 %v6077_v19, %s4582_s11  ;;  %v4389_v19 = vld [vmem:[%s4622_s20 + $0x1e3] sm:$0xff] }
 0x324   : > { %v2318_v17 = vpop.permute.xlu0 %2317  ;;  %v2320_v6 = vpop.permute.xlu1 %2319 }
 0x325   : > { %2398 = vst.msk [vmem:[#allocation2 + $0x80] sm:$0xff] %vm2381_vm11, %v2318_v17  ;;  %2399 = vst.msk [vmem:[#allocation2 + $0x88] sm:$0xff] %vm2381_vm11, %v2320_v6  ;;  %v4420_v6 = vld [vmem:[%s4622_s20 + $0x1d6] sm:$0xff] }
 0x326   : > { %2888 = vrot.lane.b32.xlu0 %v6038_v58, %s4579_s8  ;;  %3114 = vrot.lane.b32.xlu1 %v4357_v51, %s4580_s9  ;;  %v6321_v58 = vld [vmem:[%s4622_s20 + $0xc8] sm:$0xff] }
 0x328   : > { %v2322_v26 = vpop.permute.xlu0 %2321  ;;  %v2324_v32 = vpop.permute.xlu1 %2323 }
 0x329   : > { %2400 = vst.msk [vmem:[#allocation2 + $0x90] sm:$0xff] %vm2381_vm11, %v2322_v26  ;;  %2401 = vst.msk [vmem:[#allocation2 + $0x98] sm:$0xff] %vm2381_vm11, %v2324_v32  ;;  %v6399_v26 = vld [vmem:[%s4622_s20 + $0xc3] sm:$0xff] }
 0x32a   : > { %2532 = vrot.lane.b32.xlu0 %v6311_v27, %s4577_s6  ;;  %3082 = vrot.lane.b32.xlu1 %v5840_v52, %s4580_s9  ;;  %v6332_v52 = vld [vmem:[%s4622_s20 + $0x123] sm:$0xff] }
 0x32c   : > { %v2326_v37 = vpop.permute.xlu0 %2325  ;;  %v2328_v12 = vpop.permute.xlu1 %2327 }
 0x32d   : > { %2402 = vst.msk [vmem:[#allocation2 + $0xa0] sm:$0xff] %vm2381_vm11, %v2326_v37  ;;  %2403 = vst.msk [vmem:[#allocation2 + $0xa8] sm:$0xff] %vm2381_vm11, %v2328_v12  ;;  %v6407_v37 = vld [vmem:[%s4622_s20 + $0x186] sm:$0xff] }
 0x32e   : > { %3307 = vrot.lane.b32.xlu0 %v4389_v19, %s4581_s10  ;;  %2500 = vrot.lane.b32.xlu1 %v6321_v58, %s4577_s6 }
 0x330   : > { %v2330_v31 = vpop.permute.xlu0 %2329  ;;  %v2332_v15 = vpop.permute.xlu1 %2331 }
 0x331   : > { %2404 = vst.msk [vmem:[#allocation2 + $0xb0] sm:$0xff] %vm2381_vm11, %v2330_v31  ;;  %2405 = vst.msk [vmem:[#allocation2 + $0xb8] sm:$0xff] %vm2381_vm11, %v2332_v15  ;;  %v4355_v15 = vld [vmem:[%s4622_s20 + $0x1c8] sm:$0xff] }
 0x332   : > { %2725 = vrot.lane.b32.xlu0 %v6329_v62, %s4578_s7  ;;  %3275 = vrot.lane.b32.xlu1 %v6332_v52, %s4581_s10 }
 0x334   : > { %v2334_v55 = vpop.permute.xlu0 %2333  ;;  %v2336_v63 = vpop.permute.xlu1 %2335 }
 0x335   : > { %2406 = vst.msk [vmem:[#allocation2 + $0xc0] sm:$0xff] %vm2381_vm11, %v2334_v55  ;;  %2407 = vst.msk [vmem:[#allocation2 + $0xc8] sm:$0xff] %vm2381_vm11, %v2336_v63  ;;  %v6422_v63 = vld [vmem:[%s4622_s20 + $0x170] sm:$0xff] }
 0x336   : > { %3500 = vrot.lane.b32.xlu0 %v4421_v30, %s4582_s11  ;;  %2693 = vrot.lane.b32.xlu1 %v6342_v54, %s4578_s7 }
 0x338   : > { %v2338_v1 = vpop.permute.xlu0 %2337  ;;  %v2340_v24 = vpop.permute.xlu1 %2339 }
 0x339   : > { %2408 = vst.msk [vmem:[#allocation2 + $0xd0] sm:$0xff] %vm2381_vm11, %v2338_v1  ;;  %2409 = vst.msk [vmem:[#allocation2 + $0xd8] sm:$0xff] %vm2381_vm11, %v2340_v24  ;;  %v6425_v1 = vld [vmem:[%s4622_s20 + $0x108] sm:$0xff] }
 0x33a   : > { %2918 = vrot.lane.b32.xlu0 %v6350_v2, %s4579_s8  ;;  %3468 = vrot.lane.b32.xlu1 %v6074_v61, %s4582_s11 }
 0x33c   : > { %v2342_v59 = vpop.permute.xlu0 %2341  ;;  %v2344_v7 = vpop.permute.xlu1 %2343 }
 0x33d   : > { %2410 = vst.msk [vmem:[#allocation2 + $0xe0] sm:$0xff] %vm2381_vm11, %v2342_v59  ;;  %2411 = vst.msk [vmem:[#allocation2 + $0xe8] sm:$0xff] %vm2381_vm11, %v2344_v7 }
 0x33e   : > { %2886 = vrot.lane.b32.xlu0 %v6029_v49, %s4579_s8  ;;  %3112 = vrot.lane.b32.xlu1 %v4356_v25, %s4580_s9  ;;  %v4388_v49 = vld [vmem:[%s4622_s20 + $0x1d3] sm:$0xff] }
 0x33f   : > { %v6435_v25 = vld [vmem:[%s4622_s20 + $0xb0] sm:$0xff] }
 0x340   : > { %v2346_v44 = vpop.permute.xlu0 %2345  ;;  %v2348_v61 = vpop.permute.xlu1 %2347 }
 0x341   : > { %2412 = vst.msk [vmem:[#allocation2 + $0xf0] sm:$0xff] %vm2381_vm11, %v2346_v44  ;;  %2413 = vst.msk [vmem:[#allocation2 + $0xf8] sm:$0xff] %vm2381_vm11, %v2348_v61  ;;  %v6443_v44 = vld [vmem:[%s4622_s20 + $0x173] sm:$0xff]  ;;  %v6446_v61 = vld [vmem:[%s4622_s20 + $0x10b] sm:$0xff] }
 0x342   : > { %2530 = vrot.lane.b32.xlu0 %v6365_v28, %s4577_s6  ;;  %3080 = vrot.lane.b32.xlu1 %v6368_v53, %s4580_s9 }
 0x344   : > { %v2479_v56 = vpop.permute.xlu0 %2478  ;;  %v2541_v57 = vpop.permute.xlu1 %2540 }
 0x345   : > { %2575 = vst.msk [vmem:[#allocation2] sm:$0xff] %vm2574_vm12, %v2479_v56  ;;  %2606 = vst.msk [vmem:[#allocation2 + $0xf8] sm:$0xff] %vm2574_vm12, %v2541_v57  ;;  %v4419_v57 = vld [vmem:[%s4622_s20 + $0x1ce] sm:$0xff] }
 0x346   : > { %3305 = vrot.lane.b32.xlu0 %v4388_v49, %s4581_s10  ;;  %2498 = vrot.lane.b32.xlu1 %v6378_v45, %s4577_s6 }
 0x348   : > { %v2509_v51 = vpop.permute.xlu0 %2508  ;;  %v2734_v17 = vpop.permute.xlu1 %2733 }
 0x349   : > { %2590 = vst.msk [vmem:[#allocation2 + $0x78] sm:$0xff] %vm2574_vm12, %v2509_v51  ;;  %v6456_v51 = vld [vmem:[%s4622_s20 + $0xb3] sm:$0xff] }
 0x34a   : > { %2799 = vst.msk [vmem:[#allocation2 + $0xf8] sm:$0xff] %vm2767_vm13, %v2734_v17  ;;  %2723 = vrot.lane.b32.xlu0 %v6386_v21, %s4578_s7  ;;  %3273 = vrot.lane.b32.xlu1 %v6389_v42, %s4581_s10 }
 0x34c   : > { %v2702_v32 = vpop.permute.xlu0 %2701  ;;  %v2927_v19 = vpop.permute.xlu1 %2926 }
 0x34d   : > { %2783 = vst.msk [vmem:[#allocation2 + $0x78] sm:$0xff] %vm2767_vm13, %v2702_v32 }
 0x34e   : > { %2992 = vst.msk [vmem:[#allocation2 + $0xf8] sm:$0xff] %vm2960_vm14, %v2927_v19  ;;  %3498 = vrot.lane.b32.xlu0 %v4420_v6, %s4582_s11  ;;  %2691 = vrot.lane.b32.xlu1 %v6399_v26, %s4578_s7 }
 0x350   : > { %v2895_v12 = vpop.permute.xlu0 %2894  ;;  %v3121_v31 = vpop.permute.xlu1 %3120 }
 0x351   : > { %2976 = vst.msk [vmem:[#allocation2 + $0x78] sm:$0xff] %vm2960_vm14, %v2895_v12 }
 0x352   : > { %3186 = vst.msk [vmem:[#allocation2 + $0xf8] sm:$0xff] %vm3154_vm15, %v3121_v31  ;;  %2916 = vrot.lane.b32.xlu0 %v6407_v37, %s4579_s8  ;;  %3466 = vrot.lane.b32.xlu1 %v6065_v50, %s4582_s11 }
 0x354   : > { %v2539_v30 = vpop.permute.xlu0 %2538  ;;  %v3089_v55 = vpop.permute.xlu1 %3088 }
 0x355   : > { %2605 = vst.msk [vmem:[#allocation2 + $0xf0] sm:$0xff] %vm2574_vm12, %v2539_v30 }
 0x356   : > { %3170 = vst.msk [vmem:[#allocation2 + $0x78] sm:$0xff] %vm3154_vm15, %v3089_v55  ;;  %2884 = vrot.lane.b32.xlu0 %v6026_v48, %s4579_s8  ;;  %3110 = vrot.lane.b32.xlu1 %v4355_v15, %s4580_s9  ;;  %v4387_v48 = vld [vmem:[%s4622_s20 + $0x1cb] sm:$0xff] }
 0x358   : > { %v3314_v50 = vpop.permute.xlu0 %3313  ;;  %v2507_v24 = vpop.permute.xlu1 %2506 }
 0x359   : > { %3379 = vst.msk [vmem:[#allocation2 + $0xf8] sm:$0xff] %vm3347_vm0, %v3314_v50 }
 0x35a   : > { %2589 = vst.msk [vmem:[#allocation2 + $0x70] sm:$0xff] %vm2574_vm12, %v2507_v24  ;;  %2528 = vrot.lane.b32.xlu0 %v6422_v63, %s4577_s6  ;;  %3078 = vrot.lane.b32.xlu1 %v6425_v1, %s4580_s9 }
 0x35c   : > { %v2732_v59 = vpop.permute.xlu0 %2731  ;;  %v3282_v7 = vpop.permute.xlu1 %3281 }
 0x35d   : > { %2798 = vst.msk [vmem:[#allocation2 + $0xf0] sm:$0xff] %vm2767_vm13, %v2732_v59 }
 0x35e   : > { %3363 = vst.msk [vmem:[#allocation2 + $0x78] sm:$0xff] %vm3347_vm0, %v3282_v7  ;;  %3303 = vrot.lane.b32.xlu0 %v4387_v48, %s4581_s10  ;;  %2496 = vrot.lane.b32.xlu1 %v6435_v25, %s4577_s6  ;;  %v6498_v48 = vld [vmem:[%s4622_s20 + $0x16b] sm:$0xff] }
 0x360   : > { %v3507_v49 = vpop.permute.xlu0 %3506  ;;  %v2700_v56 = vpop.permute.xlu1 %2699 }
 0x361   : > { %3572 = vst.msk [vmem:[#allocation2 + $0xf8] sm:$0xff] %vm3540_vm1, %v3507_v49  ;;  %v6507_v49 = vld [vmem:[%s4622_s20 + $0xab] sm:$0xff] }
 0x362   : > { %2782 = vst.msk [vmem:[#allocation2 + $0x70] sm:$0xff] %vm2767_vm13, %v2700_v56  ;;  %2721 = vrot.lane.b32.xlu0 %v6443_v44, %s4578_s7  ;;  %3271 = vrot.lane.b32.xlu1 %v6446_v61, %s4581_s10 }
 0x364   : > { %v2925_v17 = vpop.permute.xlu0 %2924  ;;  %v3475_v6 = vpop.permute.xlu1 %3474 }
 0x365   : > { %2991 = vst.msk [vmem:[#allocation2 + $0xf0] sm:$0xff] %vm2960_vm14, %v2925_v17 }
 0x366   : > { %3556 = vst.msk [vmem:[#allocation2 + $0x78] sm:$0xff] %vm3540_vm1, %v3475_v6  ;;  %3496 = vrot.lane.b32.xlu0 %v4419_v57, %s4582_s11  ;;  %2689 = vrot.lane.b32.xlu1 %v6456_v51, %s4578_s7 }
 0x368   : > { %v2893_v32 = vpop.permute.xlu0 %2892  ;;  %v3119_v19 = vpop.permute.xlu1 %3118  ;;  %v3606_v12 = vld [vmem:[#allocation2 + $0xf8] sm:$0xff] }
 0x369   : > { %2975 = vst.msk [vmem:[#allocation2 + $0x70] sm:$0xff] %vm2960_vm14, %v2893_v32  ;;  %4464 = vmatprep.subr.msk.mxu0 %vm3607_vm2, %v3606_v12  ;;  %4500 = vmatprep.subr.msk.mxu1 %vm3607_vm2, %v3606_v12 }
 0x36a   : > { %3185 = vst.msk [vmem:[#allocation2 + $0xf0] sm:$0xff] %vm3154_vm15, %v3119_v19  ;;  %2914 = vrot.lane.b32.xlu0 %v6113_v41, %s4579_s8  ;;  %3464 = vrot.lane.b32.xlu1 %v6062_v43, %s4582_s11  ;;  %v6480_v43 = vld [vmem:[%s4622_s20 + $0x168] sm:$0xff]  ;;  %v4338_v41 = vld [vmem:[%s4622_s20 + $0xf8] sm:$0xff] }
 0x36c   : > { %v2537_v31 = vpop.permute.xlu0 %2536  ;;  %v3087_v15 = vpop.permute.xlu1 %3086 }
 0x36d   : > { %v3590_v30 = vld [vmem:[#allocation2 + $0x78] sm:$0xff]  ;;  %2604 = vst.msk [vmem:[#allocation2 + $0xe8] sm:$0xff] %vm2574_vm12, %v2537_v31 }
 0x36e   : > { %3169 = vst.msk [vmem:[#allocation2 + $0x70] sm:$0xff] %vm3154_vm15, %v3087_v15  ;;  %4465 = vmatpush3.xpose.msk.msra.mxu0 %vm3607_vm2, %v3590_v30  ;;  %4516 = vmatpush3.xpose.msk.msra.mxu1 %vm3607_vm2, %v3590_v30  ;;  %v6550_v15 = vld [vmem:[%s4622_s20 + $0x15b] sm:$0xff] }
 0x36f   : > { %2882 = vrot.lane.b32.xlu0 %v6017_v39, %s4579_s8  ;;  %3108 = vrot.lane.b32.xlu1 %v6122_v0, %s4580_s9  ;;  %v6489_v39 = vld [vmem:[%s4622_s20 + $0xa8] sm:$0xff] }
 0x370   : > { %v3312_v55 = vpop.permute.xlu0 %3311  ;;  %v2505_v50 = vpop.permute.xlu1 %2504 }
 0x371   : > { %3378 = vst.msk [vmem:[#allocation2 + $0xf0] sm:$0xff] %vm3347_vm0, %v3312_v55  ;;  %v6559_v55 = vld [vmem:[%s4622_s20 + $0x9b] sm:$0xff] }
 0x372   : > { %2588 = vst.msk [vmem:[#allocation2 + $0x68] sm:$0xff] %vm2574_vm12, %v2505_v50 }
 0x373   : > { %2526 = vrot.lane.b32.xlu0 %v6480_v43, %s4577_s6  ;;  %3076 = vrot.lane.b32.xlu1 %v4338_v41, %s4580_s9 }
 0x374   : > { %v2730_v24 = vpop.permute.xlu0 %2729  ;;  %v3280_v0 = vpop.permute.xlu1 %3279 }
 0x375   : > { %2797 = vst.msk [vmem:[#allocation2 + $0xe8] sm:$0xff] %vm2767_vm13, %v2730_v24 }
 0x376   : > { %3362 = vst.msk [vmem:[#allocation2 + $0x70] sm:$0xff] %vm3347_vm0, %v3280_v0 }
 0x377   : > { %3301 = vrot.lane.b32.xlu0 %v6131_v29, %s4581_s10  ;;  %2494 = vrot.lane.b32.xlu1 %v6489_v39, %s4577_s6 }
 0x378   : > { %v3505_v59 = vpop.permute.xlu0 %3504  ;;  %v2698_v7 = vpop.permute.xlu1 %2697 }
 0x379   : > { %3571 = vst.msk [vmem:[#allocation2 + $0xf0] sm:$0xff] %vm3540_vm1, %v3505_v59 }
 0x37a   : > { %2781 = vst.msk [vmem:[#allocation2 + $0x68] sm:$0xff] %vm2767_vm13, %v2698_v7 }
 0x37b   : > { %2719 = vrot.lane.b32.xlu0 %v6498_v48, %s4578_s7  ;;  %3269 = vrot.lane.b32.xlu1 %v6140_v8, %s4581_s10 }
 0x37c   : > { %v2923_v29 = vpop.permute.xlu0 %2922  ;;  %v3473_v56 = vpop.permute.xlu1 %3472 }
 0x37d   : > { %2990 = vst.msk [vmem:[#allocation2 + $0xe8] sm:$0xff] %vm2960_vm14, %v2923_v29 }
 0x37e   : > { %3555 = vst.msk [vmem:[#allocation2 + $0x70] sm:$0xff] %vm3540_vm1, %v3473_v56 }
 0x37f   : > { %3494 = vrot.lane.b32.xlu0 %v6143_v47, %s4582_s11  ;;  %2687 = vrot.lane.b32.xlu1 %v6507_v49, %s4578_s7 }
 0x380   : > { %v2891_v57 = vpop.permute.xlu0 %2890  ;;  %v3117_v17 = vpop.permute.xlu1 %3116  ;;  %v3605_v6 = vld [vmem:[#allocation2 + $0xf0] sm:$0xff] }
 0x381   : > { %2974 = vst.msk [vmem:[#allocation2 + $0x68] sm:$0xff] %vm2960_vm14, %v2891_v57  ;;  %4466 = vmatprep.subr.msk.mxu0 %vm3607_vm2, %v3605_v6  ;;  %4501 = vmatprep.subr.msk.mxu1 %vm3607_vm2, %v3605_v6 }
 0x382   : > { %3184 = vst.msk [vmem:[#allocation2 + $0xe8] sm:$0xff] %vm3154_vm15, %v3117_v17  ;;  %v6596_v17 = vld [vmem:[%s4622_s20 + $0x90] sm:$0xff] }
 0x383   : > { %2912 = vrot.lane.b32.xlu0 %v6110_v40, %s4579_s8  ;;  %3462 = vrot.lane.b32.xlu1 %v6053_v18, %s4582_s11  ;;  %v6532_v18 = vld [vmem:[%s4622_s20 + $0x158] sm:$0xff]  ;;  %v4337_v40 = vld [vmem:[%s4622_s20 + $0xf0] sm:$0xff] }
 0x384   : > { %v2535_v8 = vpop.permute.xlu0 %2534  ;;  %v3085_v47 = vpop.permute.xlu1 %3084 }
 0x385   : > { %v3589_v32 = vld [vmem:[#allocation2 + $0x70] sm:$0xff]  ;;  %2603 = vst.msk [vmem:[#allocation2 + $0xe0] sm:$0xff] %vm2574_vm12, %v2535_v8 }
 0x386   : > { %3168 = vst.msk [vmem:[#allocation2 + $0x68] sm:$0xff] %vm3154_vm15, %v3085_v47  ;;  %4467 = vmatpush3.xpose.msk.msra.mxu0 %vm3607_vm2, %v3589_v32  ;;  %4517 = vmatpush3.xpose.msk.msra.mxu1 %vm3607_vm2, %v3589_v32  ;;  %v6605_v8 = vld [vmem:[%s4622_s20 + $0x153] sm:$0xff] }
 0x387   : > { %2880 = vrot.lane.b32.xlu0 %v6014_v38, %s4579_s8  ;;  %3106 = vrot.lane.b32.xlu1 %v6158_v4, %s4580_s9  ;;  %v6541_v38 = vld [vmem:[%s4622_s20 + $0x98] sm:$0xff] }
 0x388   : > { %v3310_v19 = vpop.permute.xlu0 %3309  ;;  %v2503_v12 = vpop.permute.xlu1 %2502 }
 0x389   : > { %3377 = vst.msk [vmem:[#allocation2 + $0xe8] sm:$0xff] %vm3347_vm0, %v3310_v19 }
 0x38a   : > { %2587 = vst.msk [vmem:[#allocation2 + $0x60] sm:$0xff] %vm2574_vm12, %v2503_v12  ;;  %v4400_v12 = vld [vmem:[%s4622_s20 + $0xe6] sm:$0xff] }
 0x38b   : > { %2524 = vrot.lane.b32.xlu0 %v6532_v18, %s4577_s6  ;;  %3074 = vrot.lane.b32.xlu1 %v4337_v40, %s4580_s9  ;;  %v6614_v40 = vld [vmem:[%s4622_s20 + $0x93] sm:$0xff] }
 0x38c   : > { %v2728_v31 = vpop.permute.xlu0 %2727  ;;  %v3278_v4 = vpop.permute.xlu1 %3277 }
 0x38d   : > { %2796 = vst.msk [vmem:[#allocation2 + $0xe0] sm:$0xff] %vm2767_vm13, %v2728_v31 }
 0x38e   : > { %3361 = vst.msk [vmem:[#allocation2 + $0x68] sm:$0xff] %vm3347_vm0, %v3278_v4 }
 0x38f   : > { %3299 = vrot.lane.b32.xlu0 %v6173_v34, %s4581_s10  ;;  %2492 = vrot.lane.b32.xlu1 %v6541_v38, %s4577_s6 }
 0x390   : > { %v3503_v30 = vpop.permute.xlu0 %3502  ;;  %v2696_v41 = vpop.permute.xlu1 %2695 }
 0x391   : > { %3570 = vst.msk [vmem:[#allocation2 + $0xe8] sm:$0xff] %vm3540_vm1, %v3503_v30 }
 0x392   : > { %2780 = vst.msk [vmem:[#allocation2 + $0x60] sm:$0xff] %vm2767_vm13, %v2696_v41 }
 0x393   : > { %2717 = vrot.lane.b32.xlu0 %v6550_v15, %s4578_s7  ;;  %3267 = vrot.lane.b32.xlu1 %v6186_v13, %s4581_s10  ;;  %v6576_v13 = vld [vmem:[%s4622_s20 + $0x9e] sm:$0xff] }
 0x394   : > { %v2921_v34 = vpop.permute.xlu0 %2920  ;;  %v3471_v50 = vpop.permute.xlu1 %3470 }
 0x395   : > { %2989 = vst.msk [vmem:[#allocation2 + $0xe0] sm:$0xff] %vm2960_vm14, %v2921_v34 }
 0x396   : > { %3554 = vst.msk [vmem:[#allocation2 + $0x68] sm:$0xff] %vm3540_vm1, %v3471_v50  ;;  %v4335_v50 = vld [vmem:[%s4622_s20 + $0xd8] sm:$0xff] }
 0x397   : > { %3492 = vrot.lane.b32.xlu0 %v6194_v9, %s4582_s11  ;;  %2685 = vrot.lane.b32.xlu1 %v6559_v55, %s4578_s7 }
 0x398   : > { %v2889_v24 = vpop.permute.xlu0 %2888  ;;  %v3115_v0 = vpop.permute.xlu1 %3114  ;;  %v3604_v59 = vld [vmem:[#allocation2 + $0xe8] sm:$0xff] }
 0x399   : > { %2973 = vst.msk [vmem:[#allocation2 + $0x60] sm:$0xff] %vm2960_vm14, %v2889_v24  ;;  %4468 = vmatprep.subr.msk.mxu0 %vm3607_vm2, %v3604_v59  ;;  %4502 = vmatprep.subr.msk.mxu1 %vm3607_vm2, %v3604_v59  ;;  %v4238_v59 = vld [vmem:[%s4622_s20 + $0x80] sm:$0xff] }
 0x39a   : > { %3183 = vst.msk [vmem:[#allocation2 + $0xe0] sm:$0xff] %vm3154_vm15, %v3115_v0 }
 0x39b   : > { %2910 = vrot.lane.b32.xlu0 %v6101_v36, %s4579_s8  ;;  %3460 = vrot.lane.b32.xlu1 %v6050_v11, %s4582_s11  ;;  %v6587_v11 = vld [vmem:[%s4622_s20 + $0x150] sm:$0xff]  ;;  %v4336_v36 = vld [vmem:[%s4622_s20 + $0xe0] sm:$0xff] }
 0x39c   : > { %v2533_v9 = vpop.permute.xlu0 %2532  ;;  %v3083_v7 = vpop.permute.xlu1 %3082 }
 0x39d   : > { %v3588_v29 = vld [vmem:[#allocation2 + $0x68] sm:$0xff]  ;;  %2602 = vst.msk [vmem:[#allocation2 + $0xd8] sm:$0xff] %vm2574_vm12, %v2533_v9 }
 0x39e   : > { %3167 = vst.msk [vmem:[#allocation2 + $0x60] sm:$0xff] %vm3154_vm15, %v3083_v7  ;;  %4469 = vmatpush3.xpose.msk.msra.mxu0 %vm3607_vm2, %v3588_v29  ;;  %4518 = vmatpush3.xpose.msk.msra.mxu1 %vm3607_vm2, %v3588_v29 }
 0x39f   : > { %2878 = vrot.lane.b32.xlu0 %v6576_v13, %s4579_s8  ;;  %3104 = vrot.lane.b32.xlu1 %v6209_v20, %s4580_s9 }
 0x3a0   : > { %v3308_v56 = vpop.permute.xlu0 %3307  ;;  %v2501_v57 = vpop.permute.xlu1 %2500 }
 0x3a1   : > { %3376 = vst.msk [vmem:[#allocation2 + $0xe0] sm:$0xff] %vm3347_vm0, %v3308_v56 }
 0x3a2   : > { %2586 = vst.msk [vmem:[#allocation2 + $0x58] sm:$0xff] %vm2574_vm12, %v2501_v57 }
 0x3a3   : > { %2522 = vrot.lane.b32.xlu0 %v6587_v11, %s4577_s6  ;;  %3072 = vrot.lane.b32.xlu1 %v4336_v36, %s4580_s9  ;;  %v4270_v36 = vld [vmem:[%s4622_s20 + $0x83] sm:$0xff] }
 0x3a4   : > { %v2726_v6 = vpop.permute.xlu0 %2725  ;;  %v3276_v20 = vpop.permute.xlu1 %3275 }
 0x3a5   : > { %2795 = vst.msk [vmem:[#allocation2 + $0xd8] sm:$0xff] %vm2767_vm13, %v2726_v6  ;;  %v4399_v6 = vld [vmem:[%s4622_s20 + $0xde] sm:$0xff] }
 0x3a6   : > { %3360 = vst.msk [vmem:[#allocation2 + $0x60] sm:$0xff] %vm3347_vm0, %v3276_v20 }
 0x3a7   : > { %3297 = vrot.lane.b32.xlu0 %v6224_v22, %s4581_s10  ;;  %2490 = vrot.lane.b32.xlu1 %v6596_v17, %s4577_s6 }
 0x3a8   : > { %v3501_v47 = vpop.permute.xlu0 %3500  ;;  %v2694_v32 = vpop.permute.xlu1 %2693 }
 0x3a9   : > { %3569 = vst.msk [vmem:[#allocation2 + $0xe0] sm:$0xff] %vm3540_vm1, %v3501_v47 }
 0x3aa   : > { %2779 = vst.msk [vmem:[#allocation2 + $0x58] sm:$0xff] %vm2767_vm13, %v2694_v32 }
 0x3ab   : > { %2715 = vrot.lane.b32.xlu0 %v6605_v8, %s4578_s7  ;;  %3265 = vrot.lane.b32.xlu1 %v6237_v14, %s4581_s10  ;;  %v6631_v14 = vld [vmem:[%s4622_s20 + $0x96] sm:$0xff] }
 0x3ac   : > { %v2919_v22 = vpop.permute.xlu0 %2918  ;;  %v3469_v19 = vpop.permute.xlu1 %3468 }
 0x3ad   : > { %2988 = vst.msk [vmem:[#allocation2 + $0xd8] sm:$0xff] %vm2960_vm14, %v2919_v22 }
 0x3ae   : > { %3553 = vst.msk [vmem:[#allocation2 + $0x60] sm:$0xff] %vm3540_vm1, %v3469_v19  ;;  %v4253_v19 = vld [vmem:[%s4622_s20 + $0x138] sm:$0xff] }
 0x3af   : > { %3490 = vrot.lane.b32.xlu0 %v6245_v46, %s4582_s11  ;;  %2683 = vrot.lane.b32.xlu1 %v6614_v40, %s4578_s7 }
 0x3b0   : > { %v2887_v31 = vpop.permute.xlu0 %2886  ;;  %v3113_v4 = vpop.permute.xlu1 %3112  ;;  %v3603_v30 = vld [vmem:[#allocation2 + $0xe0] sm:$0xff] }
 0x3b1   : > { %2972 = vst.msk [vmem:[#allocation2 + $0x58] sm:$0xff] %vm2960_vm14, %v2887_v31  ;;  %4470 = vmatprep.subr.msk.mxu0 %vm3607_vm2, %v3603_v30  ;;  %4503 = vmatprep.subr.msk.mxu1 %vm3607_vm2, %v3603_v30 }
 0x3b2   : > { %3182 = vst.msk [vmem:[#allocation2 + $0xd8] sm:$0xff] %vm3154_vm15, %v3113_v4  ;;  %v4237_v4 = vld [vmem:[%s4622_s20 + $0x78] sm:$0xff] }
 0x3b3   : > { %2908 = vrot.lane.b32.xlu0 %v6098_v33, %s4579_s8  ;;  %3458 = vrot.lane.b32.xlu1 %v4400_v12, %s4582_s11  ;;  %v4254_v33 = vld [vmem:[%s4622_s20 + $0x140] sm:$0xff] }
 0x3b4   : > { %v2531_v46 = vpop.permute.xlu0 %2530  ;;  %v3081_v41 = vpop.permute.xlu1 %3080 }
 0x3b5   : > { %v3587_v34 = vld [vmem:[#allocation2 + $0x60] sm:$0xff]  ;;  %2601 = vst.msk [vmem:[#allocation2 + $0xd0] sm:$0xff] %vm2574_vm12, %v2531_v46 }
 0x3b6   : > { %3166 = vst.msk [vmem:[#allocation2 + $0x58] sm:$0xff] %vm3154_vm15, %v3081_v41  ;;  %4471 = vmatpush3.xpose.msk.msra.mxu0 %vm3607_vm2, %v3587_v34  ;;  %4519 = vmatpush3.xpose.msk.msra.mxu1 %vm3607_vm2, %v3587_v34 }
 0x3b7   : > { %2876 = vrot.lane.b32.xlu0 %v6631_v14, %s4579_s8  ;;  %3102 = vrot.lane.b32.xlu1 %v6260_v5, %s4580_s9 }
 0x3b8   : > { %v3306_v24 = vpop.permute.xlu0 %3305  ;;  %v2499_v0 = vpop.permute.xlu1 %2498 }
 0x3b9   : > { %3375 = vst.msk [vmem:[#allocation2 + $0xd8] sm:$0xff] %vm3347_vm0, %v3306_v24 }
 0x3ba   : > { %2585 = vst.msk [vmem:[#allocation2 + $0x50] sm:$0xff] %vm2574_vm12, %v2499_v0 }
 0x3bb   : > { %2520 = vrot.lane.b32.xlu0 %v4254_v33, %s4577_s6  ;;  %3070 = vrot.lane.b32.xlu1 %v4335_v50, %s4580_s9  ;;  %v4398_v50 = vld [vmem:[%s4622_s20 + $0xce] sm:$0xff] }
 0x3bc   : > { %v2724_v9 = vpop.permute.xlu0 %2723  ;;  %v3274_v7 = vpop.permute.xlu1 %3273 }
 0x3bd   : > { %2794 = vst.msk [vmem:[#allocation2 + $0xd0] sm:$0xff] %vm2767_vm13, %v2724_v9 }
 0x3be   : > { %3359 = vst.msk [vmem:[#allocation2 + $0x58] sm:$0xff] %vm3347_vm0, %v3274_v7  ;;  %v4252_v7 = vld [vmem:[%s4622_s20 + $0x128] sm:$0xff] }
 0x3bf   : > { %3295 = vrot.lane.b32.xlu0 %v6275_v60, %s4581_s10  ;;  %2488 = vrot.lane.b32.xlu1 %v4238_v59, %s4577_s6  ;;  %v4318_v60 = vld [vmem:[%s4622_s20 + $0x146] sm:$0xff] }
 0x3c0   : > { %v3499_v5 = vpop.permute.xlu0 %3498  ;;  %v2692_v29 = vpop.permute.xlu1 %2691 }
 0x3c1   : > { %3568 = vst.msk [vmem:[#allocation2 + $0xd8] sm:$0xff] %vm3540_vm1, %v3499_v5 }
 0x3c2   : > { %2778 = vst.msk [vmem:[#allocation2 + $0x50] sm:$0xff] %vm2767_vm13, %v2692_v29 }
 0x3c3   : > { %2713 = vrot.lane.b32.xlu0 %v6176_v35, %s4578_s7  ;;  %3263 = vrot.lane.b32.xlu1 %v6288_v16, %s4581_s10  ;;  %v4302_v16 = vld [vmem:[%s4622_s20 + $0x86] sm:$0xff] }
 0x3c4   : > { %v2917_v56 = vpop.permute.xlu0 %2916  ;;  %v3467_v57 = vpop.permute.xlu1 %3466 }
 0x3c5   : > { %2987 = vst.msk [vmem:[#allocation2 + $0xd0] sm:$0xff] %vm2960_vm14, %v2917_v56 }
 0x3c6   : > { %3552 = vst.msk [vmem:[#allocation2 + $0x58] sm:$0xff] %vm3540_vm1, %v3467_v57 }
 0x3c7   : > { %3488 = vrot.lane.b32.xlu0 %v6296_v10, %s4582_s11  ;;  %2681 = vrot.lane.b32.xlu1 %v4270_v36, %s4578_s7  ;;  %v4236_v36 = vld [vmem:[%s4622_s20 + $0x68] sm:$0xff] }
 0x3c8   : > { %v2885_v20 = vpop.permute.xlu0 %2884  ;;  %v3111_v35 = vpop.permute.xlu1 %3110  ;;  %v3602_v47 = vld [vmem:[#allocation2 + $0xd8] sm:$0xff] }
 0x3c9   : > { %2971 = vst.msk [vmem:[#allocation2 + $0x50] sm:$0xff] %vm2960_vm14, %v2885_v20  ;;  %4472 = vmatprep.subr.msk.mxu0 %vm3607_vm2, %v3602_v47  ;;  %4504 = vmatprep.subr.msk.mxu1 %vm3607_vm2, %v3602_v47 }
 0x3ca   : > { %3181 = vst.msk [vmem:[#allocation2 + $0xd0] sm:$0xff] %vm3154_vm15, %v3111_v35  ;;  %v4397_v35 = vld [vmem:[%s4622_s20 + $0xc6] sm:$0xff] }
 0x3cb   : > { %2906 = vrot.lane.b32.xlu0 %v4318_v60, %s4579_s8  ;;  %3456 = vrot.lane.b32.xlu1 %v4399_v6, %s4582_s11 }
 0x3cc   : > { %v2529_v10 = vpop.permute.xlu0 %2528  ;;  %v3079_v32 = vpop.permute.xlu1 %3078 }
 0x3cd   : > { %v3586_v22 = vld [vmem:[#allocation2 + $0x58] sm:$0xff]  ;;  %2600 = vst.msk [vmem:[#allocation2 + $0xc8] sm:$0xff] %vm2574_vm12, %v2529_v10 }
 0x3ce   : > { %3165 = vst.msk [vmem:[#allocation2 + $0x50] sm:$0xff] %vm3154_vm15, %v3079_v32  ;;  %4473 = vmatpush3.xpose.msk.msra.mxu0 %vm3607_vm2, %v3586_v22  ;;  %4520 = vmatpush3.xpose.msk.msra.mxu1 %vm3607_vm2, %v3586_v22  ;;  %v4251_v22 = vld [vmem:[%s4622_s20 + $0x120] sm:$0xff] }
 0x3cf   : > { %2874 = vrot.lane.b32.xlu0 %v4302_v16, %s4579_s8  ;;  %3100 = vrot.lane.b32.xlu1 %v6311_v27, %s4580_s9 }
 0x3d0   : > { %v3304_v12 = vpop.permute.xlu0 %3303  ;;  %v2497_v31 = vpop.permute.xlu1 %2496 }
 0x3d1   : > { %3374 = vst.msk [vmem:[#allocation2 + $0xd0] sm:$0xff] %vm3347_vm0, %v3304_v12 }
 0x3d2   : > { %2584 = vst.msk [vmem:[#allocation2 + $0x48] sm:$0xff] %vm2574_vm12, %v2497_v31  ;;  %v4235_v31 = vld [vmem:[%s4622_s20 + $0x60] sm:$0xff] }
 0x3d3   : > { %2518 = vrot.lane.b32.xlu0 %v4253_v19, %s4577_s6  ;;  %3068 = vrot.lane.b32.xlu1 %v6321_v58, %s4580_s9  ;;  %v4269_v58 = vld [vmem:[%s4622_s20 + $0x7b] sm:$0xff] }
 0x3d4   : > { %v2722_v30 = vpop.permute.xlu0 %2721  ;;  %v3272_v46 = vpop.permute.xlu1 %3271 }
 0x3d5   : > { %2793 = vst.msk [vmem:[#allocation2 + $0xc8] sm:$0xff] %vm2767_vm13, %v2722_v30 }
 0x3d6   : > { %3358 = vst.msk [vmem:[#allocation2 + $0x50] sm:$0xff] %vm3347_vm0, %v3272_v46 }
 0x3d7   : > { %3293 = vrot.lane.b32.xlu0 %v6329_v62, %s4581_s10  ;;  %2486 = vrot.lane.b32.xlu1 %v4237_v4, %s4577_s6  ;;  %v4317_v62 = vld [vmem:[%s4622_s20 + $0x13e] sm:$0xff] }
 0x3d8   : > { %v3497_v27 = vpop.permute.xlu0 %3496  ;;  %v2690_v41 = vpop.permute.xlu1 %2689 }
 0x3d9   : > { %3567 = vst.msk [vmem:[#allocation2 + $0xd0] sm:$0xff] %vm3540_vm1, %v3497_v27  ;;  %v4267_v27 = vld [vmem:[%s4622_s20 + $0x63] sm:$0xff] }
 0x3da   : > { %2777 = vst.msk [vmem:[#allocation2 + $0x48] sm:$0xff] %vm2767_vm13, %v2690_v41 }
 0x3db   : > { %2711 = vrot.lane.b32.xlu0 %v6227_v23, %s4578_s7  ;;  %3261 = vrot.lane.b32.xlu1 %v6342_v54, %s4581_s10  ;;  %v4301_v54 = vld [vmem:[%s4622_s20 + $0x7e] sm:$0xff] }
 0x3dc   : > { %v2915_v34 = vpop.permute.xlu0 %2914  ;;  %v3465_v33 = vpop.permute.xlu1 %3464 }
 0x3dd   : > { %2986 = vst.msk [vmem:[#allocation2 + $0xc8] sm:$0xff] %vm2960_vm14, %v2915_v34  ;;  %v4396_v34 = vld [vmem:[%s4622_s20 + $0xb6] sm:$0xff] }
 0x3de   : > { %3551 = vst.msk [vmem:[#allocation2 + $0x50] sm:$0xff] %vm3540_vm1, %v3465_v33 }
 0x3df   : > { %3486 = vrot.lane.b32.xlu0 %v6350_v2, %s4582_s11  ;;  %2679 = vrot.lane.b32.xlu1 %v4269_v58, %s4578_s7  ;;  %v4315_v58 = vld [vmem:[%s4622_s20 + $0x126] sm:$0xff] }
 0x3e0   : > { %v3601_v0 = vld [vmem:[#allocation2 + $0xd0] sm:$0xff] }
 0x3e1   : > { %v2883_v24 = vpop.permute.xlu0 %2882  ;;  %v3109_v23 = vpop.permute.xlu1 %3108  ;;  %4474 = vmatprep.subr.msk.mxu0 %vm3607_vm2, %v3601_v0  ;;  %4505 = vmatprep.subr.msk.mxu1 %vm3607_vm2, %v3601_v0 }
 0x3e2   : > { %2970 = vst.msk [vmem:[#allocation2 + $0x48] sm:$0xff] %vm2960_vm14, %v2883_v24 }
 0x3e3   : > { %3180 = vst.msk [vmem:[#allocation2 + $0xc8] sm:$0xff] %vm3154_vm15, %v3109_v23  ;;  %2904 = vrot.lane.b32.xlu0 %v4317_v62, %s4579_s8  ;;  %3454 = vrot.lane.b32.xlu1 %v4398_v50, %s4582_s11 }
 0x3e5   : > { %v2527_v2 = vpop.permute.xlu0 %2526  ;;  %v3077_v59 = vpop.permute.xlu1 %3076  ;;  %v3585_v9 = vld [vmem:[#allocation2 + $0x50] sm:$0xff] }
 0x3e6   : > { %2599 = vst.msk [vmem:[#allocation2 + $0xc0] sm:$0xff] %vm2574_vm12, %v2527_v2  ;;  %4475 = vmatpush3.xpose.msk.msra.mxu0 %vm3607_vm2, %v3585_v9  ;;  %4521 = vmatpush3.xpose.msk.msra.mxu1 %vm3607_vm2, %v3585_v9  ;;  %v4234_v2 = vld [vmem:[%s4622_s20 + $0x50] sm:$0xff] }
 0x3e7   : > { %3164 = vst.msk [vmem:[#allocation2 + $0x48] sm:$0xff] %vm3154_vm15, %v3077_v59  ;;  %2872 = vrot.lane.b32.xlu0 %v4301_v54, %s4579_s8  ;;  %3098 = vrot.lane.b32.xlu1 %v6365_v28, %s4580_s9 }
 0x3e9   : > { %v3302_v5 = vpop.permute.xlu0 %3301  ;;  %v2495_v29 = vpop.permute.xlu1 %2494 }
 0x3ea   : > { %3373 = vst.msk [vmem:[#allocation2 + $0xc8] sm:$0xff] %vm3347_vm0, %v3302_v5 }
 0x3eb   : > { %2583 = vst.msk [vmem:[#allocation2 + $0x40] sm:$0xff] %vm2574_vm12, %v2495_v29  ;;  %2516 = vrot.lane.b32.xlu0 %v4252_v7, %s4577_s6  ;;  %3066 = vrot.lane.b32.xlu1 %v6378_v45, %s4580_s9  ;;  %v4268_v45 = vld [vmem:[%s4622_s20 + $0x6b] sm:$0xff]  ;;  %v4266_v7 = vld [vmem:[%s4622_s20 + $0x53] sm:$0xff] }
 0x3ec   : > { %v4314_v29 = vld [vmem:[%s4622_s20 + $0x116] sm:$0xff] }
 0x3ed   : > { %v2720_v56 = vpop.permute.xlu0 %2719  ;;  %v3270_v57 = vpop.permute.xlu1 %3269 }
 0x3ee   : > { %2792 = vst.msk [vmem:[#allocation2 + $0xc0] sm:$0xff] %vm2767_vm13, %v2720_v56 }
 0x3ef   : > { %3357 = vst.msk [vmem:[#allocation2 + $0x48] sm:$0xff] %vm3347_vm0, %v3270_v57  ;;  %3291 = vrot.lane.b32.xlu0 %v6386_v21, %s4581_s10  ;;  %2484 = vrot.lane.b32.xlu1 %v4236_v36, %s4577_s6  ;;  %v4316_v21 = vld [vmem:[%s4622_s20 + $0x12e] sm:$0xff] }
 0x3f0   : > { %v4395_v36 = vld [vmem:[%s4622_s20 + $0xae] sm:$0xff] }
 0x3f1   : > { %v3495_v28 = vpop.permute.xlu0 %3494  ;;  %v2688_v60 = vpop.permute.xlu1 %2687 }
 0x3f2   : > { %3566 = vst.msk [vmem:[#allocation2 + $0xc8] sm:$0xff] %vm3540_vm1, %v3495_v28 }
 0x3f3   : > { %2776 = vst.msk [vmem:[#allocation2 + $0x40] sm:$0xff] %vm2767_vm13, %v2688_v60  ;;  %2709 = vrot.lane.b32.xlu0 %v6278_v3, %s4578_s7  ;;  %3259 = vrot.lane.b32.xlu1 %v6399_v26, %s4581_s10  ;;  %v4300_v26 = vld [vmem:[%s4622_s20 + $0x6e] sm:$0xff] }
 0x3f5   : > { %v2913_v6 = vpop.permute.xlu0 %2912  ;;  %v3463_v20 = vpop.permute.xlu1 %3462 }
 0x3f6   : > { %2985 = vst.msk [vmem:[#allocation2 + $0xc0] sm:$0xff] %vm2960_vm14, %v2913_v6 }
 0x3f7   : > { %3550 = vst.msk [vmem:[#allocation2 + $0x48] sm:$0xff] %vm3540_vm1, %v3463_v20  ;;  %3484 = vrot.lane.b32.xlu0 %v6407_v37, %s4582_s11  ;;  %2677 = vrot.lane.b32.xlu1 %v4268_v45, %s4578_s7 }
 0x3f9   : > { %v2881_v47 = vpop.permute.xlu0 %2880  ;;  %v3107_v3 = vpop.permute.xlu1 %3106  ;;  %v3600_v16 = vld [vmem:[#allocation2 + $0xc8] sm:$0xff] }
 0x3fa   : > { %2969 = vst.msk [vmem:[#allocation2 + $0x40] sm:$0xff] %vm2960_vm14, %v2881_v47  ;;  %4476 = vmatprep.subr.msk.mxu0 %vm3607_vm2, %v3600_v16  ;;  %4506 = vmatprep.subr.msk.mxu1 %vm3607_vm2, %v3600_v16 }
 0x3fb   : > { %3179 = vst.msk [vmem:[#allocation2 + $0xc0] sm:$0xff] %vm3154_vm15, %v3107_v3  ;;  %2902 = vrot.lane.b32.xlu0 %v4316_v21, %s4579_s8  ;;  %3452 = vrot.lane.b32.xlu1 %v4397_v35, %s4582_s11  ;;  %v4313_v3 = vld [vmem:[%s4622_s20 + $0x10e] sm:$0xff] }
 0x3fd   : > { %v2525_v37 = vpop.permute.xlu0 %2524  ;;  %v3075_v10 = vpop.permute.xlu1 %3074 }
 0x3fe   : > { %v3584_v32 = vld [vmem:[#allocation2 + $0x48] sm:$0xff]  ;;  %2598 = vst.msk [vmem:[#allocation2 + $0xb8] sm:$0xff] %vm2574_vm12, %v2525_v37 }
 0x3ff   : > { %3163 = vst.msk [vmem:[#allocation2 + $0x40] sm:$0xff] %vm3154_vm15, %v3075_v10  ;;  %4477 = vmatpush3.xpose.msk.msra.mxu0 %vm3607_vm2, %v3584_v32  ;;  %4522 = vmatpush3.xpose.msk.msra.mxu1 %vm3607_vm2, %v3584_v32 }
 0x400   : > { %2870 = vrot.lane.b32.xlu0 %v4300_v26, %s4579_s8  ;;  %3096 = vrot.lane.b32.xlu1 %v6422_v63, %s4580_s9 }
 0x401   : > { %v3300_v19 = vpop.permute.xlu0 %3299  ;;  %v2493_v12 = vpop.permute.xlu1 %2492 }
 0x402   : > { %3372 = vst.msk [vmem:[#allocation2 + $0xc0] sm:$0xff] %vm3347_vm0, %v3300_v19 }
 0x403   : > { %2582 = vst.msk [vmem:[#allocation2 + $0x38] sm:$0xff] %vm2574_vm12, %v2493_v12  ;;  %v6890_v12 = vld [vmem:[%s7008_s1] sm:$0xff] }
 0x404   : > { %2514 = vrot.lane.b32.xlu0 %v4251_v22, %s4577_s6  ;;  %3064 = vrot.lane.b32.xlu1 %v6435_v25, %s4580_s9  ;;  %v4412_v25 = vld [vmem:[%s4622_s20 + $0x176] sm:$0xff] }
 0x405   : > { %v2718_v4 = vpop.permute.xlu0 %2717  ;;  %v3268_v30 = vpop.permute.xlu1 %3267  ;;  %4496 = vmatprep.mubr.msk.f32.mxu0 %vm3607_vm2, %v6890_v12 }
 0x406   : > { %2791 = vst.msk [vmem:[#allocation2 + $0xb8] sm:$0xff] %vm2767_vm13, %v2718_v4 }
 0x407   : > { %3356 = vst.msk [vmem:[#allocation2 + $0x40] sm:$0xff] %vm3347_vm0, %v3268_v30 }
 0x408   : > { %3289 = vrot.lane.b32.xlu0 %v6443_v44, %s4581_s10  ;;  %2482 = vrot.lane.b32.xlu1 %v4235_v31, %s4577_s6 }
 0x409   : > { %v3493_v63 = vpop.permute.xlu0 %3492  ;;  %v2686_v46 = vpop.permute.xlu1 %2685 }
 0x40a   : > { %3565 = vst.msk [vmem:[#allocation2 + $0xc0] sm:$0xff] %vm3540_vm1, %v3493_v63 }
 0x40b   : > { %2775 = vst.msk [vmem:[#allocation2 + $0x38] sm:$0xff] %vm2767_vm13, %v2686_v46 }
 0x40c   : > { %2707 = vrot.lane.b32.xlu0 %v6332_v52, %s4578_s7  ;;  %3257 = vrot.lane.b32.xlu1 %v6456_v51, %s4581_s10  ;;  %v4299_v51 = vld [vmem:[%s4622_s20 + $0x66] sm:$0xff] }
 0x40d   : > { %v2911_v41 = vpop.permute.xlu0 %2910  ;;  %v3461_v44 = vpop.permute.xlu1 %3460 }
 0x40e   : > { %2984 = vst.msk [vmem:[#allocation2 + $0xb8] sm:$0xff] %vm2960_vm14, %v2911_v41 }
 0x40f   : > { %3549 = vst.msk [vmem:[#allocation2 + $0x40] sm:$0xff] %vm3540_vm1, %v3461_v44 }
 0x410   : > { %3482 = vrot.lane.b32.xlu0 %v4412_v25, %s4582_s11  ;;  %2675 = vrot.lane.b32.xlu1 %v4267_v27, %s4578_s7 }
 0x411   : > { %v2879_v33 = vpop.permute.xlu0 %2878  ;;  %v3105_v52 = vpop.permute.xlu1 %3104  ;;  %v3599_v62 = vld [vmem:[#allocation2 + $0xc0] sm:$0xff] }
 0x412   : > { %2968 = vst.msk [vmem:[#allocation2 + $0x38] sm:$0xff] %vm2960_vm14, %v2879_v33  ;;  %4478 = vmatprep.subr.msk.mxu0 %vm3607_vm2, %v3599_v62  ;;  %4507 = vmatprep.subr.msk.mxu1 %vm3607_vm2, %v3599_v62 }
 0x413   : > { %3178 = vst.msk [vmem:[#allocation2 + $0xb8] sm:$0xff] %vm3154_vm15, %v3105_v52 }
 0x414   : > { %2900 = vrot.lane.b32.xlu0 %v4315_v58, %s4579_s8  ;;  %3450 = vrot.lane.b32.xlu1 %v4396_v34, %s4582_s11 }
 0x415   : > { %v2523_v50 = vpop.permute.xlu0 %2522  ;;  %v3073_v24 = vpop.permute.xlu1 %3072 }
 0x416   : > { %v3583_v23 = vld [vmem:[#allocation2 + $0x40] sm:$0xff]  ;;  %2597 = vst.msk [vmem:[#allocation2 + $0xb0] sm:$0xff] %vm2574_vm12, %v2523_v50 }
 0x417   : > { %3162 = vst.msk [vmem:[#allocation2 + $0x38] sm:$0xff] %vm3154_vm15, %v3073_v24  ;;  %4479 = vmatpush3.xpose.msk.msra.mxu0 %vm3607_vm2, %v3583_v23  ;;  %4523 = vmatpush3.xpose.msk.msra.mxu1 %vm3607_vm2, %v3583_v23 }
 0x418   : > { %2868 = vrot.lane.b32.xlu0 %v4299_v51, %s4579_s8  ;;  %3094 = vrot.lane.b32.xlu1 %v6480_v43, %s4580_s9 }
 0x419   : > { %v3298_v0 = vpop.permute.xlu0 %3297  ;;  %v2491_v54 = vpop.permute.xlu1 %2490 }
 0x41a   : > { %3371 = vst.msk [vmem:[#allocation2 + $0xb8] sm:$0xff] %vm3347_vm0, %v3298_v0 }
 0x41b   : > { %2581 = vst.msk [vmem:[#allocation2 + $0x30] sm:$0xff] %vm2574_vm12, %v2491_v54 }
 0x41c   : > { %2512 = vrot.lane.b32.xlu0 %v6368_v53, %s4577_s6  ;;  %3062 = vrot.lane.b32.xlu1 %v6489_v39, %s4580_s9  ;;  %v4411_v39 = vld [vmem:[%s4622_s20 + $0x16e] sm:$0xff] }
 0x41d   : > { %v2716_v59 = vpop.permute.xlu0 %2715  ;;  %v3266_v9 = vpop.permute.xlu1 %3265 }
 0x41e   : > { %2790 = vst.msk [vmem:[#allocation2 + $0xb0] sm:$0xff] %vm2767_vm13, %v2716_v59 }
 0x41f   : > { %3355 = vst.msk [vmem:[#allocation2 + $0x38] sm:$0xff] %vm3347_vm0, %v3266_v9 }
 0x420   : > { %3287 = vrot.lane.b32.xlu0 %v6498_v48, %s4581_s10  ;;  %2480 = vrot.lane.b32.xlu1 %v4234_v2, %s4577_s6 }
 0x421   : > { %v3491_v43 = vpop.permute.xlu0 %3490  ;;  %v2684_v53 = vpop.permute.xlu1 %2683 }
 0x422   : > { %3564 = vst.msk [vmem:[#allocation2 + $0xb8] sm:$0xff] %vm3540_vm1, %v3491_v43 }
 0x423   : > { %2774 = vst.msk [vmem:[#allocation2 + $0x30] sm:$0xff] %vm2767_vm13, %v2684_v53 }
 0x424   : > { %2705 = vrot.lane.b32.xlu0 %v6389_v42, %s4578_s7  ;;  %3255 = vrot.lane.b32.xlu1 %v6507_v49, %s4581_s10  ;;  %v4298_v49 = vld [vmem:[%s4622_s20 + $0x56] sm:$0xff] }
 0x425   : > { %v2909_v5 = vpop.permute.xlu0 %2908  ;;  %v3459_v48 = vpop.permute.xlu1 %3458 }
 0x426   : > { %2983 = vst.msk [vmem:[#allocation2 + $0xb0] sm:$0xff] %vm2960_vm14, %v2909_v5 }
 0x427   : > { %3548 = vst.msk [vmem:[#allocation2 + $0x38] sm:$0xff] %vm3540_vm1, %v3459_v48 }
 0x428   : > { %3480 = vrot.lane.b32.xlu0 %v4411_v39, %s4582_s11  ;;  %2673 = vrot.lane.b32.xlu1 %v4266_v7, %s4578_s7 }
 0x429   : > { %v2877_v56 = vpop.permute.xlu0 %2876  ;;  %v3103_v42 = vpop.permute.xlu1 %3102  ;;  %v3598_v57 = vld [vmem:[#allocation2 + $0xb8] sm:$0xff] }
 0x42a   : > { %2967 = vst.msk [vmem:[#allocation2 + $0x30] sm:$0xff] %vm2960_vm14, %v2877_v56  ;;  %4480 = vmatprep.subr.msk.mxu0 %vm3607_vm2, %v3598_v57  ;;  %4508 = vmatprep.subr.msk.mxu1 %vm3607_vm2, %v3598_v57 }
 0x42b   : > { %3177 = vst.msk [vmem:[#allocation2 + $0xb0] sm:$0xff] %vm3154_vm15, %v3103_v42 }
 0x42c   : > { %2898 = vrot.lane.b32.xlu0 %v4314_v29, %s4579_s8  ;;  %3448 = vrot.lane.b32.xlu1 %v4395_v36, %s4582_s11 }
 0x42d   : > { %v2521_v28 = vpop.permute.xlu0 %2520  ;;  %v3071_v60 = vpop.permute.xlu1 %3070 }
 0x42e   : > { %v3582_v45 = vld [vmem:[#allocation2 + $0x38] sm:$0xff]  ;;  %2596 = vst.msk [vmem:[#allocation2 + $0xa8] sm:$0xff] %vm2574_vm12, %v2521_v28 }
 0x42f   : > { %3161 = vst.msk [vmem:[#allocation2 + $0x30] sm:$0xff] %vm3154_vm15, %v3071_v60  ;;  %4481 = vmatpush3.xpose.msk.msra.mxu0 %vm3607_vm2, %v3582_v45  ;;  %4524 = vmatpush3.xpose.msk.msra.mxu1 %vm3607_vm2, %v3582_v45 }
 0x430   : > { %2866 = vrot.lane.b32.xlu0 %v4298_v49, %s4579_s8  ;;  %3092 = vrot.lane.b32.xlu1 %v6532_v18, %s4580_s9  ;;  %v4410_v18 = vld [vmem:[%s4622_s20 + $0x15e] sm:$0xff] }
 0x431   : > { %v3296_v6 = vpop.permute.xlu0 %3295  ;;  %v2489_v20 = vpop.permute.xlu1 %2488 }
 0x432   : > { %3370 = vst.msk [vmem:[#allocation2 + $0xb0] sm:$0xff] %vm3347_vm0, %v3296_v6 }
 0x433   : > { %2580 = vst.msk [vmem:[#allocation2 + $0x28] sm:$0xff] %vm2574_vm12, %v2489_v20 }
 0x434   : > { %2510 = vrot.lane.b32.xlu0 %v6425_v1, %s4577_s6  ;;  %3060 = vrot.lane.b32.xlu1 %v6541_v38, %s4580_s9  ;;  %v4265_v38 = vld [vmem:[%s4622_s20 + $0x4b] sm:$0xff] }
 0x435   : > { %v2714_v21 = vpop.permute.xlu0 %2713  ;;  %v3264_v35 = vpop.permute.xlu1 %3263 }
 0x436   : > { %2789 = vst.msk [vmem:[#allocation2 + $0xa8] sm:$0xff] %vm2767_vm13, %v2714_v21 }
 0x437   : > { %3354 = vst.msk [vmem:[#allocation2 + $0x30] sm:$0xff] %vm3347_vm0, %v3264_v35 }
 0x438   : > { %3285 = vrot.lane.b32.xlu0 %v6550_v15, %s4581_s10  ;;  %2703 = vrot.lane.b32.xlu1 %v6446_v61, %s4578_s7  ;;  %v4297_v61 = vld [vmem:[%s4622_s20 + $0x4e] sm:$0xff] }
 0x439   : > { %v3489_v47 = vpop.permute.xlu0 %3488  ;;  %v2682_v1 = vpop.permute.xlu1 %2681 }
 0x43a   : > { %3563 = vst.msk [vmem:[#allocation2 + $0xb0] sm:$0xff] %vm3540_vm1, %v3489_v47 }
 0x43b   : > { %2773 = vst.msk [vmem:[#allocation2 + $0x28] sm:$0xff] %vm2767_vm13, %v2682_v1 }
 0x43c   : > { %3253 = vrot.lane.b32.xlu0 %v6559_v55, %s4581_s10  ;;  %3478 = vrot.lane.b32.xlu1 %v4410_v18, %s4582_s11 }
 0x43d   : > { %v2907_v16 = vpop.permute.xlu0 %2906  ;;  %v3457_v15 = vpop.permute.xlu1 %3456 }
 0x43e   : > { %2982 = vst.msk [vmem:[#allocation2 + $0xa8] sm:$0xff] %vm2960_vm14, %v2907_v16 }
 0x43f   : > { %3547 = vst.msk [vmem:[#allocation2 + $0x30] sm:$0xff] %vm3540_vm1, %v3457_v15 }
 0x440   : > { %2671 = vrot.lane.b32.xlu0 %v4265_v38, %s4578_s7  ;;  %2896 = vrot.lane.b32.xlu1 %v4313_v3, %s4579_s8 }
 0x441   : > { %v2875_v26 = vpop.permute.xlu0 %2874  ;;  %v3101_v37 = vpop.permute.xlu1 %3100  ;;  %v3597_v10 = vld [vmem:[#allocation2 + $0xb0] sm:$0xff] }
 0x442   : > { %2966 = vst.msk [vmem:[#allocation2 + $0x28] sm:$0xff] %vm2960_vm14, %v2875_v26  ;;  %4482 = vmatprep.subr.msk.mxu0 %vm3607_vm2, %v3597_v10  ;;  %4509 = vmatprep.subr.msk.mxu1 %vm3607_vm2, %v3597_v10 }
 0x443   : > { %3176 = vst.msk [vmem:[#allocation2 + $0xa8] sm:$0xff] %vm3154_vm15, %v3101_v37 }
 0x444   : > { %3446 = vrot.lane.b32.xlu0 %v6576_v13, %s4582_s11  ;;  %2864 = vrot.lane.b32.xlu1 %v4297_v61, %s4579_s8 }
 0x445   : > { %v2519_v55 = vpop.permute.xlu0 %2518  ;;  %v3069_v32 = vpop.permute.xlu1 %3068 }
 0x446   : > { %v3581_v22 = vld [vmem:[#allocation2 + $0x30] sm:$0xff]  ;;  %2595 = vst.msk [vmem:[#allocation2 + $0xa0] sm:$0xff] %vm2574_vm12, %v2519_v55 }
 0x447   : > { %3160 = vst.msk [vmem:[#allocation2 + $0x28] sm:$0xff] %vm3154_vm15, %v3069_v32  ;;  %4483 = vmatpush3.xpose.msk.msra.mxu0 %vm3607_vm2, %v3581_v22  ;;  %4525 = vmatpush3.xpose.msk.msra.mxu1 %vm3607_vm2, %v3581_v22 }
 0x448   : > { %3090 = vrot.lane.b32.xlu0 %v6587_v11, %s4580_s9  ;;  %3058 = vrot.lane.b32.xlu1 %v6596_v17, %s4580_s9  ;;  %v4409_v11 = vld [vmem:[%s4622_s20 + $0x156] sm:$0xff] }
 0x449   : > { %v3294_v13 = vpop.permute.xlu0 %3293  ;;  %v2487_v19 = vpop.permute.xlu1 %2486 }
 0x44a   : > { %3369 = vst.msk [vmem:[#allocation2 + $0xa8] sm:$0xff] %vm3347_vm0, %v3294_v13 }
 0x44b   : > { %2579 = vst.msk [vmem:[#allocation2 + $0x20] sm:$0xff] %vm2574_vm12, %v2487_v19 }
 0x44c   : > { %3283 = vrot.lane.b32.xlu0 %v6605_v8, %s4581_s10  ;;  %3251 = vrot.lane.b32.xlu1 %v6614_v40, %s4581_s10  ;;  %v6900_v8 = vld [vmem:[%s7008_s1 + $0x8] sm:$0xff] }
 0x44d   : > { %v2712_v17 = vpop.permute.xlu0 %2711  ;;  %v3262_v31 = vpop.permute.xlu1 %3261  ;;  %4498 = vmatprep.mubr.msk.f32.mxu1 %vm3607_vm2, %v6900_v8 }
 0x44e   : > { %2788 = vst.msk [vmem:[#allocation2 + $0xa0] sm:$0xff] %vm2767_vm13, %v2712_v17 }
 0x44f   : > { %3353 = vst.msk [vmem:[#allocation2 + $0x28] sm:$0xff] %vm3347_vm0, %v3262_v31 }
 0x450   : > { %3476 = vrot.lane.b32.xlu0 %v4409_v11, %s4582_s11  ;;  %3444 = vrot.lane.b32.xlu1 %v6631_v14, %s4582_s11 }
 0x451   : > { %v3487_v40 = vpop.permute.xlu0 %3486  ;;  %v2680_v4 = vpop.permute.xlu1 %2679 }
 0x452   : > { %3562 = vst.msk [vmem:[#allocation2 + $0xa8] sm:$0xff] %vm3540_vm1, %v3487_v40 }
 0x453   : > { %2772 = vst.msk [vmem:[#allocation2 + $0x20] sm:$0xff] %vm2767_vm13, %v2680_v4 }
 0x455   : > { %v2905_v30 = vpop.permute.xlu0 %2904  ;;  %v3455_v63 = vpop.permute.xlu1 %3454 }
 0x456   : > { %2981 = vst.msk [vmem:[#allocation2 + $0xa0] sm:$0xff] %vm2960_vm14, %v2905_v30 }
 0x457   : > { %3546 = vst.msk [vmem:[#allocation2 + $0x28] sm:$0xff] %vm3540_vm1, %v3455_v63 }
 0x459   : > { %v2873_v46 = vpop.permute.xlu0 %2872  ;;  %v3099_v25 = vpop.permute.xlu1 %3098  ;;  %v3596_v27 = vld [vmem:[#allocation2 + $0xa8] sm:$0xff] }
 0x45a   : > { %2965 = vst.msk [vmem:[#allocation2 + $0x20] sm:$0xff] %vm2960_vm14, %v2873_v46  ;;  %4484 = vmatprep.subr.msk.mxu0 %vm3607_vm2, %v3596_v27  ;;  %4510 = vmatprep.subr.msk.mxu1 %vm3607_vm2, %v3596_v27 }
 0x45b   : > { %3175 = vst.msk [vmem:[#allocation2 + $0xa0] sm:$0xff] %vm3154_vm15, %v3099_v25 }
 0x45d   : > { %v2517_v14 = vpop.permute.xlu0 %2516  ;;  %v3067_v41 = vpop.permute.xlu1 %3066 }
 0x45e   : > { %v3580_v44 = vld [vmem:[#allocation2 + $0x28] sm:$0xff]  ;;  %2594 = vst.msk [vmem:[#allocation2 + $0x98] sm:$0xff] %vm2574_vm12, %v2517_v14 }
 0x45f   : > { %3159 = vst.msk [vmem:[#allocation2 + $0x20] sm:$0xff] %vm3154_vm15, %v3067_v41  ;;  %4485 = vmatpush3.xpose.msk.msra.mxu0 %vm3607_vm2, %v3580_v44  ;;  %4526 = vmatpush3.xpose.msk.msra.mxu1 %vm3607_vm2, %v3580_v44 }
 0x461   : > { %v3292_v58 = vpop.permute.xlu0 %3291  ;;  %v2485_v34 = vpop.permute.xlu1 %2484 }
 0x462   : > { %3368 = vst.msk [vmem:[#allocation2 + $0xa0] sm:$0xff] %vm3347_vm0, %v3292_v58 }
 0x463   : > { %2578 = vst.msk [vmem:[#allocation2 + $0x18] sm:$0xff] %vm2574_vm12, %v2485_v34 }
 0x465   : > { %v2710_v33 = vpop.permute.xlu0 %2709  ;;  %v3260_v52 = vpop.permute.xlu1 %3259 }
 0x466   : > { %2787 = vst.msk [vmem:[#allocation2 + $0x98] sm:$0xff] %vm2767_vm13, %v2710_v33 }
 0x467   : > { %3352 = vst.msk [vmem:[#allocation2 + $0x20] sm:$0xff] %vm3347_vm0, %v3260_v52 }
 0x469   : > { %v3485_v62 = vpop.permute.xlu0 %3484  ;;  %v2678_v51 = vpop.permute.xlu1 %2677 }
 0x46a   : > { %3561 = vst.msk [vmem:[#allocation2 + $0xa0] sm:$0xff] %vm3540_vm1, %v3485_v62 }
 0x46b   : > { %2771 = vst.msk [vmem:[#allocation2 + $0x18] sm:$0xff] %vm2767_vm13, %v2678_v51 }
 0x46d   : > { %v2903_v50 = vpop.permute.xlu0 %2902  ;;  %v3453_v24 = vpop.permute.xlu1 %3452 }
 0x46e   : > { %2980 = vst.msk [vmem:[#allocation2 + $0x98] sm:$0xff] %vm2960_vm14, %v2903_v50 }
 0x46f   : > { %3545 = vst.msk [vmem:[#allocation2 + $0x20] sm:$0xff] %vm3540_vm1, %v3453_v24 }
 0x471   : > { %v3595_v54 = vld [vmem:[#allocation2 + $0xa0] sm:$0xff] }
 0x472   : > { %v2871_v23 = vpop.permute.xlu0 %2870  ;;  %v3097_v0 = vpop.permute.xlu1 %3096  ;;  %4486 = vmatprep.subr.msk.mxu0 %vm3607_vm2, %v3595_v54  ;;  %4511 = vmatprep.subr.msk.mxu1 %vm3607_vm2, %v3595_v54 }
 0x473   : > { %2964 = vst.msk [vmem:[#allocation2 + $0x18] sm:$0xff] %vm2960_vm14, %v2871_v23 }
 0x474   : > { %3174 = vst.msk [vmem:[#allocation2 + $0x98] sm:$0xff] %vm3154_vm15, %v3097_v0 }
 0x476   : > { %v2515_v2 = vpop.permute.xlu0 %2514  ;;  %v3065_v59 = vpop.permute.xlu1 %3064  ;;  %v3579_v9 = vld [vmem:[#allocation2 + $0x20] sm:$0xff] }
 0x477   : > { %2593 = vst.msk [vmem:[#allocation2 + $0x90] sm:$0xff] %vm2574_vm12, %v2515_v2  ;;  %4487 = vmatpush3.xpose.msk.msra.mxu0 %vm3607_vm2, %v3579_v9  ;;  %4527 = vmatpush3.xpose.msk.msra.mxu1 %vm3607_vm2, %v3579_v9 }
 0x478   : > { %3158 = vst.msk [vmem:[#allocation2 + $0x18] sm:$0xff] %vm3154_vm15, %v3065_v59 }
 0x47a   : > { %v3290_v43 = vpop.permute.xlu0 %3289  ;;  %v2483_v53 = vpop.permute.xlu1 %2482 }
 0x47b   : > { %3367 = vst.msk [vmem:[#allocation2 + $0x98] sm:$0xff] %vm3347_vm0, %v3290_v43 }
 0x47c   : > { %2577 = vst.msk [vmem:[#allocation2 + $0x10] sm:$0xff] %vm2574_vm12, %v2483_v53 }
 0x47e   : > { %v2708_v39 = vpop.permute.xlu0 %2707  ;;  %v3258_v7 = vpop.permute.xlu1 %3257 }
 0x47f   : > { %2786 = vst.msk [vmem:[#allocation2 + $0x90] sm:$0xff] %vm2767_vm13, %v2708_v39 }
 0x480   : > { %3351 = vst.msk [vmem:[#allocation2 + $0x18] sm:$0xff] %vm3347_vm0, %v3258_v7 }
 0x482   : > { %v3483_v5 = vpop.permute.xlu0 %3482  ;;  %v2676_v48 = vpop.permute.xlu1 %2675 }
 0x483   : > { %3560 = vst.msk [vmem:[#allocation2 + $0x98] sm:$0xff] %vm3540_vm1, %v3483_v5 }
 0x484   : > { %2770 = vst.msk [vmem:[#allocation2 + $0x10] sm:$0xff] %vm2767_vm13, %v2676_v48 }
 0x486   : > { %v2901_v29 = vpop.permute.xlu0 %2900  ;;  %v3451_v36 = vpop.permute.xlu1 %3450 }
 0x487   : > { %2979 = vst.msk [vmem:[#allocation2 + $0x90] sm:$0xff] %vm2960_vm14, %v2901_v29 }
 0x488   : > { %3544 = vst.msk [vmem:[#allocation2 + $0x18] sm:$0xff] %vm3540_vm1, %v3451_v36 }
 0x48a   : > { %v2869_v56 = vpop.permute.xlu0 %2868  ;;  %v3095_v42 = vpop.permute.xlu1 %3094  ;;  %v3594_v57 = vld [vmem:[#allocation2 + $0x98] sm:$0xff] }
 0x48b   : > { %2963 = vst.msk [vmem:[#allocation2 + $0x10] sm:$0xff] %vm2960_vm14, %v2869_v56  ;;  %4488 = vmatprep.subr.msk.mxu0 %vm3607_vm2, %v3594_v57  ;;  %4512 = vmatprep.subr.msk.mxu1 %vm3607_vm2, %v3594_v57 }
 0x48c   : > { %3173 = vst.msk [vmem:[#allocation2 + $0x90] sm:$0xff] %vm3154_vm15, %v3095_v42 }
 0x48e   : > { %v2513_v49 = vpop.permute.xlu0 %2512  ;;  %v3063_v28 = vpop.permute.xlu1 %3062 }
 0x48f   : > { %v3578_v60 = vld [vmem:[#allocation2 + $0x18] sm:$0xff]  ;;  %2592 = vst.msk [vmem:[#allocation2 + $0x88] sm:$0xff] %vm2574_vm12, %v2513_v49 }
 0x490   : > { %3157 = vst.msk [vmem:[#allocation2 + $0x10] sm:$0xff] %vm3154_vm15, %v3063_v28  ;;  %4489 = vmatpush3.xpose.msk.msra.mxu0 %vm3607_vm2, %v3578_v60  ;;  %4528 = vmatpush3.xpose.msk.msra.mxu1 %vm3607_vm2, %v3578_v60 }
 0x492   : > { %v3288_v45 = vpop.permute.xlu0 %3287  ;;  %v2481_v6 = vpop.permute.xlu1 %2480 }
 0x493   : > { %3366 = vst.msk [vmem:[#allocation2 + $0x90] sm:$0xff] %vm3347_vm0, %v3288_v45 }
 0x494   : > { %2576 = vst.msk [vmem:[#allocation2 + $0x8] sm:$0xff] %vm2574_vm12, %v2481_v6 }
 0x496   : > { %v2706_v20 = vpop.permute.xlu0 %2705  ;;  %v3256_v21 = vpop.permute.xlu1 %3255 }
 0x497   : > { %2785 = vst.msk [vmem:[#allocation2 + $0x88] sm:$0xff] %vm2767_vm13, %v2706_v20 }
 0x498   : > { %3350 = vst.msk [vmem:[#allocation2 + $0x10] sm:$0xff] %vm3347_vm0, %v3256_v21 }
 0x49a   : > { %v3481_v35 = vpop.permute.xlu0 %3480  ;;  %v2674_v18 = vpop.permute.xlu1 %2673 }
 0x49b   : > { %3559 = vst.msk [vmem:[#allocation2 + $0x90] sm:$0xff] %vm3540_vm1, %v3481_v35 }
 0x49c   : > { %2769 = vst.msk [vmem:[#allocation2 + $0x8] sm:$0xff] %vm2767_vm13, %v2674_v18 }
 0x49e   : > { %v2899_v47 = vpop.permute.xlu0 %2898  ;;  %v3449_v1 = vpop.permute.xlu1 %3448 }
 0x49f   : > { %2978 = vst.msk [vmem:[#allocation2 + $0x88] sm:$0xff] %vm2960_vm14, %v2899_v47 }
 0x4a0   : > { %3543 = vst.msk [vmem:[#allocation2 + $0x10] sm:$0xff] %vm3540_vm1, %v3449_v1 }
 0x4a2   : > { %v2867_v38 = vpop.permute.xlu0 %2866  ;;  %v3093_v3 = vpop.permute.xlu1 %3092  ;;  %v3593_v16 = vld [vmem:[#allocation2 + $0x90] sm:$0xff] }
 0x4a3   : > { %2962 = vst.msk [vmem:[#allocation2 + $0x8] sm:$0xff] %vm2960_vm14, %v2867_v38  ;;  %4490 = vmatprep.subr.msk.mxu0 %vm3607_vm2, %v3593_v16  ;;  %4513 = vmatprep.subr.msk.mxu1 %vm3607_vm2, %v3593_v16 }
 0x4a4   : > { %3172 = vst.msk [vmem:[#allocation2 + $0x88] sm:$0xff] %vm3154_vm15, %v3093_v3 }
 0x4a6   : > { %v2511_v15 = vpop.permute.xlu0 %2510  ;;  %v3061_v61 = vpop.permute.xlu1 %3060 }
 0x4a7   : > { %v3577_v26 = vld [vmem:[#allocation2 + $0x10] sm:$0xff]  ;;  %2591 = vst.msk [vmem:[#allocation2 + $0x80] sm:$0xff] %vm2574_vm12, %v2511_v15 }
 0x4a8   : > { %3156 = vst.msk [vmem:[#allocation2 + $0x8] sm:$0xff] %vm3154_vm15, %v3061_v61  ;;  %4491 = vmatpush3.xpose.msk.msra.mxu0 %vm3607_vm2, %v3577_v26  ;;  %4529 = vmatpush3.xpose.msk.msra.mxu1 %vm3607_vm2, %v3577_v26 }
 0x4aa   : > { %v3286_v37 = vpop.permute.xlu0 %3285  ;;  %v2704_v10 = vpop.permute.xlu1 %2703 }
 0x4ab   : > { %3365 = vst.msk [vmem:[#allocation2 + $0x88] sm:$0xff] %vm3347_vm0, %v3286_v37 }
 0x4ac   : > { %2784 = vst.msk [vmem:[#allocation2 + $0x80] sm:$0xff] %vm2767_vm13, %v2704_v10 }
 0x4ae   : > { %v3254_v55 = vpop.permute.xlu0 %3253  ;;  %v3479_v32 = vpop.permute.xlu1 %3478 }
 0x4af   : > { %3349 = vst.msk [vmem:[#allocation2 + $0x8] sm:$0xff] %vm3347_vm0, %v3254_v55 }
 0x4b0   : > { %3558 = vst.msk [vmem:[#allocation2 + $0x88] sm:$0xff] %vm3540_vm1, %v3479_v32 }
 0x4b2   : > { %v2672_v22 = vpop.permute.xlu0 %2671  ;;  %v2897_v13 = vpop.permute.xlu1 %2896 }
 0x4b3   : > { %2768 = vst.msk [vmem:[#allocation2] sm:$0xff] %vm2767_vm13, %v2672_v22 }
 0x4b4   : > { %2977 = vst.msk [vmem:[#allocation2 + $0x80] sm:$0xff] %vm2960_vm14, %v2897_v13 }
 0x4b6   : > { %v3447_v19 = vpop.permute.xlu0 %3446  ;;  %v2865_v11 = vpop.permute.xlu1 %2864 }
 0x4b7   : > { %v3592_v17 = vld [vmem:[#allocation2 + $0x88] sm:$0xff]  ;;  %3542 = vst.msk [vmem:[#allocation2 + $0x8] sm:$0xff] %vm3540_vm1, %v3447_v19 }
 0x4b8   : > { %2961 = vst.msk [vmem:[#allocation2] sm:$0xff] %vm2960_vm14, %v2865_v11  ;;  %4492 = vmatprep.subr.msk.mxu0 %vm3607_vm2, %v3592_v17  ;;  %4514 = vmatprep.subr.msk.mxu1 %vm3607_vm2, %v3592_v17 }
 0x4ba   : > { %v3091_v31 = vpop.permute.xlu0 %3090  ;;  %v3059_v40 = vpop.permute.xlu1 %3058 }
 0x4bb   : > { %3171 = vst.msk [vmem:[#allocation2 + $0x80] sm:$0xff] %vm3154_vm15, %v3091_v31  ;;  %3155 = vst.msk [vmem:[#allocation2] sm:$0xff] %vm3154_vm15, %v3059_v40 }
 0x4be   : > { %v3284_v4 = vpop.permute.xlu0 %3283  ;;  %v3252_v30 = vpop.permute.xlu1 %3251  ;;  %v3576_v63 = vld [vmem:[#allocation2 + $0x8] sm:$0xff] }
 0x4bf   : > { %3364 = vst.msk [vmem:[#allocation2 + $0x80] sm:$0xff] %vm3347_vm0, %v3284_v4  ;;  %3348 = vst.msk [vmem:[#allocation2] sm:$0xff] %vm3347_vm0, %v3252_v30  ;;  %4493 = vmatpush3.xpose.msk.msra.mxu0 %vm3607_vm2, %v3576_v63  ;;  %4530 = vmatpush3.xpose.msk.msra.mxu1 %vm3607_vm2, %v3576_v63 }
 0x4c2   : > { %v3477_v46 = vpop.permute.xlu0 %3476  ;;  %v3445_v25 = vpop.permute.xlu1 %3444 }
 0x4c3   : > { %3557 = vst.msk [vmem:[#allocation2 + $0x80] sm:$0xff] %vm3540_vm1, %v3477_v46  ;;  %3541 = vst.msk [vmem:[#allocation2] sm:$0xff] %vm3540_vm1, %v3445_v25 }
 0x4ca   : > { %v3591_v27 = vld [vmem:[#allocation2 + $0x80] sm:$0xff] }
 0x4cb   : > { %v3575_v14 = vld [vmem:[#allocation2] sm:$0xff]  ;;  %4494 = vmatprep.subr.msk.mxu0 %vm3607_vm2, %v3591_v27  ;;  %4515 = vmatprep.subr.msk.mxu1 %vm3607_vm2, %v3591_v27 }
 0x4cc   : > { %4495 = vmatpush3.xpose.msk.msra.mxu0 %vm3607_vm2, %v3575_v14  ;;  %4531 = vmatpush3.xpose.msk.msra.mxu1 %vm3607_vm2, %v3575_v14 }
 0x4cf   : > { %4497 = vmatmul.mubr.msk.f32.vlgmr.msra.gmra.mxu0 %vm3607_vm2, %v6890_v12  ;;  %4499 = vmatmul.mubr.msk.f32.vlgmr.msra.gmra.mxu1 %vm3607_vm2, %v6900_v8 }
 0x58f   : > { %v3776_v41 = vpop.f32.mrf.mxu0  ;;  %v3782_v44 = vpop.f32.mrf.mxu1 }
 0x590   : > { %3787 = vst [vmem:[%s212_s21] sm:$0xff] %v3776_v41  ;;  %3789 = vst [vmem:[%s212_s21 + $0x10] sm:$0xff] %v3782_v44  ;;  %v3800_v62 = vmul.f32 %v3776_v41, %v3776_v41  ;;  %v3802_v51 = vmul.f32 %v3782_v44, %v3782_v44 }
 0x591   : > { %v3778_v58 = vpop.f32.mrf.mxu0  ;;  %v3784_v34 = vpop.f32.mrf.mxu1 }
 0x592   : > { %3788 = vst [vmem:[%s212_s21 + $0x8] sm:$0xff] %v3778_v58  ;;  %v3791_v33 = vadd.f32 %v3778_v58, %v3776_v41  ;;  %v3801_v52 = vmul.f32 %v3778_v58, %v3778_v58  ;;  %3790 = vst [vmem:[%s212_s21 + $0x18] sm:$0xff] %v3784_v34  ;;  %v3794_v12 = vadd.f32 %v3784_v34, %v3782_v44 }
 0x593   : > { %v3803_v50 = vmul.f32 %v3784_v34, %v3784_v34 }
 0x594   : > { %3792 = vadd.xlane.f32.xlu0 %v3791_v33  ;;  %3795 = vadd.xlane.f32.xlu1 %v3794_v12  ;;  %v3804_v8 = vadd.f32 %v3801_v52, %v3800_v62 }
 0x595   : > { %v3807_v24 = vadd.f32 %v3803_v50, %v3802_v51 }
 0x598   : > { %3805 = vadd.xlane.f32.xlu0 %v3804_v8 }
 0x59c   : > { %3808 = vadd.xlane.f32.xlu0 %v3807_v24 }
 0x61d   : > { %v3793_v23 = vpop.xlane.xlu0 %3792  ;;  %v3796_v0 = vpop.xlane.xlu1 %3795 }
 0x61e   : > { %3798 = vst.msk [vmem:[%s217_s25] sm:$0xff] %vm3797_vm3, %v3793_v23  ;;  %3799 = vst.msk [vmem:[%s217_s25 + $0x8] sm:$0xff] %vm3797_vm3, %v3796_v0 }
 0x621   : > { %v3806_v54 = vpop.xlane.xlu0 %3805 }
 0x622   : > { %3810 = vst.msk [vmem:[%s222_s28] sm:$0xff] %vm3797_vm3, %v3806_v54 }
 0x625   : > { %v3809_v2 = vpop.xlane.xlu0 %3808 }
 0x626   : > { %3811 = vst.msk [vmem:[%s222_s28 + $0x8] sm:$0xff] %vm3797_vm3, %v3809_v2 }
 0x627 PF: > { %s15_s15 = sadd.s32 1, %s4564_s15  }
 0x628   : > { %p12_p4 = scmp.ge.s32.totalorder %s15_s15, 4  }
 0x62a   :  { %14 = sbr.rel (!%p12_p4) target bundleno = 1 (0x1), region = 86 }

</bundles_post_ra>
